<compile_context>
chip_gen: v5e
topology: v5e:2x2
jax: 0.10.0
libtpu: 0.0.40
codegen_flags: <defaults>
</compile_context>

<pallas_src>
import functools
import math

import numpy as np
import jax
import jax.numpy as jnp
from jax import lax
from jax.experimental import pallas as pl
from jax.experimental.pallas import tpu as pltpu

# ----------------------------- configuration -------------------------------
T_TRAIN = 1000          # num_train_timesteps
BETA_START = 1e-4
BETA_END = 2e-2
T_EMB = 32              # sinusoidal timestep-embedding width
TEMB_HID = 128          # time-embedding MLP hidden width
C_MID = 128             # surrogate UNet hidden channels (full MXU lane width)


# ============================ Pallas kernels =================================
# ---- fully fused surrogate-UNet step (+ DDIM epilogue), one batch element ---
def _fused_unet_kernel(emb_ref, xcol_ref, samp_ref, coef_ref,
                       tw1_ref, tb1_ref, tw2_ref, tb2_ref,
                       w1_ref, b1_ref,
                       wq_ref, wk_ref, wv_ref, wo_ref,
                       w2t_ref, b2_ref,
                       o_ref, spad_ref, *, H, W):
    L = H * W
    cout = o_ref.shape[1]

    # ---- time-embedding MLP (fused) ----------------------------------------
    emb = emb_ref[0].astype(jnp.bfloat16)                          # [1, T_EMB]
    t1 = jnp.dot(emb, tw1_ref[...],
                 preferred_element_type=jnp.float32) + tb1_ref[...]
    t1 = t1 * (1.0 / (1.0 + jnp.exp(-t1)))                         # SiLU (f32)
    temb = jnp.dot(t1.astype(jnp.bfloat16), tw2_ref[...],
                   preferred_element_type=jnp.float32) + tb2_ref[...]   # [1,C]

    # ---- conv1: ONE K=9*Cin matmul (im2col built lane-dense in the wrapper) -
    h1 = jnp.dot(xcol_ref[0], w1_ref[...],
                 preferred_element_type=jnp.float32)               # [L, C]
    h1 = h1 + b1_ref[...] + temb
    h1 = h1 * (1.0 / (1.0 + jnp.exp(-h1)))                         # SiLU

    # ---- spatial self-attention (q/k/v lane-aligned; scale folded into wq) --
    hb = h1.astype(jnp.bfloat16)
    q = jnp.dot(hb, wq_ref[...], preferred_element_type=jnp.float32)
    k = jnp.dot(hb, wk_ref[...], preferred_element_type=jnp.float32)
    v = jnp.dot(hb, wv_ref[...], preferred_element_type=jnp.float32)
    s = lax.dot_general(q.astype(jnp.bfloat16), k.astype(jnp.bfloat16),
                        (((1,), (1,)), ((), ())),
                        preferred_element_type=jnp.float32)        # [L, L]
    s = s - jnp.max(s, axis=-1, keepdims=True)
    p = jnp.exp(s)
    p = p * pl.reciprocal(jnp.sum(p, axis=-1, keepdims=True), approx=False)
    a = jnp.dot(p.astype(jnp.bfloat16), v.astype(jnp.bfloat16),
                preferred_element_type=jnp.float32)
    attn = jnp.dot(a.astype(jnp.bfloat16), wo_ref[...],
                   preferred_element_type=jnp.float32)
    h2 = h1 + attn                                                 # residual

    # ---- conv2 via flat-padded VMEM scratch, lane-dense [Cout, L] output ----
    # spad holds h2 (flattened rows) with W+1 zero rows of padding on each
    # side; the 9 shifted windows are contiguous row slices of spad, with two
    # cheap per-row masks handling the left/right image borders.
    spad_ref[...] = jnp.zeros_like(spad_ref)
    spad_ref[W + 1:W + 1 + L, :] = h2
    ridx = lax.broadcasted_iota(jnp.int32, (L, 1), 0)
    if (W & (W - 1)) == 0:
        xpos = jnp.bitwise_and(ridx, W - 1)
    else:
        xpos = ridx % W
    acc = jnp.zeros((cout, L), jnp.float32)
    for dy in range(3):
        for dx in range(3):
            off = W + 1 + (dy - 1) * W + (dx - 1)
            slab = spad_ref[off:off + L, :]                        # [L, C]
            if dx == 0:
                slab = jnp.where(xpos != 0, slab, 0.0)
            elif dx == 2:
                slab = jnp.where(xpos != W - 1, slab, 0.0)
            acc = acc + lax.dot_general(
                w2t_ref[dy * 3 + dx], slab.astype(jnp.bfloat16),
                (((1,), (1,)), ((), ())),
                preferred_element_type=jnp.float32)                # [Cout, L]
    pred = acc + b2_ref[...]                                       # [Cout, L]

    # ---- fused DDIM-step epilogue: o = c0 * sample + c1 * eps ---------------
    cvec = coef_ref[0]                                             # [1, 2]
    c0 = cvec[:, 0:1]
    c1 = cvec[:, 1:2]
    o_ref[0] = c0 * samp_ref[0] + c1 * pred


def fused_unet_step(params, x_t_nchw, emb, sample_flat, coefs):
    """One surrogate-UNet evaluation + DDIM-step epilogue.

    x_t_nchw:    [B, Cin, H, W] f32
    emb:         [B, T_EMB]     f32
    sample_flat: [B, Cout, H*W] f32  (pass zeros + coefs=(0,1) to get raw eps)
    coefs:       [2]            f32  (c0, c1)
    Returns [B, Cout, H*W] f32 = c0*sample + c1*UNet(x_t, emb).
    """
    B, cin, H, W = x_t_nchw.shape
    L = H * W
    cout = sample_flat.shape[1]

    # conv1 im2col in the wrapper: Cin is tiny, so the 9x HBM blow-up is
    # negligible and the kernel sees a lane-dense [L, 9*Cin] bf16 operand.
    x_nhwc = jnp.transpose(x_t_nchw, (0, 2, 3, 1)).astype(jnp.float32)
    xp = jnp.pad(x_nhwc, ((0, 0), (1, 1), (1, 1), (0, 0)))
    cols = [xp[:, dy:dy + H, dx:dx + W, :] for dy in range(3) for dx in range(3)]
    x_col = jnp.concatenate(cols, axis=-1).reshape(B, L, 9 * cin)
    x_col = x_col.astype(jnp.bfloat16)

    emb3 = emb.reshape(B, 1, T_EMB).astype(jnp.float32)
    coef3 = coefs.reshape(1, 1, 2).astype(jnp.float32)
    samp3 = sample_flat.reshape(B, cout, L).astype(jnp.float32)

    kern = functools.partial(_fused_unet_kernel, H=H, W=W)
    return pl.pallas_call(
        kern,
        out_shape=jax.ShapeDtypeStruct((B, cout, L), jnp.float32),
        grid=(B,),
        in_specs=[
            pl.BlockSpec((1, 1, T_EMB), lambda b: (b, 0, 0)),        # emb
            pl.BlockSpec((1, L, 9 * cin), lambda b: (b, 0, 0)),      # x_col
            pl.BlockSpec((1, cout, L), lambda b: (b, 0, 0)),         # sample
            pl.BlockSpec((1, 1, 2), lambda b: (0, 0, 0)),            # coefs
            pl.BlockSpec((T_EMB, TEMB_HID), lambda b: (0, 0)),       # temb_w1
            pl.BlockSpec((1, TEMB_HID), lambda b: (0, 0)),           # temb_b1
            pl.BlockSpec((TEMB_HID, C_MID), lambda b: (0, 0)),       # temb_w2
            pl.BlockSpec((1, C_MID), lambda b: (0, 0)),              # temb_b2
            pl.BlockSpec((9 * cin, C_MID), lambda b: (0, 0)),        # conv1_w_r
            pl.BlockSpec((1, C_MID), lambda b: (0, 0)),              # conv1_b
            pl.BlockSpec((C_MID, C_MID), lambda b: (0, 0)),          # wq
            pl.BlockSpec((C_MID, C_MID), lambda b: (0, 0)),          # wk
            pl.BlockSpec((C_MID, C_MID), lambda b: (0, 0)),          # wv
            pl.BlockSpec((C_MID, C_MID), lambda b: (0, 0)),          # wo
            pl.BlockSpec((9, cout, C_MID), lambda b: (0, 0, 0)),     # conv2_w_t
            pl.BlockSpec((cout, 1), lambda b: (0, 0)),               # conv2_b
        ],
        out_specs=pl.BlockSpec((1, cout, L), lambda b: (b, 0, 0)),
        scratch_shapes=[pltpu.VMEM((L + 2 * W + 2, C_MID), jnp.float32)],
        compiler_params=pltpu.CompilerParams(dimension_semantics=("parallel",)),
    )(emb3, x_col, samp3, coef3,
      params["temb_w1"], params["temb_b1"], params["temb_w2"], params["temb_b2"],
      params["conv1_w_r"], params["conv1_b"],
      params["wq"], params["wk"], params["wv"], params["wo"],
      params["conv2_w_t"], params["conv2_b"])


# ---- MSE reduction: resident (1,128) VMEM lane accumulator ------------------
def _mse_kernel(p_ref, t_ref, o_ref):
    @pl.when(pl.program_id(0) == 0)
    def _():
        o_ref[...] = jnp.zeros_like(o_ref)
    d = p_ref[...] - t_ref[...]
    o_ref[...] += jnp.sum(d * d, axis=0, keepdims=True)


def pallas_mse(pred, target):
    n = pred.size
    pf = pred.reshape(-1).astype(jnp.float32)
    tf = target.reshape(-1).astype(jnp.float32)
    pad = (-n) % 1024
    if pad:
        pf = jnp.concatenate([pf, jnp.zeros((pad,), jnp.float32)])
        tf = jnp.concatenate([tf, jnp.zeros((pad,), jnp.float32)])
    R = (n + pad) // 128
    # largest row tile (<= 2048, multiple of 8) dividing R
    TR = 8
    cand = 8
    while cand <= min(R, 2048):
        if R % cand == 0:
            TR = cand
        cand += 8
    lane_sums = pl.pallas_call(
        _mse_kernel,
        out_shape=jax.ShapeDtypeStruct((1, 128), jnp.float32),
        grid=(R // TR,),
        in_specs=[pl.BlockSpec((TR, 128), lambda i: (i, 0)),
                  pl.BlockSpec((TR, 128), lambda i: (i, 0))],
        out_specs=pl.BlockSpec((1, 128), lambda i: (0, 0)),
        # must stay sequential: the output block is a resident accumulator
        compiler_params=pltpu.CompilerParams(dimension_semantics=("arbitrary",)),
    )(pf.reshape(R, 128), tf.reshape(R, 128))
    return jnp.sum(lane_sums) / n


# ======================= DDIM scheduler (host-side math) =====================
def make_alphas_cumprod_np():
    betas = np.linspace(BETA_START ** 0.5, BETA_END ** 0.5, T_TRAIN,
                        dtype=np.float64) ** 2            # scaled_linear
    return np.cumprod(1.0 - betas).astype(np.float32)


def trailing_timesteps(num_inference_steps):
    step_ratio = T_TRAIN / num_inference_steps
    return np.round(np.arange(T_TRAIN, 0, -step_ratio)).astype(np.int64) - 1


def ddim_coef_table(acp, timesteps, num_inference_steps):
    """Deterministic DDIM step coefficients (eta=0, epsilon pred, alpha_final=1)."""
    coefs = []
    for t in timesteps:
        prev_t = int(t) - T_TRAIN // num_inference_steps
        a_t = float(acp[int(t)])
        a_prev = float(acp[prev_t]) if prev_t >= 0 else 1.0
        c0 = math.sqrt(a_prev / a_t)
        c1 = (math.sqrt(1.0 - a_prev)
              - math.sqrt(a_prev) * math.sqrt(1.0 - a_t) / math.sqrt(a_t))
        coefs.append((c0, c1))
    return np.asarray(coefs, np.float32)                   # [S, 2]


def sinusoidal_emb(timesteps):
    half = T_EMB // 2
    freqs = np.exp(-math.log(10000.0) * np.arange(half, dtype=np.float64) / half)
    ang = np.asarray(timesteps, np.float64)[:, None] * freqs[None, :]
    return np.concatenate([np.sin(ang), np.cos(ang)], axis=-1).astype(np.float32)


# =========================== surrogate UNet params ===========================
def init_unet_params(key, in_ch, out_ch):
    ks = jax.random.split(key, 8)
    w = lambda k, shp, s: jax.random.normal(k, shp, jnp.float32) * s
    conv1_w = w(ks[0], (3, 3, in_ch, C_MID), 0.1)           # HWIO
    conv2_w = w(ks[1], (3, 3, C_MID, out_ch), 0.05)
    # fold the attention 1/sqrt(C) scale into wq at init: zero runtime cost
    wq = w(ks[2], (C_MID, C_MID), 0.05) * (1.0 / math.sqrt(C_MID))
    wk = w(ks[3], (C_MID, C_MID), 0.05)
    wv = w(ks[4], (C_MID, C_MID), 0.05)
    wo = w(ks[5], (C_MID, C_MID), 0.05)
    return {
        "temb_w1": w(ks[6], (T_EMB, TEMB_HID), 0.1).astype(jnp.bfloat16),
        "temb_b1": jnp.zeros((1, TEMB_HID), jnp.float32),
        "temb_w2": w(ks[7], (TEMB_HID, C_MID), 0.1).astype(jnp.bfloat16),
        "temb_b2": jnp.zeros((1, C_MID), jnp.float32),
        # pre-reshaped / pre-cast bf16 weights for the MXU kernel
        "conv1_w_r": conv1_w.reshape(9 * in_ch, C_MID).astype(jnp.bfloat16),
        "conv1_b": jnp.zeros((1, C_MID), jnp.float32),
        "wq": wq.astype(jnp.bfloat16),
        "wk": wk.astype(jnp.bfloat16),
        "wv": wv.astype(jnp.bfloat16),
        "wo": wo.astype(jnp.bfloat16),
        # conv2 weight transposed per tap -> [9, Cout, C] for the lane-dense
        # [Cout, H*W] output orientation
        "conv2_w_t": conv2_w.reshape(9, C_MID, out_ch)
                            .transpose(0, 2, 1).astype(jnp.bfloat16),
        "conv2_b": jnp.zeros((out_ch, 1), jnp.float32),
    }


# ================================ DDPM =======================================
class DDPMPallas:
    def __init__(self, params, aconc, weather, *, channels, layers,
                 batch_size, ddimsteps, R2, multistep):
        self.params = params
        self.aconc = jnp.asarray(aconc, jnp.float32)
        self.weather = jnp.asarray(weather, jnp.float32)
        self.channels = channels
        self.layers = layers
        self.batch_size = batch_size
        self.ddimsteps = ddimsteps
        _, _, self.H, self.W = self.aconc.shape
        self.HW = self.H * self.W

        acp = make_alphas_cumprod_np()

        # training-time static tables (timesteps are static -> precompute)
        train_ts = np.linspace(0, 999, batch_size).astype(np.int64)
        self.train_emb = jnp.asarray(sinusoidal_emb(train_ts))          # [B,T_EMB]
        self.sqrt_a = jnp.asarray(np.sqrt(acp[train_ts]), jnp.float32)
        self.sqrt_1ma = jnp.asarray(np.sqrt(1.0 - acp[train_ts]), jnp.float32)

        # sampling-time static tables (trailing spacing, eta=0)
        samp_ts = trailing_timesteps(ddimsteps)
        S = len(samp_ts)
        self.coef_tab = jnp.asarray(ddim_coef_table(acp, samp_ts, ddimsteps))
        emb_s = sinusoidal_emb(samp_ts)                                 # [S,T_EMB]
        self.samp_emb = jnp.asarray(
            np.broadcast_to(emb_s[:, None, :], (S, batch_size, T_EMB)).copy())
        self.identity_coefs = jnp.asarray([0.0, 1.0], jnp.float32)

        self.weights = jnp.asarray(self._W(np.asarray(R2[:multistep], np.float32)))
        self._jit_cache = {}

    @staticmethod
    def _W(R2):
        R2n = (R2 - R2.min()) / (R2.max() - R2.min())
        w = 1.0 - R2n
        return w / w.sum()

    # ---------------- jitted forward (training loss + DDIM sampling) ---------
    def _forward_impl(self, x, batch_count, *, multistep):
        B = self.batch_size
        loss_batch = jnp.float32(0.0)
        for step in range(multistep):                 # static, small
            x = x.astype(jnp.float32)
            start = batch_count * B + step

            weather_blk = lax.dynamic_slice_in_dim(self.weather, start, B, axis=0)
            x_tt_aconc = lax.dynamic_slice_in_dim(self.aconc, start + 1, B, axis=0)
            noise = x
            # add_noise as a jnp prologue (launch cost >> compute at this size)
            noised_xtt = (self.sqrt_a[:, None, None, None] * x_tt_aconc
                          + self.sqrt_1ma[:, None, None, None] * noise)
            x_t = jnp.concatenate([noised_xtt, weather_blk], axis=1)

            # identity epilogue (c0=0, c1=1) -> raw epsilon prediction
            zero_samp = jnp.zeros((B, self.layers, self.HW), jnp.float32)
            pred_flat = fused_unet_step(self.params, x_t, self.train_emb,
                                        zero_samp, self.identity_coefs)
            mse = pallas_mse(pred_flat, noise.reshape(B, self.layers, self.HW))
            loss_batch = loss_batch + self.weights[step] * mse

            # DDIM reverse sampling loop as a lax.scan (trailing spacing, eta=0)
            x_cur = lax.dynamic_slice_in_dim(self.aconc, start, B, axis=0)

            def samp_step(carry, xs):
                emb_b, coefs = xs
                all_var = jnp.concatenate([carry, weather_blk], axis=1)
                nxt = fused_unet_step(self.params, all_var, emb_b,
                                      carry.reshape(B, self.layers, self.HW),
                                      coefs)
                return nxt.reshape(carry.shape), None

            x_cur, _ = lax.scan(samp_step, x_cur, (self.samp_emb, self.coef_tab))
            x = x_cur
        return loss_batch

    def forward(self, x, batch_count, multistep):
        if multistep not in self._jit_cache:
            self._jit_cache[multistep] = jax.jit(
                functools.partial(self._forward_impl, multistep=multistep))
        return self._jit_cache[multistep](jnp.asarray(x, jnp.float32),
                                          jnp.asarray(batch_count, jnp.int32))


# ================================= main ======================================
if __name__ == "__main__":
    key = jax.random.PRNGKey(0)
    k_aconc, k_weather, k_x, k_params = jax.random.split(key, 4)

    BATCH = 2          # args.batch_size
    LAYERS = 2         # args.layers   (UNet out_channels)
    CHANNELS = 4       # args.channels (UNet in_channels)
    H = W = 16         # small spatial size (reference uses sample_size=128)
    MULTISTEP = 2
    DDIMSTEPS = 4
    N_TOTAL = 8        # enough rows of aconc/weather for start+1:end+1

    aconc = jax.random.normal(k_aconc, (N_TOTAL, LAYERS, H, W), jnp.float32)
    weather = jax.random.normal(k_weather, (N_TOTAL, CHANNELS - LAYERS, H, W),
                                jnp.float32)
    x = jax.random.normal(k_x, (BATCH, LAYERS, H, W), jnp.float32)

    params = init_unet_params(k_params, CHANNELS, LAYERS)

    model = DDPMPallas(params, aconc, weather,
                       channels=CHANNELS, layers=LAYERS,
                       batch_size=BATCH, ddimsteps=DDIMSTEPS,
                       R2=[0.3, 0.8], multistep=MULTISTEP)

    loss = model.forward(x, batch_count=0, multistep=MULTISTEP)
    jax.block_until_ready(loss)
    assert jnp.isfinite(loss)
    print("KERNEL_OK")
</pallas_src>

<mosaic_0001>
module attributes {stable_mosaic.version = 11 : i64} {
  func.func @_fused_unet_kernel(%arg0: i32, %arg1: memref<1x1x32xf32, #tpu.memory_space<vmem>>, %arg2: memref<1x256x36xbf16, #tpu.memory_space<vmem>>, %arg3: memref<1x2x256xf32, #tpu.memory_space<vmem>>, %arg4: memref<1x1x2xf32, #tpu.memory_space<vmem>>, %arg5: memref<32x128xbf16, #tpu.memory_space<vmem>>, %arg6: memref<1x128xf32, #tpu.memory_space<vmem>>, %arg7: memref<128x128xbf16, #tpu.memory_space<vmem>>, %arg8: memref<1x128xf32, #tpu.memory_space<vmem>>, %arg9: memref<36x128xbf16, #tpu.memory_space<vmem>>, %arg10: memref<1x128xf32, #tpu.memory_space<vmem>>, %arg11: memref<128x128xbf16, #tpu.memory_space<vmem>>, %arg12: memref<128x128xbf16, #tpu.memory_space<vmem>>, %arg13: memref<128x128xbf16, #tpu.memory_space<vmem>>, %arg14: memref<128x128xbf16, #tpu.memory_space<vmem>>, %arg15: memref<9x2x128xbf16, #tpu.memory_space<vmem>>, %arg16: memref<2x1xf32, #tpu.memory_space<vmem>>, %arg17: memref<1x2x256xf32, #tpu.memory_space<vmem>>, %arg18: memref<290x128xf32, #tpu.memory_space<vmem>>) attributes {dimension_semantics = [#tpu.dimension_semantics<parallel>], iteration_bounds = array<i64: 2>, scalar_prefetch = 0 : i64, scratch_operands = 1 : i64, tpu.core_type = #tpu.core_type<tc>, window_params = [{transform_indices = @transform_0, window_bounds = array<i64: 1, 1, 32>}, {transform_indices = @transform_1, window_bounds = array<i64: 1, 256, 36>}, {transform_indices = @transform_2, window_bounds = array<i64: 1, 2, 256>}, {pipeline_mode = #tpu.pipeline_mode<synchronous>, transform_indices = @transform_3, window_bounds = array<i64: 1, 1, 2>}, {pipeline_mode = #tpu.pipeline_mode<synchronous>, transform_indices = @transform_4, window_bounds = array<i64: 32, 128>}, {pipeline_mode = #tpu.pipeline_mode<synchronous>, transform_indices = @transform_5, window_bounds = array<i64: 1, 128>}, {pipeline_mode = #tpu.pipeline_mode<synchronous>, transform_indices = @transform_6, window_bounds = array<i64: 128, 128>}, {pipeline_mode = #tpu.pipeline_mode<synchronous>, transform_indices = @transform_7, window_bounds = array<i64: 1, 128>}, {pipeline_mode = #tpu.pipeline_mode<synchronous>, transform_indices = @transform_8, window_bounds = array<i64: 36, 128>}, {pipeline_mode = #tpu.pipeline_mode<synchronous>, transform_indices = @transform_9, window_bounds = array<i64: 1, 128>}, {pipeline_mode = #tpu.pipeline_mode<synchronous>, transform_indices = @transform_10, window_bounds = array<i64: 128, 128>}, {pipeline_mode = #tpu.pipeline_mode<synchronous>, transform_indices = @transform_11, window_bounds = array<i64: 128, 128>}, {pipeline_mode = #tpu.pipeline_mode<synchronous>, transform_indices = @transform_12, window_bounds = array<i64: 128, 128>}, {pipeline_mode = #tpu.pipeline_mode<synchronous>, transform_indices = @transform_13, window_bounds = array<i64: 128, 128>}, {pipeline_mode = #tpu.pipeline_mode<synchronous>, transform_indices = @transform_14, window_bounds = array<i64: 9, 2, 128>}, {pipeline_mode = #tpu.pipeline_mode<synchronous>, transform_indices = @transform_15, window_bounds = array<i64: 2, 1>}, {transform_indices = @transform_16, window_bounds = array<i64: 1, 2, 256>}]} {
    %c0 = arith.constant 0 : index
    %c0_0 = arith.constant 0 : index
    %c0_1 = arith.constant 0 : index
    %0 = vector.load %arg1[%c0, %c0_0, %c0_1] : memref<1x1x32xf32, #tpu.memory_space<vmem>>, vector<1x1x32xf32>
    %1 = vector.shape_cast %0 : vector<1x1x32xf32> to vector<1x32xf32>
    %2 = arith.truncf %1 : vector<1x32xf32> to vector<1x32xbf16>
    %c0_2 = arith.constant 0 : index
    %c0_3 = arith.constant 0 : index
    %3 = vector.load %arg5[%c0_2, %c0_3] : memref<32x128xbf16, #tpu.memory_space<vmem>>, vector<32x128xbf16>
    %cst = arith.constant dense<0.000000e+00> : vector<1x128xf32>
    %4 = tpu.matmul %2, %3, %cst {dimension_numbers = #tpu.dot_dimension_numbers<[1], [0], [0], [1], [0, 0, 1, 1], [], []>} : vector<1x32xbf16>, vector<32x128xbf16>, vector<1x128xf32> -> vector<1x128xf32>
    %c0_4 = arith.constant 0 : index
    %c0_5 = arith.constant 0 : index
    %5 = vector.load %arg6[%c0_4, %c0_5] : memref<1x128xf32, #tpu.memory_space<vmem>>, vector<1x128xf32>
    %6 = arith.addf %4, %5 : vector<1x128xf32>
    %cst_6 = arith.constant 0.000000e+00 : f32
    %7 = vector.broadcast %cst_6 : f32 to vector<1x128xf32>
    %8 = arith.subf %7, %6 : vector<1x128xf32>
    %9 = math.exp %8 : vector<1x128xf32>
    %cst_7 = arith.constant 1.000000e+00 : f32
    %10 = vector.broadcast %cst_7 : f32 to vector<1x128xf32>
    %11 = arith.addf %10, %9 : vector<1x128xf32>
    %cst_8 = arith.constant 1.000000e+00 : f32
    %12 = vector.broadcast %cst_8 : f32 to vector<1x128xf32>
    %13 = arith.divf %12, %11 : vector<1x128xf32>
    %14 = arith.mulf %6, %13 : vector<1x128xf32>
    %15 = arith.truncf %14 : vector<1x128xf32> to vector<1x128xbf16>
    %c0_9 = arith.constant 0 : index
    %c0_10 = arith.constant 0 : index
    %16 = vector.load %arg7[%c0_9, %c0_10] : memref<128x128xbf16, #tpu.memory_space<vmem>>, vector<128x128xbf16>
    %cst_11 = arith.constant dense<0.000000e+00> : vector<1x128xf32>
    %17 = tpu.matmul %15, %16, %cst_11 {dimension_numbers = #tpu.dot_dimension_numbers<[1], [0], [0], [1], [0, 0, 1, 1], [], []>} : vector<1x128xbf16>, vector<128x128xbf16>, vector<1x128xf32> -> vector<1x128xf32>
    %c0_12 = arith.constant 0 : index
    %c0_13 = arith.constant 0 : index
    %18 = vector.load %arg8[%c0_12, %c0_13] : memref<1x128xf32, #tpu.memory_space<vmem>>, vector<1x128xf32>
    %19 = arith.addf %17, %18 : vector<1x128xf32>
    %c0_14 = arith.constant 0 : index
    %c0_15 = arith.constant 0 : index
    %c0_16 = arith.constant 0 : index
    %20 = vector.load %arg2[%c0_14, %c0_15, %c0_16] : memref<1x256x36xbf16, #tpu.memory_space<vmem>>, vector<1x256x36xbf16>
    %21 = vector.shape_cast %20 : vector<1x256x36xbf16> to vector<256x36xbf16>
    %c0_17 = arith.constant 0 : index
    %c0_18 = arith.constant 0 : index
    %22 = vector.load %arg9[%c0_17, %c0_18] : memref<36x128xbf16, #tpu.memory_space<vmem>>, vector<36x128xbf16>
    %cst_19 = arith.constant dense<0.000000e+00> : vector<256x128xf32>
    %23 = tpu.matmul %21, %22, %cst_19 {dimension_numbers = #tpu.dot_dimension_numbers<[1], [0], [0], [1], [0, 0, 1, 1], [], []>} : vector<256x36xbf16>, vector<36x128xbf16>, vector<256x128xf32> -> vector<256x128xf32>
    %c0_20 = arith.constant 0 : index
    %c0_21 = arith.constant 0 : index
    %24 = vector.load %arg10[%c0_20, %c0_21] : memref<1x128xf32, #tpu.memory_space<vmem>>, vector<1x128xf32>
    %25 = vector.broadcast %24 : vector<1x128xf32> to vector<256x128xf32>
    %26 = arith.addf %23, %25 : vector<256x128xf32>
    %27 = vector.broadcast %19 : vector<1x128xf32> to vector<256x128xf32>
    %28 = arith.addf %26, %27 : vector<256x128xf32>
    %cst_22 = arith.constant 0.000000e+00 : f32
    %29 = vector.broadcast %cst_22 : f32 to vector<256x128xf32>
    %30 = arith.subf %29, %28 : vector<256x128xf32>
    %31 = math.exp %30 : vector<256x128xf32>
    %cst_23 = arith.constant 1.000000e+00 : f32
    %32 = vector.broadcast %cst_23 : f32 to vector<256x128xf32>
    %33 = arith.addf %32, %31 : vector<256x128xf32>
    %cst_24 = arith.constant 1.000000e+00 : f32
    %34 = vector.broadcast %cst_24 : f32 to vector<256x128xf32>
    %35 = arith.divf %34, %33 : vector<256x128xf32>
    %36 = arith.mulf %28, %35 : vector<256x128xf32>
    %37 = arith.truncf %36 : vector<256x128xf32> to vector<256x128xbf16>
    %c0_25 = arith.constant 0 : index
    %c0_26 = arith.constant 0 : index
    %38 = vector.load %arg11[%c0_25, %c0_26] : memref<128x128xbf16, #tpu.memory_space<vmem>>, vector<128x128xbf16>
    %cst_27 = arith.constant dense<0.000000e+00> : vector<256x128xf32>
    %39 = tpu.matmul %37, %38, %cst_27 {dimension_numbers = #tpu.dot_dimension_numbers<[1], [0], [0], [1], [0, 0, 1, 1], [], []>} : vector<256x128xbf16>, vector<128x128xbf16>, vector<256x128xf32> -> vector<256x128xf32>
    %c0_28 = arith.constant 0 : index
    %c0_29 = arith.constant 0 : index
    %40 = vector.load %arg12[%c0_28, %c0_29] : memref<128x128xbf16, #tpu.memory_space<vmem>>, vector<128x128xbf16>
    %cst_30 = arith.constant dense<0.000000e+00> : vector<256x128xf32>
    %41 = tpu.matmul %37, %40, %cst_30 {dimension_numbers = #tpu.dot_dimension_numbers<[1], [0], [0], [1], [0, 0, 1, 1], [], []>} : vector<256x128xbf16>, vector<128x128xbf16>, vector<256x128xf32> -> vector<256x128xf32>
    %c0_31 = arith.constant 0 : index
    %c0_32 = arith.constant 0 : index
    %42 = vector.load %arg13[%c0_31, %c0_32] : memref<128x128xbf16, #tpu.memory_space<vmem>>, vector<128x128xbf16>
    %cst_33 = arith.constant dense<0.000000e+00> : vector<256x128xf32>
    %43 = tpu.matmul %37, %42, %cst_33 {dimension_numbers = #tpu.dot_dimension_numbers<[1], [0], [0], [1], [0, 0, 1, 1], [], []>} : vector<256x128xbf16>, vector<128x128xbf16>, vector<256x128xf32> -> vector<256x128xf32>
    %44 = arith.truncf %39 : vector<256x128xf32> to vector<256x128xbf16>
    %45 = arith.truncf %41 : vector<256x128xf32> to vector<256x128xbf16>
    %cst_34 = arith.constant dense<0.000000e+00> : vector<256x256xf32>
    %46 = tpu.matmul %44, %45, %cst_34 {dimension_numbers = #tpu.dot_dimension_numbers<[1], [1], [0], [0], [0, 0, 1, 0], [], []>} : vector<256x128xbf16>, vector<256x128xbf16>, vector<256x256xf32> -> vector<256x256xf32>
    %cst_35 = arith.constant dense<0xFF800000> : vector<256xf32>
    %47 = vector.multi_reduction <maximumf>, %46, %cst_35 [1] : vector<256x256xf32> to vector<256xf32>
    %48 = vector.shape_cast %47 : vector<256xf32> to vector<256x1xf32>
    %49 = vector.broadcast %48 : vector<256x1xf32> to vector<256x256xf32>
    %50 = arith.subf %46, %49 : vector<256x256xf32>
    %51 = math.exp %50 : vector<256x256xf32>
    %cst_36 = arith.constant dense<0.000000e+00> : vector<256xf32>
    %52 = vector.multi_reduction <add>, %51, %cst_36 [1] : vector<256x256xf32> to vector<256xf32>
    %53 = vector.shape_cast %52 : vector<256xf32> to vector<256x1xf32>
    %54 = tpu.reciprocal %53 : vector<256x1xf32> -> vector<256x1xf32>
    %55 = vector.broadcast %54 : vector<256x1xf32> to vector<256x256xf32>
    %56 = arith.mulf %51, %55 : vector<256x256xf32>
    %57 = arith.truncf %56 : vector<256x256xf32> to vector<256x256xbf16>
    %58 = arith.truncf %43 : vector<256x128xf32> to vector<256x128xbf16>
    %cst_37 = arith.constant dense<0.000000e+00> : vector<256x128xf32>
    %59 = tpu.matmul %57, %58, %cst_37 {dimension_numbers = #tpu.dot_dimension_numbers<[1], [0], [0], [1], [0, 0, 1, 1], [], []>} : vector<256x256xbf16>, vector<256x128xbf16>, vector<256x128xf32> -> vector<256x128xf32>
    %60 = arith.truncf %59 : vector<256x128xf32> to vector<256x128xbf16>
    %c0_38 = arith.constant 0 : index
    %c0_39 = arith.constant 0 : index
    %61 = vector.load %arg14[%c0_38, %c0_39] : memref<128x128xbf16, #tpu.memory_space<vmem>>, vector<128x128xbf16>
    %cst_40 = arith.constant dense<0.000000e+00> : vector<256x128xf32>
    %62 = tpu.matmul %60, %61, %cst_40 {dimension_numbers = #tpu.dot_dimension_numbers<[1], [0], [0], [1], [0, 0, 1, 1], [], []>} : vector<256x128xbf16>, vector<128x128xbf16>, vector<256x128xf32> -> vector<256x128xf32>
    %63 = arith.addf %36, %62 : vector<256x128xf32>
    %cst_41 = arith.constant 0.000000e+00 : f32
    %64 = vector.broadcast %cst_41 : f32 to vector<290x128xf32>
    %c0_42 = arith.constant 0 : index
    %c0_43 = arith.constant 0 : index
    %65 = vector.load %arg18[%c0_42, %c0_43] : memref<290x128xf32, #tpu.memory_space<vmem>>, vector<290x128xf32>
    tpu.vector_store %arg18[%c0_42, %c0_43], %64 {strides = array<i32>} : memref<290x128xf32, #tpu.memory_space<vmem>>, vector<290x128xf32>,
    %c17 = arith.constant 17 : index
    %c0_44 = arith.constant 0 : index
    %66 = vector.load %arg18[%c17, %c0_44] : memref<290x128xf32, #tpu.memory_space<vmem>>, vector<256x128xf32>
    tpu.vector_store %arg18[%c17, %c0_44], %63 {strides = array<i32>} : memref<290x128xf32, #tpu.memory_space<vmem>>, vector<256x128xf32>,
    %67 = tpu.iota {dimensions = array<i32: 0>} : vector<256x1xi32>
    %c15_i32 = arith.constant 15 : i32
    %68 = vector.broadcast %c15_i32 : i32 to vector<256x1xi32>
    %69 = arith.andi %67, %68 : vector<256x1xi32>
    %cst_45 = arith.constant 0.000000e+00 : f32
    %70 = vector.broadcast %cst_45 : f32 to vector<2x256xf32>
    %c0_46 = arith.constant 0 : index
    %c0_47 = arith.constant 0 : index
    %71 = vector.load %arg18[%c0_46, %c0_47] : memref<290x128xf32, #tpu.memory_space<vmem>>, vector<256x128xf32>
    %c0_i32 = arith.constant 0 : i32
    %72 = vector.broadcast %c0_i32 : i32 to vector<256x1xi32>
    %73 = arith.cmpi ne, %69, %72 : vector<256x1xi32>
    %cst_48 = arith.constant 0.000000e+00 : f32
    %74 = vector.shape_cast %73 : vector<256x1xi1> to vector<256x1xi1>
    %75 = vector.broadcast %74 : vector<256x1xi1> to vector<256x128xi1>
    %76 = vector.broadcast %cst_48 : f32 to vector<256x128xf32>
    %77 = arith.select %75, %71, %76 : vector<256x128xi1>, vector<256x128xf32>
    %c0_49 = arith.constant 0 : index
    %c0_50 = arith.constant 0 : index
    %c0_51 = arith.constant 0 : index
    %78 = vector.load %arg15[%c0_49, %c0_50, %c0_51] : memref<9x2x128xbf16, #tpu.memory_space<vmem>>, vector<1x2x128xbf16>
    %79 = vector.shape_cast %78 : vector<1x2x128xbf16> to vector<2x128xbf16>
    %80 = arith.truncf %77 : vector<256x128xf32> to vector<256x128xbf16>
    %cst_52 = arith.constant dense<0.000000e+00> : vector<2x256xf32>
    %81 = tpu.matmul %79, %80, %cst_52 {dimension_numbers = #tpu.dot_dimension_numbers<[1], [1], [0], [0], [0, 0, 1, 0], [], []>} : vector<2x128xbf16>, vector<256x128xbf16>, vector<2x256xf32> -> vector<2x256xf32>
    %82 = arith.addf %70, %81 : vector<2x256xf32>
    %c1 = arith.constant 1 : index
    %c0_53 = arith.constant 0 : index
    %83 = vector.load %arg18[%c1, %c0_53] : memref<290x128xf32, #tpu.memory_space<vmem>>, vector<256x128xf32>
    %c1_54 = arith.constant 1 : index
    %c0_55 = arith.constant 0 : index
    %c0_56 = arith.constant 0 : index
    %84 = vector.load %arg15[%c1_54, %c0_55, %c0_56] : memref<9x2x128xbf16, #tpu.memory_space<vmem>>, vector<1x2x128xbf16>
    %85 = vector.shape_cast %84 : vector<1x2x128xbf16> to vector<2x128xbf16>
    %86 = arith.truncf %83 : vector<256x128xf32> to vector<256x128xbf16>
    %cst_57 = arith.constant dense<0.000000e+00> : vector<2x256xf32>
    %87 = tpu.matmul %85, %86, %cst_57 {dimension_numbers = #tpu.dot_dimension_numbers<[1], [1], [0], [0], [0, 0, 1, 0], [], []>} : vector<2x128xbf16>, vector<256x128xbf16>, vector<2x256xf32> -> vector<2x256xf32>
    %88 = arith.addf %82, %87 : vector<2x256xf32>
    %c2 = arith.constant 2 : index
    %c0_58 = arith.constant 0 : index
    %89 = vector.load %arg18[%c2, %c0_58] : memref<290x128xf32, #tpu.memory_space<vmem>>, vector<256x128xf32>
    %c15_i32_59 = arith.constant 15 : i32
    %90 = vector.broadcast %c15_i32_59 : i32 to vector<256x1xi32>
    %91 = arith.cmpi ne, %69, %90 : vector<256x1xi32>
    %cst_60 = arith.constant 0.000000e+00 : f32
    %92 = vector.shape_cast %91 : vector<256x1xi1> to vector<256x1xi1>
    %93 = vector.broadcast %92 : vector<256x1xi1> to vector<256x128xi1>
    %94 = vector.broadcast %cst_60 : f32 to vector<256x128xf32>
    %95 = arith.select %93, %89, %94 : vector<256x128xi1>, vector<256x128xf32>
    %c2_61 = arith.constant 2 : index
    %c0_62 = arith.constant 0 : index
    %c0_63 = arith.constant 0 : index
    %96 = vector.load %arg15[%c2_61, %c0_62, %c0_63] : memref<9x2x128xbf16, #tpu.memory_space<vmem>>, vector<1x2x128xbf16>
    %97 = vector.shape_cast %96 : vector<1x2x128xbf16> to vector<2x128xbf16>
    %98 = arith.truncf %95 : vector<256x128xf32> to vector<256x128xbf16>
    %cst_64 = arith.constant dense<0.000000e+00> : vector<2x256xf32>
    %99 = tpu.matmul %97, %98, %cst_64 {dimension_numbers = #tpu.dot_dimension_numbers<[1], [1], [0], [0], [0, 0, 1, 0], [], []>} : vector<2x128xbf16>, vector<256x128xbf16>, vector<2x256xf32> -> vector<2x256xf32>
    %100 = arith.addf %88, %99 : vector<2x256xf32>
    %c16 = arith.constant 16 : index
    %c0_65 = arith.constant 0 : index
    %101 = vector.load %arg18[%c16, %c0_65] : memref<290x128xf32, #tpu.memory_space<vmem>>, vector<256x128xf32>
    %c0_i32_66 = arith.constant 0 : i32
    %102 = vector.broadcast %c0_i32_66 : i32 to vector<256x1xi32>
    %103 = arith.cmpi ne, %69, %102 : vector<256x1xi32>
    %cst_67 = arith.constant 0.000000e+00 : f32
    %104 = vector.shape_cast %103 : vector<256x1xi1> to vector<256x1xi1>
    %105 = vector.broadcast %104 : vector<256x1xi1> to vector<256x128xi1>
    %106 = vector.broadcast %cst_67 : f32 to vector<256x128xf32>
    %107 = arith.select %105, %101, %106 : vector<256x128xi1>, vector<256x128xf32>
    %c3 = arith.constant 3 : index
    %c0_68 = arith.constant 0 : index
    %c0_69 = arith.constant 0 : index
    %108 = vector.load %arg15[%c3, %c0_68, %c0_69] : memref<9x2x128xbf16, #tpu.memory_space<vmem>>, vector<1x2x128xbf16>
    %109 = vector.shape_cast %108 : vector<1x2x128xbf16> to vector<2x128xbf16>
    %110 = arith.truncf %107 : vector<256x128xf32> to vector<256x128xbf16>
    %cst_70 = arith.constant dense<0.000000e+00> : vector<2x256xf32>
    %111 = tpu.matmul %109, %110, %cst_70 {dimension_numbers = #tpu.dot_dimension_numbers<[1], [1], [0], [0], [0, 0, 1, 0], [], []>} : vector<2x128xbf16>, vector<256x128xbf16>, vector<2x256xf32> -> vector<2x256xf32>
    %112 = arith.addf %100, %111 : vector<2x256xf32>
    %c17_71 = arith.constant 17 : index
    %c0_72 = arith.constant 0 : index
    %113 = vector.load %arg18[%c17_71, %c0_72] : memref<290x128xf32, #tpu.memory_space<vmem>>, vector<256x128xf32>
    %c4 = arith.constant 4 : index
    %c0_73 = arith.constant 0 : index
    %c0_74 = arith.constant 0 : index
    %114 = vector.load %arg15[%c4, %c0_73, %c0_74] : memref<9x2x128xbf16, #tpu.memory_space<vmem>>, vector<1x2x128xbf16>
    %115 = vector.shape_cast %114 : vector<1x2x128xbf16> to vector<2x128xbf16>
    %116 = arith.truncf %113 : vector<256x128xf32> to vector<256x128xbf16>
    %cst_75 = arith.constant dense<0.000000e+00> : vector<2x256xf32>
    %117 = tpu.matmul %115, %116, %cst_75 {dimension_numbers = #tpu.dot_dimension_numbers<[1], [1], [0], [0], [0, 0, 1, 0], [], []>} : vector<2x128xbf16>, vector<256x128xbf16>, vector<2x256xf32> -> vector<2x256xf32>
    %118 = arith.addf %112, %117 : vector<2x256xf32>
    %c18 = arith.constant 18 : index
    %c0_76 = arith.constant 0 : index
    %119 = vector.load %arg18[%c18, %c0_76] : memref<290x128xf32, #tpu.memory_space<vmem>>, vector<256x128xf32>
    %c15_i32_77 = arith.constant 15 : i32
    %120 = vector.broadcast %c15_i32_77 : i32 to vector<256x1xi32>
    %121 = arith.cmpi ne, %69, %120 : vector<256x1xi32>
    %cst_78 = arith.constant 0.000000e+00 : f32
    %122 = vector.shape_cast %121 : vector<256x1xi1> to vector<256x1xi1>
    %123 = vector.broadcast %122 : vector<256x1xi1> to vector<256x128xi1>
    %124 = vector.broadcast %cst_78 : f32 to vector<256x128xf32>
    %125 = arith.select %123, %119, %124 : vector<256x128xi1>, vector<256x128xf32>
    %c5 = arith.constant 5 : index
    %c0_79 = arith.constant 0 : index
    %c0_80 = arith.constant 0 : index
    %126 = vector.load %arg15[%c5, %c0_79, %c0_80] : memref<9x2x128xbf16, #tpu.memory_space<vmem>>, vector<1x2x128xbf16>
    %127 = vector.shape_cast %126 : vector<1x2x128xbf16> to vector<2x128xbf16>
    %128 = arith.truncf %125 : vector<256x128xf32> to vector<256x128xbf16>
    %cst_81 = arith.constant dense<0.000000e+00> : vector<2x256xf32>
    %129 = tpu.matmul %127, %128, %cst_81 {dimension_numbers = #tpu.dot_dimension_numbers<[1], [1], [0], [0], [0, 0, 1, 0], [], []>} : vector<2x128xbf16>, vector<256x128xbf16>, vector<2x256xf32> -> vector<2x256xf32>
    %130 = arith.addf %118, %129 : vector<2x256xf32>
    %c32 = arith.constant 32 : index
    %c0_82 = arith.constant 0 : index
    %131 = vector.load %arg18[%c32, %c0_82] : memref<290x128xf32, #tpu.memory_space<vmem>>, vector<256x128xf32>
    %c0_i32_83 = arith.constant 0 : i32
    %132 = vector.broadcast %c0_i32_83 : i32 to vector<256x1xi32>
    %133 = arith.cmpi ne, %69, %132 : vector<256x1xi32>
    %cst_84 = arith.constant 0.000000e+00 : f32
    %134 = vector.shape_cast %133 : vector<256x1xi1> to vector<256x1xi1>
    %135 = vector.broadcast %134 : vector<256x1xi1> to vector<256x128xi1>
    %136 = vector.broadcast %cst_84 : f32 to vector<256x128xf32>
    %137 = arith.select %135, %131, %136 : vector<256x128xi1>, vector<256x128xf32>
    %c6 = arith.constant 6 : index
    %c0_85 = arith.constant 0 : index
    %c0_86 = arith.constant 0 : index
    %138 = vector.load %arg15[%c6, %c0_85, %c0_86] : memref<9x2x128xbf16, #tpu.memory_space<vmem>>, vector<1x2x128xbf16>
    %139 = vector.shape_cast %138 : vector<1x2x128xbf16> to vector<2x128xbf16>
    %140 = arith.truncf %137 : vector<256x128xf32> to vector<256x128xbf16>
    %cst_87 = arith.constant dense<0.000000e+00> : vector<2x256xf32>
    %141 = tpu.matmul %139, %140, %cst_87 {dimension_numbers = #tpu.dot_dimension_numbers<[1], [1], [0], [0], [0, 0, 1, 0], [], []>} : vector<2x128xbf16>, vector<256x128xbf16>, vector<2x256xf32> -> vector<2x256xf32>
    %142 = arith.addf %130, %141 : vector<2x256xf32>
    %c33 = arith.constant 33 : index
    %c0_88 = arith.constant 0 : index
    %143 = vector.load %arg18[%c33, %c0_88] : memref<290x128xf32, #tpu.memory_space<vmem>>, vector<256x128xf32>
    %c7 = arith.constant 7 : index
    %c0_89 = arith.constant 0 : index
    %c0_90 = arith.constant 0 : index
    %144 = vector.load %arg15[%c7, %c0_89, %c0_90] : memref<9x2x128xbf16, #tpu.memory_space<vmem>>, vector<1x2x128xbf16>
    %145 = vector.shape_cast %144 : vector<1x2x128xbf16> to vector<2x128xbf16>
    %146 = arith.truncf %143 : vector<256x128xf32> to vector<256x128xbf16>
    %cst_91 = arith.constant dense<0.000000e+00> : vector<2x256xf32>
    %147 = tpu.matmul %145, %146, %cst_91 {dimension_numbers = #tpu.dot_dimension_numbers<[1], [1], [0], [0], [0, 0, 1, 0], [], []>} : vector<2x128xbf16>, vector<256x128xbf16>, vector<2x256xf32> -> vector<2x256xf32>
    %148 = arith.addf %142, %147 : vector<2x256xf32>
    %c34 = arith.constant 34 : index
    %c0_92 = arith.constant 0 : index
    %149 = vector.load %arg18[%c34, %c0_92] : memref<290x128xf32, #tpu.memory_space<vmem>>, vector<256x128xf32>
    %c15_i32_93 = arith.constant 15 : i32
    %150 = vector.broadcast %c15_i32_93 : i32 to vector<256x1xi32>
    %151 = arith.cmpi ne, %69, %150 : vector<256x1xi32>
    %cst_94 = arith.constant 0.000000e+00 : f32
    %152 = vector.shape_cast %151 : vector<256x1xi1> to vector<256x1xi1>
    %153 = vector.broadcast %152 : vector<256x1xi1> to vector<256x128xi1>
    %154 = vector.broadcast %cst_94 : f32 to vector<256x128xf32>
    %155 = arith.select %153, %149, %154 : vector<256x128xi1>, vector<256x128xf32>
    %c8 = arith.constant 8 : index
    %c0_95 = arith.constant 0 : index
    %c0_96 = arith.constant 0 : index
    %156 = vector.load %arg15[%c8, %c0_95, %c0_96] : memref<9x2x128xbf16, #tpu.memory_space<vmem>>, vector<1x2x128xbf16>
    %157 = vector.shape_cast %156 : vector<1x2x128xbf16> to vector<2x128xbf16>
    %158 = arith.truncf %155 : vector<256x128xf32> to vector<256x128xbf16>
    %cst_97 = arith.constant dense<0.000000e+00> : vector<2x256xf32>
    %159 = tpu.matmul %157, %158, %cst_97 {dimension_numbers = #tpu.dot_dimension_numbers<[1], [1], [0], [0], [0, 0, 1, 0], [], []>} : vector<2x128xbf16>, vector<256x128xbf16>, vector<2x256xf32> -> vector<2x256xf32>
    %160 = arith.addf %148, %159 : vector<2x256xf32>
    %c0_98 = arith.constant 0 : index
    %c0_99 = arith.constant 0 : index
    %161 = vector.load %arg16[%c0_98, %c0_99] : memref<2x1xf32, #tpu.memory_space<vmem>>, vector<2x1xf32>
    %162 = vector.broadcast %161 : vector<2x1xf32> to vector<2x256xf32>
    %163 = arith.addf %160, %162 : vector<2x256xf32>
    %c0_100 = arith.constant 0 : index
    %c0_101 = arith.constant 0 : index
    %c0_102 = arith.constant 0 : index
    %164 = vector.load %arg4[%c0_100, %c0_101, %c0_102] : memref<1x1x2xf32, #tpu.memory_space<vmem>>, vector<1x1x2xf32>
    %165 = vector.shape_cast %164 : vector<1x1x2xf32> to vector<1x2xf32>
    %166 = vector.extract_strided_slice %165 {offsets = [0, 0], sizes = [1, 1], strides = [1, 1]} : vector<1x2xf32> to vector<1x1xf32>
    %167 = vector.extract_strided_slice %165 {offsets = [0, 1], sizes = [1, 1], strides = [1, 1]} : vector<1x2xf32> to vector<1x1xf32>
    %c0_103 = arith.constant 0 : index
    %c0_104 = arith.constant 0 : index
    %c0_105 = arith.constant 0 : index
    %168 = vector.load %arg3[%c0_103, %c0_104, %c0_105] : memref<1x2x256xf32, #tpu.memory_space<vmem>>, vector<1x2x256xf32>
    %169 = vector.shape_cast %168 : vector<1x2x256xf32> to vector<2x256xf32>
    %170 = vector.broadcast %166 : vector<1x1xf32> to vector<2x256xf32>
    %171 = arith.mulf %170, %169 : vector<2x256xf32>
    %172 = vector.broadcast %167 : vector<1x1xf32> to vector<2x256xf32>
    %173 = arith.mulf %172, %163 : vector<2x256xf32>
    %174 = arith.addf %171, %173 : vector<2x256xf32>
    %c0_106 = arith.constant 0 : index
    %c0_107 = arith.constant 0 : index
    %c0_108 = arith.constant 0 : index
    %175 = vector.load %arg17[%c0_106, %c0_107, %c0_108] : memref<1x2x256xf32, #tpu.memory_space<vmem>>, vector<1x2x256xf32>
    %176 = vector.shape_cast %175 : vector<1x2x256xf32> to vector<2x256xf32>
    %177 = vector.shape_cast %174 : vector<2x256xf32> to vector<1x2x256xf32>
    tpu.vector_store %arg17[%c0_106, %c0_107, %c0_108], %177 {strides = array<i32>} : memref<1x2x256xf32, #tpu.memory_space<vmem>>, vector<1x2x256xf32>,
    return
  }
  func.func @transform_0(%arg0: i32) -> (i32, i32, i32) {
    %c0_i32 = arith.constant 0 : i32
    %c0_i32_0 = arith.constant 0 : i32
    %c0_i32_1 = arith.constant 0 : i32
    return %arg0, %c0_i32, %c0_i32_0 : i32, i32, i32
  }
  func.func @transform_1(%arg0: i32) -> (i32, i32, i32) {
    %c0_i32 = arith.constant 0 : i32
    %c0_i32_0 = arith.constant 0 : i32
    %c0_i32_1 = arith.constant 0 : i32
    return %arg0, %c0_i32, %c0_i32_0 : i32, i32, i32
  }
  func.func @transform_2(%arg0: i32) -> (i32, i32, i32) {
    %c0_i32 = arith.constant 0 : i32
    %c0_i32_0 = arith.constant 0 : i32
    %c0_i32_1 = arith.constant 0 : i32
    return %arg0, %c0_i32, %c0_i32_0 : i32, i32, i32
  }
  func.func @transform_3(%arg0: i32) -> (i32, i32, i32) {
    %c0_i32 = arith.constant 0 : i32
    %c0_i32_0 = arith.constant 0 : i32
    %c0_i32_1 = arith.constant 0 : i32
    %c0_i32_2 = arith.constant 0 : i32
    return %c0_i32, %c0_i32_0, %c0_i32_1 : i32, i32, i32
  }
  func.func @transform_4(%arg0: i32) -> (i32, i32) {
    %c0_i32 = arith.constant 0 : i32
    %c0_i32_0 = arith.constant 0 : i32
    %c0_i32_1 = arith.constant 0 : i32
    return %c0_i32, %c0_i32_0 : i32, i32
  }
  func.func @transform_5(%arg0: i32) -> (i32, i32) {
    %c0_i32 = arith.constant 0 : i32
    %c0_i32_0 = arith.constant 0 : i32
    %c0_i32_1 = arith.constant 0 : i32
    return %c0_i32, %c0_i32_0 : i32, i32
  }
  func.func @transform_6(%arg0: i32) -> (i32, i32) {
    %c0_i32 = arith.constant 0 : i32
    %c0_i32_0 = arith.constant 0 : i32
    %c0_i32_1 = arith.constant 0 : i32
    return %c0_i32, %c0_i32_0 : i32, i32
  }
  func.func @transform_7(%arg0: i32) -> (i32, i32) {
    %c0_i32 = arith.constant 0 : i32
    %c0_i32_0 = arith.constant 0 : i32
    %c0_i32_1 = arith.constant 0 : i32
    return %c0_i32, %c0_i32_0 : i32, i32
  }
  func.func @transform_8(%arg0: i32) -> (i32, i32) {
    %c0_i32 = arith.constant 0 : i32
    %c0_i32_0 = arith.constant 0 : i32
    %c0_i32_1 = arith.constant 0 : i32
    return %c0_i32, %c0_i32_0 : i32, i32
  }
  func.func @transform_9(%arg0: i32) -> (i32, i32) {
    %c0_i32 = arith.constant 0 : i32
    %c0_i32_0 = arith.constant 0 : i32
    %c0_i32_1 = arith.constant 0 : i32
    return %c0_i32, %c0_i32_0 : i32, i32
  }
  func.func @transform_10(%arg0: i32) -> (i32, i32) {
    %c0_i32 = arith.constant 0 : i32
    %c0_i32_0 = arith.constant 0 : i32
    %c0_i32_1 = arith.constant 0 : i32
    return %c0_i32, %c0_i32_0 : i32, i32
  }
  func.func @transform_11(%arg0: i32) -> (i32, i32) {
    %c0_i32 = arith.constant 0 : i32
    %c0_i32_0 = arith.constant 0 : i32
    %c0_i32_1 = arith.constant 0 : i32
    return %c0_i32, %c0_i32_0 : i32, i32
  }
  func.func @transform_12(%arg0: i32) -> (i32, i32) {
    %c0_i32 = arith.constant 0 : i32
    %c0_i32_0 = arith.constant 0 : i32
    %c0_i32_1 = arith.constant 0 : i32
    return %c0_i32, %c0_i32_0 : i32, i32
  }
  func.func @transform_13(%arg0: i32) -> (i32, i32) {
    %c0_i32 = arith.constant 0 : i32
    %c0_i32_0 = arith.constant 0 : i32
    %c0_i32_1 = arith.constant 0 : i32
    return %c0_i32, %c0_i32_0 : i32, i32
  }
  func.func @transform_14(%arg0: i32) -> (i32, i32, i32) {
    %c0_i32 = arith.constant 0 : i32
    %c0_i32_0 = arith.constant 0 : i32
    %c0_i32_1 = arith.constant 0 : i32
    %c0_i32_2 = arith.constant 0 : i32
    return %c0_i32, %c0_i32_0, %c0_i32_1 : i32, i32, i32
  }
  func.func @transform_15(%arg0: i32) -> (i32, i32) {
    %c0_i32 = arith.constant 0 : i32
    %c0_i32_0 = arith.constant 0 : i32
    %c0_i32_1 = arith.constant 0 : i32
    return %c0_i32, %c0_i32_0 : i32, i32
  }
  func.func @transform_16(%arg0: i32) -> (i32, i32, i32) {
    %c0_i32 = arith.constant 0 : i32
    %c0_i32_0 = arith.constant 0 : i32
    %c0_i32_1 = arith.constant 0 : i32
    return %arg0, %c0_i32, %c0_i32_0 : i32, i32, i32
  }
}

module attributes {stable_mosaic.version = 11 : i64} {
  func.func @_mse_kernel(%arg0: i32, %arg1: memref<8x128xf32, #tpu.memory_space<vmem>>, %arg2: memref<8x128xf32, #tpu.memory_space<vmem>>, %arg3: memref<1x128xf32, #tpu.memory_space<vmem>>) attributes {dimension_semantics = [#tpu.dimension_semantics<arbitrary>], iteration_bounds = array<i64: 1>, scalar_prefetch = 0 : i64, scratch_operands = 0 : i64, tpu.core_type = #tpu.core_type<tc>, window_params = [{transform_indices = @transform_0, window_bounds = array<i64: 8, 128>}, {transform_indices = @transform_1, window_bounds = array<i64: 8, 128>}, {pipeline_mode = #tpu.pipeline_mode<synchronous>, transform_indices = @transform_2, window_bounds = array<i64: 1, 128>}]} {
    %c0_i32 = arith.constant 0 : i32
    %0 = arith.cmpi eq, %arg0, %c0_i32 : i32
    %1 = arith.extui %0 : i1 to i32
    %c0_i32_0 = arith.constant 0 : i32
    %2 = arith.cmpi ne, %1, %c0_i32_0 : i32
    scf.if %2 {
      %cst_8 = arith.constant 0.000000e+00 : f32
      %12 = vector.broadcast %cst_8 : f32 to vector<1x128xf32>
      %c0_9 = arith.constant 0 : index
      %c0_10 = arith.constant 0 : index
      %13 = vector.load %arg3[%c0_9, %c0_10] : memref<1x128xf32, #tpu.memory_space<vmem>>, vector<1x128xf32>
      tpu.vector_store %arg3[%c0_9, %c0_10], %12 {strides = array<i32>} : memref<1x128xf32, #tpu.memory_space<vmem>>, vector<1x128xf32>,
    } else {
    }
    %c0 = arith.constant 0 : index
    %c0_1 = arith.constant 0 : index
    %3 = vector.load %arg1[%c0, %c0_1] : memref<8x128xf32, #tpu.memory_space<vmem>>, vector<8x128xf32>
    %c0_2 = arith.constant 0 : index
    %c0_3 = arith.constant 0 : index
    %4 = vector.load %arg2[%c0_2, %c0_3] : memref<8x128xf32, #tpu.memory_space<vmem>>, vector<8x128xf32>
    %5 = arith.subf %3, %4 : vector<8x128xf32>
    %c0_4 = arith.constant 0 : index
    %c0_5 = arith.constant 0 : index
    %6 = vector.load %arg3[%c0_4, %c0_5] : memref<1x128xf32, #tpu.memory_space<vmem>>, vector<1x128xf32>
    %7 = arith.mulf %5, %5 : vector<8x128xf32>
    %cst = arith.constant dense<0.000000e+00> : vector<128xf32>
    %8 = vector.multi_reduction <add>, %7, %cst [0] : vector<8x128xf32> to vector<128xf32>
    %9 = vector.shape_cast %8 : vector<128xf32> to vector<1x128xf32>
    %10 = arith.addf %6, %9 : vector<1x128xf32>
    %c0_6 = arith.constant 0 : index
    %c0_7 = arith.constant 0 : index
    %11 = vector.load %arg3[%c0_6, %c0_7] : memref<1x128xf32, #tpu.memory_space<vmem>>, vector<1x128xf32>
    tpu.vector_store %arg3[%c0_6, %c0_7], %10 {strides = array<i32>} : memref<1x128xf32, #tpu.memory_space<vmem>>, vector<1x128xf32>,
    return
  }
  func.func @transform_0(%arg0: i32) -> (i32, i32) {
    %c0_i32 = arith.constant 0 : i32
    %c0_i32_0 = arith.constant 0 : i32
    return %arg0, %c0_i32 : i32, i32
  }
  func.func @transform_1(%arg0: i32) -> (i32, i32) {
    %c0_i32 = arith.constant 0 : i32
    %c0_i32_0 = arith.constant 0 : i32
    return %arg0, %c0_i32 : i32, i32
  }
  func.func @transform_2(%arg0: i32) -> (i32, i32) {
    %c0_i32 = arith.constant 0 : i32
    %c0_i32_0 = arith.constant 0 : i32
    %c0_i32_1 = arith.constant 0 : i32
    return %c0_i32, %c0_i32_0 : i32, i32
  }
}

</mosaic_0001>

<bundles_post_ra>
// kernel: _forward_impl.7
= control target key start
LH: loop header
LB: loop body
LE: loop exit
PB: predicated region body
PF: predicated region fallthrough
CT: control target
= control target key end

     0   :  { %v34_v0 = vmov 0.0   ;;  %s65_s2 = inlined_call_operand.vmem [shape: f32[1,128], index: 2, kind: output, shape index: {}]   ;;  %s66_s0 = inlined_call_operand.vmem [shape: f32[8,128], index: 0, kind: input, shape index: {}]   ;;  %s67_s1 = inlined_call_operand.vmem [shape: f32[8,128], index: 1, kind: input, shape index: {}]  }
   0x1   :  { %15 = vst [vmem:[%s65_s2] sm:$0x1] %v34_v0  ;;  %v16_v1 = vld [vmem:[%s66_s0] sm:$0xff] }
   0x2   :  { %v17_v2 = vld [vmem:[%s67_s1] sm:$0xff] }
   0x3   :  { %v18_v3 = vsub.f32 %v16_v1, %v17_v2 }
   0x5   :  { %v20_v4 = vmul.f32 %v18_v3, %v18_v3 }
   0x7   :  { %v21_v5 = vrot.slane %v20_v4, 4 }
   0x8   :  { %v19_v10 = vld [vmem:[%s65_s2] sm:$0x1] }
   0x9   :  { %v22_v6 = vadd.f32 %v21_v5, %v20_v4 }
   0xb   :  { %v23_v7 = vrot.slane %v22_v6, 2 }
   0xd   :  { %v24_v8 = vadd.f32 %v23_v7, %v22_v6 }
   0xf   :  { %v25_v9 = vrot.slane %v24_v8, 1 }
  0x11   :  { %v26_v11 = vadd.f32 %v25_v9, %v24_v8 }
  0x13   :  { %v27_v12 = vadd.f32 %v26_v11, %v19_v10 }
  0x15   :  { %28 = vst [vmem:[%s65_s2] sm:$0x1] %v27_v12 }

// kernel: closed_call.7
= control target key start
LH: loop header
LB: loop body
LE: loop exit
PB: predicated region body
PF: predicated region fallthrough
CT: control target
= control target key end

     0   :  { %s6042_s21 = smov 0   ;;  %s9081_s0 = inlined_call_operand.vmem [shape: f32[2,1,32], index: 0, kind: input, shape index: {}]   ;;  %s9082_s1 = inlined_call_operand.vmem [shape: bf16[2,256,36], index: 1, kind: input, shape index: {}]   ;;  %s9083_s2 = inlined_call_operand.vmem [shape: f32[2,2,256], index: 2, kind: input, shape index: {}]   ;;  %s9084_s3 = inlined_call_operand.vmem [shape: f32[1,1,2], index: 3, kind: input, shape index: {}]   ;;  %s9085_s4 = inlined_call_operand.vmem [shape: bf16[32,128], index: 4, kind: input, shape index: {}]   ;;  %s9086_s5 = inlined_call_operand.vmem [shape: f32[1,128], index: 5, kind: input, shape index: {}, may-alias: {5,7,9}]   ;;  %s9087_s6 = inlined_call_operand.vmem [shape: bf16[128,128], index: 6, kind: input, shape index: {}]   ;;  %s9088_s7 = inlined_call_operand.vmem [shape: f32[1,128], index: 7, kind: input, shape index: {}, may-alias: {5,7,9}]   ;;  %s9089_s8 = inlined_call_operand.vmem [shape: bf16[36,128], index: 8, kind: input, shape index: {}]   ;;  %s9090_s9 = inlined_call_operand.vmem [shape: f32[1,128], index: 9, kind: input, shape index: {}, may-alias: {5,7,9}]   ;;  %s9091_s10 = inlined_call_operand.vmem [shape: bf16[128,128], index: 10, kind: input, shape index: {}]   ;;  %s9092_s11 = inlined_call_operand.vmem [shape: bf16[128,128], index: 11, kind: input, shape index: {}]   ;;  %s9093_s12 = inlined_call_operand.vmem [shape: bf16[128,128], index: 12, kind: input, shape index: {}]   ;;  %s9094_s13 = inlined_call_operand.vmem [shape: bf16[128,128], index: 13, kind: input, shape index: {}]   ;;  %s9095_s14 = inlined_call_operand.vmem [shape: bf16[9,2,128], index: 14, kind: input, shape index: {}]   ;;  %s9096_s15 = inlined_call_operand.vmem [shape: f32[2,1], index: 15, kind: input, shape index: {}]   ;;  %s9097_s16 = inlined_call_operand.vmem [shape: f32[2,2,256], index: 16, kind: output, shape index: {}]  }
   0x1   :  { %9176 = sst [smem:[#allocation35_spill]] %s9081_s0 }
   0x2 LB: > { %s4972_s22 = sadd.s32 4294967295, %s5951_s21   ;;  %p4976_p0 = scmp.ge.s32.totalorder %s5951_s21, 1  ;;  %s5951_s21 = sphi %s6042_s21, %s26_s21  }
   0x3   : > { %p480_p1 = scmp.lt.s32.totalorder %s5951_s21, 3 }
   0x5   : > { %p481_p2 = pnand %p4976_p0, %p480_p1 }
   0x7   : > { %484 = sbr.rel (%p481_p2) target bundleno = 2377 (0x949), region = 84 }
   0xc   : > { %v5542_v0 = vld [vmem:[%s9085_s4 + $0x8] sm:$0xff]  ;;  %v728_v1 = vld [vmem:[%s9089_s8 + $0x10] sm:$0x3]  ;;  %p538_p3 = scmp.lt.s32.totalorder %s4972_s22, 1  ;;  %vm9130_vm0 = vcmask 1041408   ;;  %v5541_v3 = vld [vmem:[%s9085_s4] sm:$0xff] }
   0xd   : > { %v822_v2 = vunpack.c.l.b16 %v728_v1  ;;  %586 = vmatpush.bf16.msra.mxu0 %v5542_v0  ;;  %s9177_s0 = sld [smem:[#allocation35_spill]]  ;;  %vm576_vm1 = vcmask 261120   ;;  %v5568_v8 = vld [vmem:[%s9089_s8 + $0x8] sm:$0xff]  ;;  %v5567_v9 = vld [vmem:[%s9089_s8] sm:$0xff]  ;;  %vm828_vm2 = vcmask 293888   ;;  %v5550_v16 = vld [vmem:[%s9087_s6 + $0x38] sm:$0xff] }
   0xe   : > { %s9452_s22 = smov (!%p538_p3, %s4972_s22), 1  ;;  %679 = vmatpush.bf16.msra.mxu1 %v5550_v16  ;;  %v5549_v18 = vld [vmem:[%s9087_s6 + $0x30] sm:$0xff]  ;;  %v5548_v19 = vld [vmem:[%s9087_s6 + $0x28] sm:$0xff]  ;;  %v5547_v20 = vld [vmem:[%s9087_s6 + $0x20] sm:$0xff] }
   0xf   : > { %v825_v4 = vpack.c.b16 %v822_v2, %v822_v2  ;;  %s5538_s20 = sshll.u32 %s9452_s22, 7  ;;  %v5546_v21 = vld [vmem:[%s9087_s6 + $0x18] sm:$0xff]  ;;  %v5545_v23 = vld [vmem:[%s9087_s6 + $0x10] sm:$0xff]  ;;  %v5544_v24 = vld [vmem:[%s9087_s6 + $0x8] sm:$0xff] }
  0x10   : > { %s6073_s25 = scalar_lea.vmem %s9082_s1, %s5538_s20  ;;  %v563_v25 = vld [vmem:[%s9086_s5] sm:$0x1]  ;;  %s5539_s20 = sshll.u32 %s9452_s22, 2 }
  0x11   : > { %v879_v5 = vsel %vm9130_vm0, %v825_v4, 0  ;;  %587 = vmatpush.bf16.msra.mxu0 %v5541_v3  ;;  %v5551_v10 = vld [vmem:[%s6073_s25] sm:$0xff]  ;;  %v5552_v11 = vld [vmem:[%s6073_s25 + $0x8] sm:$0xff]  ;;  %v5553_v12 = vld [vmem:[%s6073_s25 + $0x10] sm:$0xff]  ;;  %s555_s27 = scalar_lea.vmem %s9097_s16, %s5539_s20 }
  0x12   : > { %886 = vmatpush.bf16.msra.mxu2 %v879_v5  ;;  %v5554_v13 = vld [vmem:[%s6073_s25 + $0x18] sm:$0xff]  ;;  %v5555_v14 = vld [vmem:[%s6073_s25 + $0x20] sm:$0xff]  ;;  %v5556_v15 = vld [vmem:[%s6073_s25 + $0x28] sm:$0xff]  ;;  %680 = vmatpush.bf16.msra.mxu1 %v5549_v18 }
  0x13   : > { %s540_s17 = scalar_lea.vmem %s9177_s0, %s9452_s22  ;;  %v5557_v17 = vld [vmem:[%s6073_s25 + $0x30] sm:$0xff]  ;;  %v5558_v22 = vld [vmem:[%s6073_s25 + $0x38] sm:$0xff]  ;;  %v5543_v26 = vld [vmem:[%s9087_s6] sm:$0xff] }
  0x14   : > { %v557_v6 = vld [vmem:[%s540_s17] sm:$0x1]  ;;  %v5560_v36 = vld [vmem:[%s6073_s25 + $0x48] sm:$0xff]  ;;  %v5561_v48 = vld [vmem:[%s6073_s25 + $0x50] sm:$0xff] }
  0x15   : > { %v558_v7 = vpack.c.bf16 %v557_v6, %v557_v6  ;;  %v5559_v31 = vld [vmem:[%s6073_s25 + $0x40] sm:$0xff]  ;;  %v5562_v50 = vld [vmem:[%s6073_s25 + $0x58] sm:$0xff]  ;;  %v5564_v55 = vld [vmem:[%s6073_s25 + $0x68] sm:$0xff] }
  0x16   : > { %887 = vmatpush.bf16.msra.mxu2 %v5568_v8  ;;  %681 = vmatpush.bf16.msra.mxu1 %v5548_v19  ;;  %v5563_v52 = vld [vmem:[%s6073_s25 + $0x60] sm:$0xff]  ;;  %v5565_v58 = vld [vmem:[%s6073_s25 + $0x70] sm:$0xff]  ;;  %v5566_v60 = vld [vmem:[%s6073_s25 + $0x78] sm:$0xff]  ;;  %s550_s25 = scalar_lea.vmem %s9083_s2, %s5539_s20 }
  0x17   : > { %4991 = vmatmul.msk.bf16.vlgmr.msra.gmra.mxu0 %vm576_vm1, %v558_v7  ;;  %v630_v0 = vld [vmem:[%s9088_s7] sm:$0x1] }
  0x18   : > { %v6147_v2 = vld [vmem:[%s9090_s9] ss:$0 sm:$0xff] }
  0x1a   : > { %888 = vmatpush.bf16.msra.mxu2 %v5567_v9  ;;  %682 = vmatpush.bf16.msra.mxu1 %v5547_v20 }
  0x1d   : > { %5096 = vmatmul.msk.bf16.vlgmr.msra.gmra.mxu2 %vm828_vm2, %v5551_v10 }
  0x1e   : > { %683 = vmatpush.bf16.msra.mxu1 %v5546_v21 }
  0x22   : > { %684 = vmatpush.bf16.msra.mxu1 %v5545_v23 }
  0x26   : > { %685 = vmatpush.bf16.msra.mxu1 %v5544_v24 }
  0x2a   : > { %686 = vmatpush.bf16.msra.mxu1 %v5543_v26 }
  0x2d   : > { %5097 = vmatmul.msk.bf16.gmra.mxu2 %vm828_vm2, %v5552_v11  ;;  %v5576_v11 = vld [vmem:[%s9091_s10 + $0x38] sm:$0xff] }
  0x2e   : > { %1723 = vmatpush.bf16.msra.mxu3 %v5576_v11 }
  0x3d   : > { %5098 = vmatmul.msk.bf16.gmra.mxu2 %vm828_vm2, %v5553_v12  ;;  %v5584_v12 = vld [vmem:[%s9092_s11 + $0x38] sm:$0xff] }
  0x3e   : > { %1876 = vmatpush.bf16.msrb.mxu0 %v5584_v12 }
  0x4d   : > { %5099 = vmatmul.msk.bf16.gmra.mxu2 %vm828_vm2, %v5554_v13  ;;  %v5592_v13 = vld [vmem:[%s9093_s12 + $0x38] sm:$0xff] }
  0x4e   : > { %2029 = vmatpush.bf16.msrb.mxu1 %v5592_v13 }
  0x5d   : > { %5100 = vmatmul.msk.bf16.gmra.mxu2 %vm828_vm2, %v5555_v14 }
  0x6d   : > { %5101 = vmatmul.msk.bf16.gmra.mxu2 %vm828_vm2, %v5556_v15 }
  0x7d   : > { %5102 = vmatmul.msk.bf16.gmra.mxu2 %vm828_vm2, %v5557_v17 }
  0x8d   : > { %5103 = vmatmul.msk.bf16.gmra.mxu2 %vm828_vm2, %v5558_v22 }
  0x94   : > { %v589_v27 = vpop.f32.mrf.mxu0 }
  0x95   : > { %v590_v28 = vadd.f32 %v589_v27, %v563_v25 }
  0x97   : > { %v593_v29 = vsub.f32 0.0, %v590_v28 }
  0x99   : > { %v594_v30 = vmul.f32 1.442695, %v593_v29 }
  0x9b   : > { %5619 = vpow2.f32 %v594_v30  ;;  %v5575_v30 = vld [vmem:[%s9091_s10 + $0x30] sm:$0xff] }
  0x9c   : > { %v591_v32 = vpop.f32.mrf.mxu0  ;;  %1724 = vmatpush.bf16.msra.mxu3 %v5575_v30 }
  0x9d   : > { %5104 = vmatmul.msk.bf16.gmra.mxu2 %vm828_vm2, %v5559_v31  ;;  %v5583_v31 = vld [vmem:[%s9092_s11 + $0x30] sm:$0xff] }
  0x9e   : > { %1877 = vmatpush.bf16.msrb.mxu0 %v5583_v31 }
  0xa0   : > { %v890_v49 = vpop.f32.mrf.mxu2 }
  0xa1   : > { %v5620_v33 = vpop.eup %5619  ;;  %v891_v4 = vadd.f32 %v6147_v2, %v890_v49  ;;  %v5589_v49 = vld [vmem:[%s9093_s12 + $0x20] sm:$0xff] }
  0xa2   : > { %v596_v34 = vadd.f32 1.0, %v5620_v33  ;;  %v5591_v33 = vld [vmem:[%s9093_s12 + $0x30] sm:$0xff] }
  0xa3   : > { %2030 = vmatpush.bf16.msrb.mxu1 %v5591_v33 }
  0xa4   : > { %5621 = vrcp.f32 %v596_v34  ;;  %v608_v39 = vand.u32 2147483648, %v596_v34  ;;  %v606_v41 = vand.u32 2147483647, %v596_v34  ;;  %vm602_vm4 = vweird.f32 %v596_v34 }
  0xa6   : > { %v609_v43 = vor.u32 1.1754944e-38, %v608_v39  ;;  %vm607_vm6 = vcmp.eq.f32.partialorder %v606_v41, 8.507059e+37 }
  0xa8   : > { %v892_v51 = vpop.f32.mrf.mxu2 }
  0xa9   : > { %v893_v5 = vadd.f32 %v6147_v2, %v892_v51 }
  0xaa   : > { %v5622_v35 = vpop.eup %5621 }
  0xab   : > { %v598_v37 = vmul.f32 %v5622_v35, %v596_v34  ;;  %vm603_vm3 = vweird.f32 %v5622_v35 }
  0xac   : > { %vm604_vm5 = vmor %vm602_vm4, %vm603_vm3 }
  0xad   : > { %v599_v38 = vsub.f32 1.0, %v598_v37  ;;  %5105 = vmatmul.msk.bf16.gmra.mxu2 %vm828_vm2, %v5560_v36  ;;  %v5574_v36 = vld [vmem:[%s9091_s10 + $0x28] sm:$0xff] }
  0xae   : > { %v5582_v37 = vld [vmem:[%s9092_s11 + $0x28] sm:$0xff]  ;;  %1725 = vmatpush.bf16.msra.mxu3 %v5574_v36  ;;  %v5569_v36 = vld [vmem:[%s9091_s10] sm:$0xff] }
  0xaf   : > { %v600_v40 = vmul.f32 %v5622_v35, %v599_v38  ;;  %v5590_v38 = vld [vmem:[%s9093_s12 + $0x28] sm:$0xff]  ;;  %1878 = vmatpush.bf16.msrb.mxu0 %v5582_v37  ;;  %v5577_v37 = vld [vmem:[%s9092_s11] sm:$0xff] }
  0xb0   : > { %v895_v53 = vpop.f32.mrf.mxu2  ;;  %2031 = vmatpush.bf16.msrb.mxu1 %v5590_v38 }
  0xb1   : > { %v601_v42 = vadd.f32 %v5622_v35, %v600_v40  ;;  %v896_v16 = vadd.f32 %v6147_v2, %v895_v53 }
  0xb3   : > { %v605_v44 = vsel %vm604_vm5, %v5622_v35, %v601_v42 }
  0xb4   : > { %v610_v45 = vsel %vm607_vm6, %v609_v43, %v605_v44  ;;  %2032 = vmatpush.bf16.msrb.mxu1 %v5589_v49 }
  0xb5   : > { %v612_v46 = vmul.f32 %v610_v45, %v590_v28 }
  0xb7   : > { %v613_v47 = vpack.c.bf16 %v612_v46, %v612_v46 }
  0xb8   : > { %v897_v54 = vpop.f32.mrf.mxu2 }
  0xb9   : > { %687 = vmatmul.bf16.vlgmr.msra.gmra.mxu1 %v613_v47  ;;  %v898_v17 = vadd.f32 %v6147_v2, %v897_v54  ;;  %v5573_v47 = vld [vmem:[%s9091_s10 + $0x20] sm:$0xff] }
  0xba   : > { %1726 = vmatpush.bf16.msra.mxu3 %v5573_v47 }
  0xbd   : > { %5106 = vmatmul.msk.bf16.gmra.mxu2 %vm828_vm2, %v5561_v48  ;;  %v5581_v48 = vld [vmem:[%s9092_s11 + $0x20] sm:$0xff] }
  0xbe   : > { %1879 = vmatpush.bf16.msrb.mxu0 %v5581_v48 }
  0xc0   : > { %v900_v56 = vpop.f32.mrf.mxu2 }
  0xc1   : > { %v901_v32 = vadd.f32 %v6147_v2, %v900_v56  ;;  %v5572_v56 = vld [vmem:[%s9091_s10 + $0x18] sm:$0xff] }
  0xc2   : > { %1727 = vmatpush.bf16.msra.mxu3 %v5572_v56 }
  0xc8   : > { %v902_v57 = vpop.f32.mrf.mxu2 }
  0xc9   : > { %v903_v34 = vadd.f32 %v6147_v2, %v902_v57  ;;  %v5580_v57 = vld [vmem:[%s9092_s11 + $0x18] sm:$0xff] }
  0xca   : > { %1880 = vmatpush.bf16.msrb.mxu0 %v5580_v57 }
  0xcd   : > { %5107 = vmatmul.msk.bf16.gmra.mxu2 %vm828_vm2, %v5562_v50 }
  0xd0   : > { %v6135_v59 = vpop.f32.mrf.mxu2 }
  0xd8   : > { %v6138_v61 = vpop.f32.mrf.mxu2 }
  0xd9   : > { %v908_v11 = vadd.f32 %v6147_v2, %v6138_v61  ;;  %v5578_v61 = vld [vmem:[%s9092_s11 + $0x8] sm:$0xff] }
  0xdd   : > { %5108 = vmatmul.msk.bf16.gmra.mxu2 %vm828_vm2, %v5563_v52 }
  0xe0   : > { %v6159_v8 = vpop.f32.mrf.mxu2 }
  0xe8   : > { %v6174_v18 = vpop.f32.mrf.mxu2 }
  0xed   : > { %5109 = vmatmul.msk.bf16.gmra.mxu2 %vm828_vm2, %v5564_v55 }
  0xf0   : > { %v6188_v27 = vpop.f32.mrf.mxu2 }
  0xf8   : > { %v6222_v43 = vpop.f32.mrf.mxu2 }
  0xfd   : > { %5110 = vmatmul.msk.bf16.gmra.mxu2 %vm828_vm2, %v5565_v58  ;;  %v5588_v58 = vld [vmem:[%s9093_s12 + $0x18] sm:$0xff] }
  0xfe   : > { %2033 = vmatpush.bf16.msrb.mxu1 %v5588_v58 }
 0x10d   : > { %5111 = vmatmul.msk.bf16.gmra.mxu2 %vm828_vm2, %v5566_v60 }
 0x136   : > { %v688_v62 = vpop.f32.mrf.mxu1 }
 0x137   : > { %v689_v1 = vadd.f32 %v688_v62, %v630_v0 }
 0x139   : > { %v6149_v3 = vperm.slane %v689_v1, 0  ;;  %v5571_v1 = vld [vmem:[%s9091_s10 + $0x10] sm:$0xff] }
 0x13a   : > { %1728 = vmatpush.bf16.msra.mxu3 %v5571_v1 }
 0x13b   : > { %v6154_v6 = vadd.f32 %v6149_v3, %v891_v4  ;;  %v6157_v7 = vadd.f32 %v6149_v3, %v893_v5  ;;  %v6177_v19 = vadd.f32 %v6149_v3, %v896_v16  ;;  %v6180_v20 = vadd.f32 %v6149_v3, %v898_v17  ;;  %v5579_v4 = vld [vmem:[%s9092_s11 + $0x10] sm:$0xff] }
 0x13c   : > { %v6217_v40 = vadd.f32 %v6149_v3, %v901_v32  ;;  %v6220_v41 = vadd.f32 %v6149_v3, %v903_v34  ;;  %v906_v5 = vadd.f32 %v6147_v2, %v6135_v59  ;;  %1881 = vmatpush.bf16.msrb.mxu0 %v5579_v4 }
 0x13d   : > { %v1003_v9 = vsub.f32 0.0, %v6154_v6  ;;  %v1004_v10 = vsub.f32 0.0, %v6157_v7  ;;  %v1005_v23 = vsub.f32 0.0, %v6177_v19  ;;  %v1006_v24 = vsub.f32 0.0, %v6180_v20 }
 0x13e   : > { %v690_v63 = vpop.f32.mrf.mxu1  ;;  %v1007_v50 = vsub.f32 0.0, %v6217_v40  ;;  %v1008_v51 = vsub.f32 0.0, %v6220_v41  ;;  %v6286_v16 = vadd.f32 %v6149_v3, %v906_v5 }
 0x13f   : > { %v1035_v14 = vmul.f32 1.442695, %v1003_v9  ;;  %v1037_v15 = vmul.f32 1.442695, %v1004_v10  ;;  %v1039_v28 = vmul.f32 1.442695, %v1005_v23  ;;  %v6264_v9 = vpop.f32.mrf.mxu2  ;;  %v6295_v23 = vadd.f32 %v6149_v3, %v908_v11 }
 0x140   : > { %v1041_v29 = vmul.f32 1.442695, %v1006_v24  ;;  %v1043_v60 = vmul.f32 1.442695, %v1007_v50  ;;  %v1045_v62 = vmul.f32 1.442695, %v1008_v51  ;;  %1882 = vmatpush.bf16.msrb.mxu0 %v5578_v61 }
 0x141   : > { %5623 = vpow2.f32 %v1035_v14  ;;  %v5587_v10 = vld [vmem:[%s9093_s12 + $0x10] sm:$0xff]  ;;  %v5570_v14 = vld [vmem:[%s9091_s10 + $0x8] sm:$0xff]  ;;  %v1009_v38 = vsub.f32 0.0, %v6286_v16 }
 0x142   : > { %5625 = vpow2.f32 %v1037_v15  ;;  %2034 = vmatpush.bf16.msrb.mxu1 %v5587_v10  ;;  %1729 = vmatpush.bf16.msra.mxu3 %v5570_v14 }
 0x144   : > { %1883 = vmatpush.bf16.msrb.mxu0 %v5577_v37 }
 0x146   : > { %1730 = vmatpush.bf16.msra.mxu3 %v5569_v36 }
 0x147   : > { %v5624_v21 = vpop.eup %5623 }
 0x148   : > { %v5626_v22 = vpop.eup %5625  ;;  %v6184_v25 = vadd.f32 1.0, %v5624_v21 }
 0x149   : > { %v6186_v26 = vadd.f32 1.0, %v5626_v22  ;;  %v5586_v22 = vld [vmem:[%s9093_s12 + $0x8] sm:$0xff] }
 0x14a   : > { %5627 = vrcp.f32 %v6184_v25  ;;  %vm1136_vm9 = vweird.f32 %v6184_v25  ;;  %v1142_v17 = vand.u32 2147483648, %v6184_v25  ;;  %2035 = vmatpush.bf16.msrb.mxu1 %v5586_v22 }
 0x14b   : > { %5629 = vrcp.f32 %v6186_v26  ;;  %v1157_v21 = vand.u32 2147483648, %v6186_v26  ;;  %vm1151_vm11 = vweird.f32 %v6186_v26 }
 0x14c   : > { %5631 = vpow2.f32 %v1039_v28  ;;  %v1140_v28 = vand.u32 2147483647, %v6184_v25 }
 0x14d   : > { %5633 = vpow2.f32 %v1041_v29  ;;  %v1155_v29 = vand.u32 2147483647, %v6186_v26 }
 0x14e   : > { %vm1141_vm13 = vcmp.eq.f32.partialorder %v1140_v28, 8.507059e+37 }
 0x14f   : > { %vm1156_vm14 = vcmp.eq.f32.partialorder %v1155_v29, 8.507059e+37 }
 0x150   : > { %v6203_v35 = vpop.eup %5627 }
 0x151   : > { %v6214_v39 = vpop.eup %5629  ;;  %v1132_v45 = vmul.f32 %v6203_v35, %v6184_v25  ;;  %vm1137_vm7 = vweird.f32 %v6203_v35 }
 0x152   : > { %v5632_v42 = vpop.eup %5631  ;;  %v1147_v46 = vmul.f32 %v6214_v39, %v6186_v26  ;;  %vm1152_vm8 = vweird.f32 %v6214_v39  ;;  %vm6299_vm10 = vmor %vm1136_vm9, %vm1137_vm7 }
 0x153   : > { %v5634_v44 = vpop.eup %5633  ;;  %v6239_v52 = vadd.f32 1.0, %v5632_v42  ;;  %v1133_v54 = vsub.f32 1.0, %v1132_v45  ;;  %vm6308_vm12 = vmor %vm1151_vm11, %vm1152_vm8  ;;  %v1158_v42 = vor.u32 1.1754944e-38, %v1157_v21 }
 0x154   : > { %v6241_v53 = vadd.f32 1.0, %v5634_v44  ;;  %v1148_v55 = vsub.f32 1.0, %v1147_v46  ;;  %v1010_v44 = vsub.f32 0.0, %v6295_v23  ;;  %v6335_v46 = vpop.f32.mrf.mxu2 }
 0x155   : > { %5635 = vrcp.f32 %v6239_v52  ;;  %v1134_v63 = vmul.f32 %v6203_v35, %v1133_v54  ;;  %v1047_v54 = vmul.f32 1.442695, %v1009_v38  ;;  %vm1166_vm2 = vweird.f32 %v6239_v52 }
 0x156   : > { %5637 = vrcp.f32 %v6241_v53  ;;  %v1149_v0 = vmul.f32 %v6214_v39, %v1148_v55  ;;  %v1049_v55 = vmul.f32 1.442695, %v1010_v44  ;;  %v1172_v5 = vand.u32 2147483648, %v6239_v52 }
 0x157   : > { %5639 = vpow2.f32 %v1043_v60  ;;  %v1135_v59 = vadd.f32 %v6203_v35, %v1134_v63  ;;  %v913_v63 = vadd.f32 %v6147_v2, %v6174_v18  ;;  %v1187_v10 = vand.u32 2147483648, %v6241_v53 }
 0x158   : > { %5641 = vpow2.f32 %v1045_v62  ;;  %v1150_v13 = vadd.f32 %v6214_v39, %v1149_v0  ;;  %v911_v62 = vadd.f32 %v6147_v2, %v6159_v8  ;;  %vm1181_vm4 = vweird.f32 %v6241_v53 }
 0x159   : > { %v1139_v33 = vsel %vm6299_vm10, %v6203_v35, %v1135_v59  ;;  %v5585_v35 = vld [vmem:[%s9093_s12] sm:$0xff]  ;;  %v6372_v11 = vadd.f32 %v6149_v3, %v913_v63  ;;  %v1185_v14 = vand.u32 2147483647, %v6241_v53  ;;  %v1173_v29 = vor.u32 1.1754944e-38, %v1172_v5 }
 0x15a   : > { %v1154_v25 = vsel %vm6308_vm12, %v6214_v39, %v1150_v13  ;;  %v1143_v39 = vor.u32 1.1754944e-38, %v1142_v17  ;;  %2036 = vmatpush.bf16.msrb.mxu1 %v5585_v35  ;;  %v6366_v18 = vadd.f32 %v6149_v3, %v911_v62  ;;  %v1170_v13 = vand.u32 2147483647, %v6239_v52 }
 0x15b   : > { %v6272_v12 = vpop.eup %5635  ;;  %v1159_v49 = vsel %vm1156_vm14, %v1158_v42, %v1154_v25  ;;  %v1012_v31 = vsub.f32 0.0, %v6372_v11  ;;  %vm1186_vm7 = vcmp.eq.f32.partialorder %v1185_v14, 8.507059e+37  ;;  %v916_v44 = vadd.f32 %v6147_v2, %v6188_v27 }
 0x15c   : > { %v6283_v15 = vpop.eup %5637  ;;  %v1162_v26 = vmul.f32 %v6272_v12, %v6239_v52  ;;  %v1144_v48 = vsel %vm1141_vm13, %v1143_v39, %v1139_v33  ;;  %v6344_v57 = vmul.f32 %v1159_v49, %v6157_v7  ;;  %vm1167_vm15 = vweird.f32 %v6272_v12  ;;  %v6363_v4 = vpop.f32.mrf.mxu2 }
 0x15d   : > { %v5640_v30 = vpop.eup %5639  ;;  %v1177_v34 = vmul.f32 %v6283_v15, %v6241_v53  ;;  %v6341_v56 = vmul.f32 %v1144_v48, %v6154_v6  ;;  %vm1182_vm1 = vweird.f32 %v6283_v15  ;;  %vm6376_vm3 = vmor %vm1166_vm2, %vm1167_vm15  ;;  %v1011_v28 = vsub.f32 0.0, %v6366_v18 }
 0x15e   : > { %v5642_v32 = vpop.eup %5641  ;;  %v6333_v45 = vadd.f32 1.0, %v5640_v30  ;;  %v1163_v50 = vsub.f32 1.0, %v1162_v26  ;;  %9182 = vst [vmem:[#allocation3_spill] sm:$0xff] %v6344_v57  ;;  %vm6385_vm5 = vmor %vm1181_vm4, %vm1182_vm1  ;;  %v1188_v30 = vor.u32 1.1754944e-38, %v1187_v10  ;;  %vm1171_vm6 = vcmp.eq.f32.partialorder %v1170_v13, 8.507059e+37 }
 0x15f   : > { %v6337_v47 = vadd.f32 1.0, %v5642_v32  ;;  %v1178_v51 = vsub.f32 1.0, %v1177_v34  ;;  %v1643_v6 = vpack.c.bf16 %v6344_v57, %v6341_v56  ;;  %v1051_v34 = vmul.f32 1.442695, %v1011_v28 }
 0x160   : > { %5643 = vrcp.f32 %v6333_v45  ;;  %v1164_v58 = vmul.f32 %v6272_v12, %v1163_v50  ;;  %v1053_v36 = vmul.f32 1.442695, %v1012_v31  ;;  %v918_v48 = vadd.f32 %v6147_v2, %v6222_v43 }
 0x161   : > { %5645 = vrcp.f32 %v6337_v47  ;;  %v1179_v60 = vmul.f32 %v6283_v15, %v1178_v51  ;;  %1731 = vmatmul.bf16.vlgmr.msra.gmra.mxu3 %v1643_v6  ;;  %1884 = vmatmul.bf16.vlgmr.msrb.gmra.mxu0 %v1643_v6  ;;  %v6432_v43 = vadd.f32 %v6149_v3, %v916_v44  ;;  %vm1196_vm10 = vweird.f32 %v6333_v45 }
 0x162   : > { %5647 = vpow2.f32 %v1047_v54  ;;  %v1165_v0 = vadd.f32 %v6272_v12, %v1164_v58  ;;  %2037 = vmatmul.bf16.vlgmr.msrb.gmra.mxu1 %v1643_v6  ;;  %v1202_v51 = vand.u32 2147483648, %v6333_v45  ;;  %v1217_v54 = vand.u32 2147483648, %v6337_v47 }
 0x163   : > { %5649 = vpow2.f32 %v1049_v55  ;;  %v1180_v1 = vadd.f32 %v6283_v15, %v1179_v60  ;;  %v6438_v55 = vadd.f32 %v6149_v3, %v918_v48  ;;  %v1200_v60 = vand.u32 2147483647, %v6333_v45 }
 0x164   : > { %v1169_v22 = vsel %vm6376_vm3, %v6272_v12, %v1165_v0  ;;  %v6412_v38 = vpop.f32.mrf.mxu2  ;;  %vm1211_vm12 = vweird.f32 %v6337_v47  ;;  %v1215_v62 = vand.u32 2147483647, %v6337_v47  ;;  %v1013_v59 = vsub.f32 0.0, %v6432_v43 }
 0x165   : > { %v1184_v52 = vsel %vm6385_vm5, %v6283_v15, %v1180_v1  ;;  %v1174_v33 = vsel %vm1171_vm6, %v1173_v29, %v1169_v22  ;;  %v1203_v13 = vor.u32 1.1754944e-38, %v1202_v51  ;;  %v1218_v14 = vor.u32 1.1754944e-38, %v1217_v54 }
 0x166   : > { %v6356_v7 = vpop.eup %5643  ;;  %v1189_v15 = vsel %vm1186_vm7, %v1188_v30, %v1184_v52  ;;  %v6407_v37 = vmul.f32 %v1174_v33, %v6177_v19  ;;  %vm1201_vm14 = vcmp.eq.f32.partialorder %v1200_v60, 8.507059e+37  ;;  %vm1216_vm15 = vcmp.eq.f32.partialorder %v1215_v62, 8.507059e+37 }
 0x167   : > { %v6361_v8 = vpop.eup %5645  ;;  %v1192_v24 = vmul.f32 %v6356_v7, %v6333_v45  ;;  %v6410_v35 = vmul.f32 %v1189_v15, %v6180_v20  ;;  %vm1197_vm8 = vweird.f32 %v6356_v7  ;;  %v921_v33 = vadd.f32 %v6147_v2, %v6264_v9 }
 0x168   : > { %v5648_v61 = vpop.eup %5647  ;;  %v1207_v53 = vmul.f32 %v6361_v8, %v6337_v47  ;;  %9187 = vst [vmem:[#allocation4_spill] sm:$0xff] %v6407_v37  ;;  %vm1212_vm9 = vweird.f32 %v6361_v8  ;;  %vm6440_vm11 = vmor %vm1196_vm10, %vm1197_vm8  ;;  %v923_v15 = vadd.f32 %v6147_v2, %v6335_v46 }
 0x169   : > { %v5650_v21 = vpop.eup %5649  ;;  %v6401_v32 = vadd.f32 1.0, %v5648_v61  ;;  %v1193_v25 = vsub.f32 1.0, %v1192_v24  ;;  %9188 = vst [vmem:[#allocation5_spill] sm:$0xff] %v6410_v35  ;;  %v1644_v19 = vpack.c.bf16 %v6410_v35, %v6407_v37  ;;  %vm6449_vm13 = vmor %vm1211_vm12, %vm1212_vm9  ;;  %v1014_v61 = vsub.f32 0.0, %v6438_v55 }
 0x16a   : > { %v6403_v12 = vadd.f32 1.0, %v5650_v21  ;;  %v1208_v26 = vsub.f32 1.0, %v1207_v53  ;;  %v1055_v24 = vmul.f32 1.442695, %v1013_v59  ;;  %v6498_v46 = vadd.f32 %v6149_v3, %v921_v33 }
 0x16b   : > { %5651 = vrcp.f32 %v6401_v32  ;;  %v1194_v39 = vmul.f32 %v6356_v7, %v1193_v25  ;;  %v1057_v53 = vmul.f32 1.442695, %v1014_v61  ;;  %vm1226_vm3 = vweird.f32 %v6401_v32 }
 0x16c   : > { %5653 = vrcp.f32 %v6403_v12  ;;  %v1209_v42 = vmul.f32 %v6361_v8, %v1208_v26  ;;  %v6463_v10 = vpop.f32.mrf.mxu2  ;;  %v1230_v48 = vand.u32 2147483647, %v6401_v32  ;;  %vm1241_vm5 = vweird.f32 %v6403_v12 }
 0x16d   : > { %5655 = vpow2.f32 %v1051_v34  ;;  %v1195_v49 = vadd.f32 %v6356_v7, %v1194_v39  ;;  %v1247_v39 = vand.u32 2147483648, %v6403_v12  ;;  %v1015_v60 = vsub.f32 0.0, %v6498_v46 }
 0x16e   : > { %5657 = vpow2.f32 %v1053_v36  ;;  %v1210_v50 = vadd.f32 %v6361_v8, %v1209_v42  ;;  %v1232_v36 = vand.u32 2147483648, %v6401_v32  ;;  %v6504_v42 = vadd.f32 %v6149_v3, %v923_v15 }
 0x16f   : > { %v1199_v1 = vsel %vm6440_vm11, %v6356_v7, %v1195_v49  ;;  %vm1231_vm7 = vcmp.eq.f32.partialorder %v1230_v48, 8.507059e+37  ;;  %v1059_v59 = vmul.f32 1.442695, %v1015_v60 }
 0x170   : > { %v1214_v45 = vsel %vm6449_vm13, %v6361_v8, %v1210_v50  ;;  %v1204_v8 = vsel %vm1201_vm14, %v1203_v13, %v1199_v1  ;;  %v1233_v62 = vor.u32 1.1754944e-38, %v1232_v36  ;;  %v1016_v6 = vsub.f32 0.0, %v6504_v42 }
 0x171   : > { %v6424_v20 = vpop.eup %5651  ;;  %1736 = vmatmul.bf16.gmra.mxu3 %v1644_v19  ;;  %1889 = vmatmul.bf16.gmra.mxu0 %v1644_v19  ;;  %v1219_v21 = vsel %vm1216_vm15, %v1218_v14, %v1214_v45  ;;  %v6473_v28 = vmul.f32 %v1204_v8, %v6217_v40 }
 0x172   : > { %v6429_v27 = vpop.eup %5653  ;;  %2042 = vmatmul.bf16.gmra.mxu1 %v1644_v19  ;;  %v1222_v5 = vmul.f32 %v6424_v20, %v6401_v32  ;;  %v6476_v29 = vmul.f32 %v1219_v21, %v6220_v41  ;;  %vm1227_vm1 = vweird.f32 %v6424_v20  ;;  %v1245_v19 = vand.u32 2147483647, %v6403_v12 }
 0x173   : > { %v5656_v63 = vpop.eup %5655  ;;  %v1237_v47 = vmul.f32 %v6429_v27, %v6403_v12  ;;  %9193 = vst [vmem:[#allocation6_spill] sm:$0xff] %v6473_v28  ;;  %vm1242_vm2 = vweird.f32 %v6429_v27  ;;  %vm6506_vm4 = vmor %vm1226_vm3, %vm1227_vm1  ;;  %v1061_v13 = vmul.f32 1.442695, %v1016_v6 }
 0x174   : > { %v5658_v0 = vpop.eup %5657  ;;  %v6467_v17 = vadd.f32 1.0, %v5656_v63  ;;  %v1223_v22 = vsub.f32 1.0, %v1222_v5  ;;  %9194 = vst [vmem:[#allocation7_spill] sm:$0xff] %v6476_v29  ;;  %v1645_v40 = vpack.c.bf16 %v6476_v29, %v6473_v28  ;;  %v6487_v25 = vpop.f32.mrf.mxu2  ;;  %vm6515_vm6 = vmor %vm1241_vm5, %vm1242_vm2  ;;  %v1248_v63 = vor.u32 1.1754944e-38, %v1247_v39 }
 0x175   : > { %v6469_v7 = vadd.f32 1.0, %v5658_v0  ;;  %v1238_v52 = vsub.f32 1.0, %v1237_v47  ;;  %vm1246_vm8 = vcmp.eq.f32.partialorder %v1245_v19, 8.507059e+37 }
 0x176   : > { %5659 = vrcp.f32 %v6467_v17  ;;  %v1224_v30 = vmul.f32 %v6424_v20, %v1223_v22  ;;  %v926_v22 = vadd.f32 %v6147_v2, %v6363_v4  ;;  %vm1256_vm11 = vweird.f32 %v6467_v17 }
 0x177   : > { %5661 = vrcp.f32 %v6469_v7  ;;  %v1239_v31 = vmul.f32 %v6429_v27, %v1238_v52  ;;  %v928_v52 = vadd.f32 %v6147_v2, %v6412_v38  ;;  %vm1271_vm13 = vweird.f32 %v6469_v7 }
 0x178   : > { %5663 = vpow2.f32 %v1055_v24  ;;  %v1225_v26 = vadd.f32 %v6424_v20, %v1224_v30  ;;  %v6562_v38 = vadd.f32 %v6149_v3, %v926_v22  ;;  %v1262_v30 = vand.u32 2147483648, %v6467_v17 }
 0x179   : > { %5665 = vpow2.f32 %v1057_v53  ;;  %v1240_v34 = vadd.f32 %v6429_v27, %v1239_v31  ;;  %v1277_v31 = vand.u32 2147483648, %v6469_v7  ;;  %v6568_v33 = vadd.f32 %v6149_v3, %v928_v52 }
 0x17a   : > { %v1229_v54 = vsel %vm6506_vm4, %v6424_v20, %v1225_v26  ;;  %v1275_v26 = vand.u32 2147483647, %v6469_v7  ;;  %v1263_v50 = vor.u32 1.1754944e-38, %v1262_v30 }
 0x17b   : > { %v1244_v32 = vsel %vm6515_vm6, %v6429_v27, %v1240_v34  ;;  %v1234_v1 = vsel %vm1231_vm7, %v1233_v62, %v1229_v54  ;;  %v1018_v54 = vsub.f32 0.0, %v6568_v33 }
 0x17c   : > { %v6490_v41 = vpop.eup %5659  ;;  %v1249_v27 = vsel %vm1246_vm8, %v1248_v63, %v1244_v32  ;;  %v6535_v47 = vpop.f32.mrf.mxu2  ;;  %v6539_v14 = vmul.f32 %v1234_v1, %v6286_v16  ;;  %vm1276_vm1 = vcmp.eq.f32.partialorder %v1275_v26, 8.507059e+37 }
 0x17d   : > { %v6495_v9 = vpop.eup %5661  ;;  %v1252_v58 = vmul.f32 %v6490_v41, %v6467_v17  ;;  %v6542_v61 = vmul.f32 %v1249_v27, %v6295_v23  ;;  %vm1257_vm9 = vweird.f32 %v6490_v41  ;;  %v1065_v63 = vmul.f32 1.442695, %v1018_v54 }
 0x17e   : > { %v5664_v49 = vpop.eup %5663  ;;  %v1267_v12 = vmul.f32 %v6495_v9, %v6469_v7  ;;  %9199 = vst [vmem:[#allocation8_spill] sm:$0xff] %v6539_v14  ;;  %vm1272_vm10 = vweird.f32 %v6495_v9  ;;  %vm6570_vm12 = vmor %vm1256_vm11, %vm1257_vm9 }
 0x17f   : > { %v5666_v51 = vpop.eup %5665  ;;  %v6531_v0 = vadd.f32 1.0, %v5664_v49  ;;  %v1253_v45 = vsub.f32 1.0, %v1252_v58  ;;  %9200 = vst [vmem:[#allocation9_spill] sm:$0xff] %v6542_v61  ;;  %v1646_v16 = vpack.c.bf16 %v6542_v61, %v6539_v14  ;;  %vm6581_vm14 = vmor %vm1271_vm13, %vm1272_vm10  ;;  %v1017_v49 = vsub.f32 0.0, %v6562_v38 }
 0x180   : > { %v6533_v20 = vadd.f32 1.0, %v5666_v51  ;;  %v1268_v5 = vsub.f32 1.0, %v1267_v12  ;;  %v1278_v51 = vor.u32 1.1754944e-38, %v1277_v31 }
 0x181   : > { %1741 = vmatmul.bf16.gmra.mxu3 %v1645_v40  ;;  %1894 = vmatmul.bf16.gmra.mxu0 %v1645_v40  ;;  %5667 = vrcp.f32 %v6531_v0  ;;  %v1254_v8 = vmul.f32 %v6490_v41, %v1253_v45  ;;  %v1063_v62 = vmul.f32 1.442695, %v1017_v49  ;;  %vm1286_vm4 = vweird.f32 %v6531_v0 }
 0x182   : > { %2047 = vmatmul.bf16.gmra.mxu1 %v1645_v40  ;;  %5669 = vrcp.f32 %v6533_v20  ;;  %v1269_v21 = vmul.f32 %v6495_v9, %v1268_v5  ;;  %v1260_v40 = vand.u32 2147483647, %v6467_v17  ;;  %v931_v5 = vadd.f32 %v6147_v2, %v6463_v10 }
 0x183   : > { %5671 = vpow2.f32 %v1059_v59  ;;  %v1255_v24 = vadd.f32 %v6490_v41, %v1254_v8  ;;  %v1292_v22 = vand.u32 2147483648, %v6531_v0  ;;  %v1307_v52 = vand.u32 2147483648, %v6533_v20 }
 0x184   : > { %5673 = vpow2.f32 %v1061_v13  ;;  %v1270_v53 = vadd.f32 %v6495_v9, %v1269_v21  ;;  %v6577_v36 = vpop.f32.mrf.mxu2  ;;  %vm1261_vm15 = vcmp.eq.f32.partialorder %v1260_v40, 8.507059e+37  ;;  %v933_v13 = vadd.f32 %v6147_v2, %v6487_v25 }
 0x185   : > { %v1259_v48 = vsel %vm6570_vm12, %v6490_v41, %v1255_v24  ;;  %v6628_v25 = vadd.f32 %v6149_v3, %v931_v5  ;;  %vm1301_vm6 = vweird.f32 %v6533_v20  ;;  %v1305_v30 = vand.u32 2147483647, %v6533_v20 }
 0x186   : > { %v1274_v17 = vsel %vm6581_vm14, %v6495_v9, %v1270_v53  ;;  %v1264_v58 = vsel %vm1261_vm15, %v1263_v50, %v1259_v48  ;;  %v1290_v53 = vand.u32 2147483647, %v6531_v0  ;;  %v1308_v48 = vor.u32 1.1754944e-38, %v1307_v52 }
 0x187   : > { %v6554_v23 = vpop.eup %5667  ;;  %v1279_v9 = vsel %vm1276_vm1, %v1278_v51, %v1274_v17  ;;  %v6603_v6 = vmul.f32 %v1264_v58, %v6366_v18  ;;  %v1019_v39 = vsub.f32 0.0, %v6628_v25  ;;  %vm1306_vm9 = vcmp.eq.f32.partialorder %v1305_v30, 8.507059e+37 }
 0x188   : > { %v6559_v4 = vpop.eup %5669  ;;  %v1282_v7 = vmul.f32 %v6554_v23, %v6531_v0  ;;  %v6606_v1 = vmul.f32 %v1279_v9, %v6372_v11  ;;  %vm1287_vm2 = vweird.f32 %v6554_v23  ;;  %vm1291_vm8 = vcmp.eq.f32.partialorder %v1290_v53, 8.507059e+37 }
 0x189   : > { %v5672_v34 = vpop.eup %5671  ;;  %v1297_v19 = vmul.f32 %v6559_v4, %v6533_v20  ;;  %9205 = vst [vmem:[#allocation10_spill] sm:$0xff] %v6603_v6  ;;  %vm1302_vm3 = vweird.f32 %v6559_v4  ;;  %vm6636_vm5 = vmor %vm1286_vm4, %vm1287_vm2  ;;  %v1067_v54 = vmul.f32 1.442695, %v1019_v39 }
 0x18a   : > { %v5674_v44 = vpop.eup %5673  ;;  %v6597_v32 = vadd.f32 1.0, %v5672_v34  ;;  %v1283_v12 = vsub.f32 1.0, %v1282_v7  ;;  %9206 = vst [vmem:[#allocation11_spill] sm:$0xff] %v6606_v1  ;;  %v1647_v18 = vpack.c.bf16 %v6606_v1, %v6603_v6  ;;  %vm6645_vm7 = vmor %vm1301_vm6, %vm1302_vm3 }
 0x18b   : > { %v6599_v41 = vadd.f32 1.0, %v5674_v44  ;;  %v1298_v60 = vsub.f32 1.0, %v1297_v19  ;;  %v1293_v44 = vor.u32 1.1754944e-38, %v1292_v22 }
 0x18c   : > { %5675 = vrcp.f32 %v6597_v32  ;;  %v1284_v27 = vmul.f32 %v6554_v23, %v1283_v12  ;;  %v6613_v59 = vpop.f32.mrf.mxu2  ;;  %vm1316_vm12 = vweird.f32 %v6597_v32  ;;  %v1320_v22 = vand.u32 2147483647, %v6597_v32 }
 0x18d   : > { %5677 = vrcp.f32 %v6599_v41  ;;  %v1299_v45 = vmul.f32 %v6559_v4, %v1298_v60  ;;  %vm1331_vm14 = vweird.f32 %v6599_v41  ;;  %v1335_v52 = vand.u32 2147483647, %v6599_v41 }
 0x18e   : > { %5679 = vpow2.f32 %v1063_v62  ;;  %v1285_v8 = vadd.f32 %v6554_v23, %v1284_v27  ;;  %vm1321_vm1 = vcmp.eq.f32.partialorder %v1320_v22, 8.507059e+37 }
 0x18f   : > { %5681 = vpow2.f32 %v1065_v63  ;;  %v1300_v21 = vadd.f32 %v6559_v4, %v1299_v45  ;;  %v938_v63 = vadd.f32 %v6147_v2, %v6577_v36  ;;  %vm1336_vm2 = vcmp.eq.f32.partialorder %v1335_v52, 8.507059e+37 }
 0x190   : > { %v1289_v26 = vsel %vm6636_vm5, %v6554_v23, %v1285_v8 }
 0x191   : > { %1746 = vmatmul.bf16.gmra.mxu3 %v1646_v16  ;;  %1899 = vmatmul.bf16.gmra.mxu0 %v1646_v16  ;;  %v1304_v0 = vsel %vm6645_vm7, %v6559_v4, %v1300_v21  ;;  %v1294_v19 = vsel %vm1291_vm8, %v1293_v44, %v1289_v26 }
 0x192   : > { %2052 = vmatmul.bf16.gmra.mxu1 %v1646_v16  ;;  %v6620_v11 = vpop.eup %5675  ;;  %v6634_v16 = vadd.f32 %v6149_v3, %v933_v13  ;;  %v1309_v4 = vsel %vm1306_vm9, %v1308_v48, %v1304_v0  ;;  %v6669_v9 = vmul.f32 %v1294_v19, %v6432_v43  ;;  %v936_v43 = vadd.f32 %v6147_v2, %v6535_v47 }
 0x193   : > { %v6625_v10 = vpop.eup %5677  ;;  %v1312_v34 = vmul.f32 %v6620_v11, %v6597_v32  ;;  %v6672_v12 = vmul.f32 %v1309_v4, %v6438_v55  ;;  %vm1317_vm10 = vweird.f32 %v6620_v11  ;;  %v6692_v13 = vadd.f32 %v6149_v3, %v938_v63 }
 0x194   : > { %v5680_v31 = vpop.eup %5679  ;;  %v1327_v20 = vmul.f32 %v6625_v10, %v6599_v41  ;;  %v1020_v17 = vsub.f32 0.0, %v6634_v16  ;;  %v6665_v49 = vpop.f32.mrf.mxu2  ;;  %9211 = vst [vmem:[#allocation12_spill] sm:$0xff] %v6669_v9  ;;  %vm1332_vm11 = vweird.f32 %v6625_v10  ;;  %v1322_v47 = vand.u32 2147483648, %v6597_v32  ;;  %vm6699_vm13 = vmor %vm1316_vm12, %vm1317_vm10 }
 0x195   : > { %v5682_v40 = vpop.eup %5681  ;;  %v6661_v7 = vadd.f32 1.0, %v5680_v31  ;;  %v1313_v50 = vsub.f32 1.0, %v1312_v34  ;;  %9212 = vst [vmem:[#allocation13_spill] sm:$0xff] %v6672_v12  ;;  %v1648_v27 = vpack.c.bf16 %v6672_v12, %v6669_v9  ;;  %v6707_v53 = vadd.f32 %v6149_v3, %v936_v43  ;;  %vm6711_vm15 = vmor %vm1331_vm14, %vm1332_vm11 }
 0x196   : > { %v6663_v23 = vadd.f32 1.0, %v5682_v40  ;;  %v1328_v51 = vsub.f32 1.0, %v1327_v20  ;;  %v1069_v58 = vmul.f32 1.442695, %v1020_v17  ;;  %v1022_v26 = vsub.f32 0.0, %v6692_v13 }
 0x197   : > { %5683 = vrcp.f32 %v6661_v7  ;;  %v1314_v60 = vmul.f32 %v6620_v11, %v1313_v50  ;;  %v1323_v0 = vor.u32 1.1754944e-38, %v1322_v47  ;;  %v941_v43 = vadd.f32 %v6147_v2, %v6613_v59 }
 0x198   : > { %5685 = vrcp.f32 %v6663_v23  ;;  %v1329_v62 = vmul.f32 %v6625_v10, %v1328_v51  ;;  %v1073_v19 = vmul.f32 1.442695, %v1022_v26  ;;  %vm1346_vm5 = vweird.f32 %v6661_v7 }
 0x199   : > { %5687 = vpow2.f32 %v1067_v54  ;;  %v1315_v45 = vadd.f32 %v6620_v11, %v1314_v60  ;;  %vm1361_vm7 = vweird.f32 %v6663_v23  ;;  %v6785_v30 = vadd.f32 %v6149_v3, %v941_v43 }
 0x19a   : > { %5689 = vpow2.f32 %v1069_v58  ;;  %v1330_v5 = vadd.f32 %v6625_v10, %v1329_v62  ;;  %v943_v62 = vadd.f32 %v6147_v2, %v6665_v49  ;;  %v1365_v2 = vand.u32 2147483647, %v6663_v23 }
 0x19b   : > { %v1319_v15 = vsel %vm6699_vm13, %v6620_v11, %v1315_v45  ;;  %v1021_v11 = vsub.f32 0.0, %v6707_v53  ;;  %v1352_v45 = vand.u32 2147483648, %v6661_v7 }
 0x19c   : > { %v6697_v8 = vpop.f32.mrf.mxu2  ;;  %v1334_v32 = vsel %vm6711_vm15, %v6625_v10, %v1330_v5  ;;  %v1324_v44 = vsel %vm1321_vm1, %v1323_v0, %v1319_v15  ;;  %v1367_v5 = vand.u32 2147483648, %v6663_v23  ;;  %v6766_v59 = vadd.f32 %v6149_v3, %v943_v62 }
 0x19d   : > { %v6684_v55 = vpop.eup %5683  ;;  %v6733_v4 = vmul.f32 %v1324_v44, %v6498_v46  ;;  %v1071_v51 = vmul.f32 1.442695, %v1021_v11  ;;  %v1353_v15 = vor.u32 1.1754944e-38, %v1352_v45  ;;  %vm1366_vm10 = vcmp.eq.f32.partialorder %v1365_v2, 8.507059e+37 }
 0x19e   : > { %v6689_v36 = vpop.eup %5685  ;;  %vm1347_vm3 = vweird.f32 %v6684_v55  ;;  %v1023_v11 = vsub.f32 0.0, %v6785_v30 }
 0x19f   : > { %v5688_v24 = vpop.eup %5687  ;;  %v1357_v40 = vmul.f32 %v6689_v36, %v6663_v23  ;;  %9217 = vst [vmem:[#allocation14_spill] sm:$0xff] %v6733_v4  ;;  %vm1362_vm4 = vweird.f32 %v6689_v36  ;;  %vm6758_vm6 = vmor %vm1346_vm5, %vm1347_vm3 }
 0x1a0   : > { %v5690_v31 = vpop.eup %5689  ;;  %v6726_v20 = vadd.f32 1.0, %v5688_v24  ;;  %vm6770_vm8 = vmor %vm1361_vm7, %vm1362_vm4 }
 0x1a1   : > { %1751 = vmatmul.bf16.gmra.mxu3 %v1647_v18  ;;  %1904 = vmatmul.bf16.gmra.mxu0 %v1647_v18  ;;  %v6729_v39 = vadd.f32 1.0, %v5690_v31  ;;  %v1358_v17 = vsub.f32 1.0, %v1357_v40 }
 0x1a2   : > { %2057 = vmatmul.bf16.gmra.mxu1 %v1647_v18  ;;  %v1337_v18 = vand.u32 2147483648, %v6599_v41  ;;  %v1342_v41 = vmul.f32 %v6684_v55, %v6661_v7  ;;  %5691 = vrcp.f32 %v6726_v20  ;;  %vm1376_vm13 = vweird.f32 %v6726_v20 }
 0x1a3   : > { %5693 = vrcp.f32 %v6729_v39  ;;  %v1359_v60 = vmul.f32 %v6689_v36, %v1358_v17  ;;  %v1397_v45 = vand.u32 2147483648, %v6729_v39  ;;  %v1380_v47 = vand.u32 2147483647, %v6726_v20 }
 0x1a4   : > { %v1338_v34 = vor.u32 1.1754944e-38, %v1337_v18  ;;  %v1343_v48 = vsub.f32 1.0, %v1342_v41  ;;  %v947_v54 = vpop.f32.mrf.mxu2  ;;  %5695 = vpow2.f32 %v1073_v19  ;;  %v1350_v18 = vand.u32 2147483647, %v6661_v7 }
 0x1a5   : > { %5697 = vpow2.f32 %v1071_v51  ;;  %vm1391_vm15 = vweird.f32 %v6729_v39 }
 0x1a6   : > { %v1339_v10 = vsel %vm1336_vm2, %v1338_v34, %v1334_v32  ;;  %v1344_v58 = vmul.f32 %v6684_v55, %v1343_v48  ;;  %v1368_v32 = vor.u32 1.1754944e-38, %v1367_v5  ;;  %vm1351_vm9 = vcmp.eq.f32.partialorder %v1350_v18, 8.507059e+37 }
 0x1a7   : > { %v6736_v50 = vmul.f32 %v1339_v10, %v6504_v42  ;;  %v1395_v18 = vand.u32 2147483647, %v6729_v39  ;;  %vm1381_vm2 = vcmp.eq.f32.partialorder %v1380_v47, 8.507059e+37 }
 0x1a8   : > { %v6746_v46 = vpop.eup %5691  ;;  %v1345_v42 = vadd.f32 %v6684_v55, %v1344_v58  ;;  %v1075_v58 = vmul.f32 1.442695, %v1023_v11 }
 0x1a9   : > { %9218 = vst [vmem:[#allocation15_spill] sm:$0xff] %v6736_v50  ;;  %v1649_v63 = vpack.c.bf16 %v6736_v50, %v6733_v4  ;;  %v6753_v49 = vpop.eup %5693  ;;  %v1372_v52 = vmul.f32 %v6746_v46, %v6726_v20  ;;  %vm1377_vm11 = vweird.f32 %v6746_v46  ;;  %vm1396_vm3 = vcmp.eq.f32.partialorder %v1395_v18, 8.507059e+37 }
 0x1aa   : > { %v5696_v21 = vpop.eup %5695  ;;  %v1349_v7 = vsel %vm6758_vm6, %v6684_v55, %v1345_v42  ;;  %v1387_v24 = vmul.f32 %v6753_v49, %v6729_v39  ;;  %v1024_v55 = vsub.f32 0.0, %v6766_v59  ;;  %vm1392_vm12 = vweird.f32 %v6753_v49  ;;  %vm6824_vm14 = vmor %vm1376_vm13, %vm1377_vm11 }
 0x1ab   : > { %v5698_v31 = vpop.eup %5697  ;;  %v6789_v40 = vadd.f32 1.0, %v5696_v21  ;;  %v1354_v26 = vsel %vm1351_vm9, %v1353_v15, %v1349_v7  ;;  %vm1393_vm1 = vmor %vm1391_vm15, %vm1392_vm12 }
 0x1ac   : > { %v6787_v41 = vpop.f32.mrf.mxu2  ;;  %v1388_v34 = vsub.f32 1.0, %v1387_v24  ;;  %v6793_v44 = vadd.f32 1.0, %v5698_v31  ;;  %v6797_v10 = vmul.f32 %v1354_v26, %v6562_v38  ;;  %v1077_v17 = vmul.f32 1.442695, %v1024_v55 }
 0x1ad   : > { %5699 = vrcp.f32 %v6789_v40  ;;  %vm1421_vm5 = vweird.f32 %v6789_v40 }
 0x1ae   : > { %9223 = vst [vmem:[#allocation16_spill] sm:$0xff] %v6797_v10  ;;  %v1389_v51 = vmul.f32 %v6753_v49, %v1388_v34  ;;  %5701 = vrcp.f32 %v6793_v44 }
 0x1af   : > { %5703 = vpow2.f32 %v1077_v17 }
 0x1b0   : > { %5705 = vpow2.f32 %v1075_v58 }
 0x1b1   : > { %1756 = vmatmul.bf16.gmra.mxu3 %v1648_v27  ;;  %1909 = vmatmul.bf16.gmra.mxu0 %v1648_v27 }
 0x1b2   : > { %2062 = vmatmul.bf16.gmra.mxu1 %v1648_v27  ;;  %v1360_v27 = vadd.f32 %v6689_v36, %v1359_v60  ;;  %v6808_v60 = vld [vmem:[%s9090_s9] ss:$0 sm:$0xff] }
 0x1b3   : > { %v948_v38 = vadd.f32 %v6808_v60, %v947_v54  ;;  %v946_v43 = vadd.f32 %v6808_v60, %v6697_v8  ;;  %v1382_v54 = vand.u32 2147483648, %v6726_v20 }
 0x1b4   : > { %v1364_v23 = vsel %vm6770_vm8, %v6689_v36, %v1360_v27  ;;  %v1373_v36 = vsub.f32 1.0, %v1372_v52  ;;  %v952_v62 = vpop.f32.mrf.mxu2  ;;  %v1390_v27 = vadd.f32 %v6753_v49, %v1389_v51  ;;  %vm1406_vm8 = vweird.f32 %v6793_v44 }
 0x1b5   : > { %v1369_v0 = vsel %vm1366_vm10, %v1368_v32, %v1364_v23  ;;  %v6832_v8 = vadd.f32 %v6149_v3, %v948_v38  ;;  %v6845_v39 = vadd.f32 %v6149_v3, %v946_v43  ;;  %v1383_v7 = vor.u32 1.1754944e-38, %v1382_v54 }
 0x1b6   : > { %v6800_v48 = vmul.f32 %v1369_v0, %v6568_v33  ;;  %v1374_v19 = vmul.f32 %v6746_v46, %v1373_v36  ;;  %v1394_v52 = vsel %vm1393_vm1, %v6753_v49, %v1390_v27  ;;  %v1398_v23 = vor.u32 1.1754944e-38, %v1397_v45 }
 0x1b7   : > { %v1026_v15 = vsub.f32 0.0, %v6832_v8  ;;  %v951_v43 = vadd.f32 %v6808_v60, %v6787_v41  ;;  %v1427_v45 = vand.u32 2147483648, %v6789_v40 }
 0x1b8   : > { %9224 = vst [vmem:[#allocation17_spill] sm:$0xff] %v6800_v48  ;;  %v1650_v33 = vpack.c.bf16 %v6800_v48, %v6797_v10  ;;  %v1375_v42 = vadd.f32 %v6746_v46, %v1374_v19  ;;  %v1399_v26 = vsel %vm1396_vm3, %v1398_v23, %v1394_v52 }
 0x1b9   : > { %v6861_v17 = vmul.f32 %v1399_v26, %v6634_v16  ;;  %v1081_v19 = vmul.f32 1.442695, %v1026_v15 }
 0x1ba   : > { %v1379_v20 = vsel %vm6824_vm14, %v6746_v46, %v1375_v42  ;;  %v1025_v46 = vsub.f32 0.0, %v6845_v39  ;;  %v953_v42 = vadd.f32 %v6808_v60, %v952_v62  ;;  %v1425_v62 = vand.u32 2147483647, %v6789_v40 }
 0x1bb   : > { %v1384_v55 = vsel %vm1381_vm2, %v1383_v7, %v1379_v20  ;;  %9228 = vst [vmem:[#allocation19_spill] sm:$0xff] %v6861_v17  ;;  %v1410_v7 = vand.u32 2147483647, %v6793_v44 }
 0x1bc   : > { %v6855_v36 = vpop.f32.mrf.mxu2  ;;  %v6858_v11 = vmul.f32 %v1384_v55, %v6628_v25  ;;  %v1079_v58 = vmul.f32 1.442695, %v1025_v46  ;;  %v6890_v41 = vadd.f32 %v6149_v3, %v953_v42  ;;  %vm1426_vm9 = vcmp.eq.f32.partialorder %v1425_v62, 8.507059e+37 }
 0x1bd   : > { %vm1411_vm11 = vcmp.eq.f32.partialorder %v1410_v7, 8.507059e+37 }
 0x1be   : > { %9227 = vst [vmem:[#allocation18_spill] sm:$0xff] %v6858_v11  ;;  %v1651_v16 = vpack.c.bf16 %v6861_v17, %v6858_v11  ;;  %v1028_v26 = vsub.f32 0.0, %v6890_v41 }
 0x1c1   : > { %1761 = vmatmul.bf16.gmra.mxu3 %v1649_v63  ;;  %1914 = vmatmul.bf16.gmra.mxu0 %v1649_v63 }
 0x1c2   : > { %2067 = vmatmul.bf16.gmra.mxu1 %v1649_v63  ;;  %v6815_v63 = vpop.eup %5699 }
 0x1c3   : > { %v6834_v2 = vpop.eup %5701  ;;  %v1417_v21 = vmul.f32 %v6815_v63, %v6789_v40  ;;  %vm1422_vm4 = vweird.f32 %v6815_v63  ;;  %v1412_v40 = vand.u32 2147483648, %v6793_v44 }
 0x1c4   : > { %v5704_v22 = vpop.eup %5703  ;;  %v1402_v31 = vmul.f32 %v6834_v2, %v6793_v44  ;;  %vm6883_vm6 = vmor %vm1421_vm5, %vm1422_vm4  ;;  %vm1407_vm7 = vweird.f32 %v6834_v2 }
 0x1c5   : > { %v5706_v24 = vpop.eup %5705  ;;  %v1418_v32 = vsub.f32 1.0, %v1417_v21  ;;  %v6850_v0 = vadd.f32 1.0, %v5704_v22  ;;  %v957_v22 = vpop.f32.mrf.mxu2  ;;  %vm6905_vm10 = vmor %vm1406_vm8, %vm1407_vm7 }
 0x1c6   : > { %v6853_v49 = vadd.f32 1.0, %v5706_v24  ;;  %v1403_v34 = vsub.f32 1.0, %v1402_v31  ;;  %v6903_v24 = vadd.f32 %v6149_v3, %v951_v43  ;;  %v1428_v31 = vor.u32 1.1754944e-38, %v1427_v45 }
 0x1c7   : > { %v1419_v51 = vmul.f32 %v6815_v63, %v1418_v32  ;;  %5707 = vrcp.f32 %v6850_v0  ;;  %v1085_v45 = vmul.f32 1.442695, %v1028_v26  ;;  %vm1451_vm14 = vweird.f32 %v6850_v0 }
 0x1c8   : > { %5709 = vrcp.f32 %v6853_v49  ;;  %vm1436_vm15 = vweird.f32 %v6853_v49 }
 0x1c9   : > { %5711 = vpow2.f32 %v1081_v19  ;;  %v1420_v27 = vadd.f32 %v6815_v63, %v1419_v51  ;;  %v1413_v51 = vor.u32 1.1754944e-38, %v1412_v40 }
 0x1ca   : > { %5713 = vpow2.f32 %v1079_v58 }
 0x1cb   : > { %v1424_v21 = vsel %vm6883_vm6, %v6815_v63, %v1420_v27 }
 0x1cc   : > { %v1429_v19 = vsel %vm1426_vm9, %v1428_v31, %v1424_v21  ;;  %v958_v31 = vadd.f32 %v6808_v60, %v957_v22  ;;  %v1457_v22 = vand.u32 2147483648, %v6850_v0 }
 0x1cd   : > { %v6878_v54 = vpop.eup %5707  ;;  %v6929_v43 = vmul.f32 %v1429_v19, %v6692_v13  ;;  %v6939_v7 = vpop.f32.mrf.mxu2 }
 0x1ce   : > { %v6892_v18 = vpop.eup %5709  ;;  %v1447_v23 = vmul.f32 %v6878_v54, %v6850_v0  ;;  %vm1452_vm12 = vweird.f32 %v6878_v54  ;;  %v6961_v19 = vadd.f32 %v6149_v3, %v958_v31 }
 0x1cf   : > { %v5712_v52 = vpop.eup %5711  ;;  %v1432_v44 = vmul.f32 %v6892_v18, %v6853_v49  ;;  %9233 = vst [vmem:[#allocation20_spill] sm:$0xff] %v6929_v43  ;;  %vm1437_vm13 = vweird.f32 %v6892_v18  ;;  %vm6969_vm1 = vmor %vm1451_vm14, %vm1452_vm12 }
 0x1d0   : > { %v5714_v32 = vpop.eup %5713  ;;  %v6921_v58 = vadd.f32 1.0, %v5712_v52  ;;  %v1448_v42 = vsub.f32 1.0, %v1447_v23  ;;  %vm6982_vm2 = vmor %vm1436_vm15, %vm1437_vm13 }
 0x1d1   : > { %1766 = vmatmul.bf16.gmra.mxu3 %v1650_v33  ;;  %1919 = vmatmul.bf16.gmra.mxu0 %v1650_v33  ;;  %v6926_v27 = vadd.f32 1.0, %v5714_v32  ;;  %v1433_v62 = vsub.f32 1.0, %v1432_v44  ;;  %v1455_v44 = vand.u32 2147483647, %v6850_v0 }
 0x1d2   : > { %2072 = vmatmul.bf16.gmra.mxu1 %v1650_v33  ;;  %v1404_v33 = vmul.f32 %v6834_v2, %v1403_v34  ;;  %5715 = vrcp.f32 %v6921_v58  ;;  %v1449_v21 = vmul.f32 %v6878_v54, %v1448_v42  ;;  %vm1481_vm7 = vweird.f32 %v6921_v58 }
 0x1d3   : > { %5717 = vrcp.f32 %v6926_v27  ;;  %v1434_v13 = vmul.f32 %v6892_v18, %v1433_v62  ;;  %v1440_v62 = vand.u32 2147483647, %v6853_v49  ;;  %vm1456_vm3 = vcmp.eq.f32.partialorder %v1455_v44, 8.507059e+37 }
 0x1d4   : > { %v1405_v47 = vadd.f32 %v6834_v2, %v1404_v33  ;;  %5719 = vpow2.f32 %v1085_v45  ;;  %v1450_v32 = vadd.f32 %v6878_v54, %v1449_v21  ;;  %vm1466_vm8 = vweird.f32 %v6926_v27 }
 0x1d5   : > { %v1435_v26 = vadd.f32 %v6892_v18, %v1434_v13  ;;  %v962_v34 = vpop.f32.mrf.mxu2  ;;  %vm1441_vm4 = vcmp.eq.f32.partialorder %v1440_v62, 8.507059e+37 }
 0x1d6   : > { %v1409_v55 = vsel %vm6905_vm10, %v6834_v2, %v1405_v47  ;;  %v1027_v2 = vsub.f32 0.0, %v6903_v24  ;;  %v1454_v0 = vsel %vm6969_vm1, %v6878_v54, %v1450_v32 }
 0x1d8   : > { %v1083_v40 = vmul.f32 1.442695, %v1027_v2 }
 0x1da   : > { %5721 = vpow2.f32 %v1083_v40  ;;  %v1458_v40 = vor.u32 1.1754944e-38, %v1457_v22 }
 0x1dc   : > { %v1459_v44 = vsel %vm1456_vm3, %v1458_v40, %v1454_v0 }
 0x1de   : > { %v6866_v38 = vpop.f32.mrf.mxu0 }
 0x1df   : > { %v6870_v25 = vpop.f32.mrf.mxu1 }
 0x1e1   : > { %1771 = vmatmul.bf16.gmra.mxu3 %v1651_v16  ;;  %1924 = vmatmul.bf16.gmra.mxu0 %v1651_v16 }
 0x1e2   : > { %2077 = vmatmul.bf16.gmra.mxu1 %v1651_v16  ;;  %v1414_v16 = vsel %vm1411_vm11, %v1413_v51, %v1409_v55  ;;  %v6953_v55 = vpop.eup %5715 }
 0x1e3   : > { %v6933_v47 = vmul.f32 %v1414_v16, %v6707_v53  ;;  %v6963_v51 = vpop.eup %5717  ;;  %v1477_v45 = vmul.f32 %v6953_v55, %v6921_v58  ;;  %vm1482_vm5 = vweird.f32 %v6953_v55 }
 0x1e4   : > { %v1732_v20 = vpop.f32.mrf.mxu3  ;;  %v5720_v16 = vpop.eup %5719  ;;  %v1462_v54 = vmul.f32 %v6963_v51, %v6926_v27  ;;  %vm1467_vm6 = vweird.f32 %v6963_v51  ;;  %vm7044_vm9 = vmor %vm1481_vm7, %vm1482_vm5 }
 0x1e5   : > { %9234 = vst [vmem:[#allocation21_spill] sm:$0xff] %v6933_v47  ;;  %v1652_v53 = vpack.c.bf16 %v6929_v43, %v6933_v47  ;;  %v5722_v31 = vpop.eup %5721  ;;  %v6998_v22 = vadd.f32 1.0, %v5720_v16  ;;  %v7006_v47 = vmul.f32 %v1459_v44, %v6766_v59  ;;  %vm7057_vm10 = vmor %vm1466_vm8, %vm1467_vm6 }
 0x1e6   : > { %v6909_v63 = vpop.f32.mrf.mxu0  ;;  %v7003_v43 = vadd.f32 1.0, %v5722_v31  ;;  %v1463_v17 = vsub.f32 1.0, %v1462_v54  ;;  %v963_v31 = vadd.f32 %v6808_v60, %v962_v34  ;;  %v1487_v34 = vand.u32 2147483648, %v6921_v58 }
 0x1e7   : > { %v6917_v46 = vpop.f32.mrf.mxu1  ;;  %9239 = vst [vmem:[#allocation22_spill] sm:$0xff] %v7006_v47  ;;  %5723 = vrcp.f32 %v6998_v22  ;;  %vm1511_vm15 = vweird.f32 %v6998_v22 }
 0x1e8   : > { %5725 = vrcp.f32 %v7003_v43  ;;  %v1464_v59 = vmul.f32 %v6963_v51, %v1463_v17  ;;  %v1485_v17 = vand.u32 2147483647, %v6921_v58  ;;  %v7036_v44 = vadd.f32 %v6149_v3, %v963_v31 }
 0x1e9   : > { %vm1496_vm1 = vweird.f32 %v7003_v43 }
 0x1ea   : > { %vm1486_vm11 = vcmp.eq.f32.partialorder %v1485_v17, 8.507059e+37 }
 0x1ec   : > { %v1734_v5 = vpop.f32.mrf.mxu3 }
 0x1ed   : > { %v6936_v52 = vpack.c.bf16 %v1734_v5, %v1732_v20  ;;  %v956_v20 = vadd.f32 %v6808_v60, %v6855_v36  ;;  %v1442_v36 = vand.u32 2147483648, %v6853_v49  ;;  %v1439_v49 = vsel %vm6982_vm2, %v6892_v18, %v1435_v26 }
 0x1ee   : > { %v6941_v23 = vpop.f32.mrf.mxu0  ;;  %v1478_v18 = vsub.f32 1.0, %v1477_v45 }
 0x1ef   : > { %v6945_v15 = vpop.f32.mrf.mxu1  ;;  %v6980_v5 = vadd.f32 %v6149_v3, %v956_v20  ;;  %v1443_v42 = vor.u32 1.1754944e-38, %v1442_v36 }
 0x1f0   : > { %v1479_v0 = vmul.f32 %v6953_v55, %v1478_v18  ;;  %v1472_v18 = vand.u32 2147483648, %v6926_v27 }
 0x1f1   : > { %1776 = vmatmul.bf16.gmra.mxu3 %v1652_v53  ;;  %1929 = vmatmul.bf16.gmra.mxu0 %v1652_v53  ;;  %v1029_v26 = vsub.f32 0.0, %v6980_v5  ;;  %v1444_v21 = vsel %vm1441_vm4, %v1443_v42, %v1439_v49  ;;  %v1465_v42 = vadd.f32 %v6963_v51, %v1464_v59 }
 0x1f2   : > { %2082 = vmatmul.bf16.gmra.mxu1 %v1652_v53  ;;  %v1030_v53 = vsub.f32 0.0, %v6961_v19  ;;  %v7010_v16 = vmul.f32 %v1444_v21, %v6785_v30  ;;  %v1480_v54 = vadd.f32 %v6953_v55, %v1479_v0  ;;  %v1470_v0 = vand.u32 2147483647, %v6926_v27 }
 0x1f3   : > { %v1087_v62 = vmul.f32 1.442695, %v1029_v26  ;;  %v1469_v27 = vsel %vm7057_vm10, %v6963_v51, %v1465_v42 }
 0x1f4   : > { %v1737_v2 = vpop.f32.mrf.mxu3  ;;  %v1089_v20 = vmul.f32 1.442695, %v1030_v53  ;;  %9240 = vst [vmem:[#allocation23_spill] sm:$0xff] %v7010_v16  ;;  %v1653_v30 = vpack.c.bf16 %v7006_v47, %v7010_v16  ;;  %v7028_v53 = vpop.eup %5723  ;;  %v1484_v58 = vsel %vm7044_vm9, %v6953_v55, %v1480_v54  ;;  %v1032_v54 = vsub.f32 0.0, %v7036_v44 }
 0x1f5   : > { %v1473_v16 = vor.u32 1.1754944e-38, %v1472_v18  ;;  %vm1471_vm12 = vcmp.eq.f32.partialorder %v1470_v0, 8.507059e+37  ;;  %vm1512_vm13 = vweird.f32 %v7028_v53 }
 0x1f6   : > { %v6986_v13 = vpop.f32.mrf.mxu0  ;;  %5727 = vpow2.f32 %v1089_v20  ;;  %v965_v20 = vpop.f32.mrf.mxu2  ;;  %v1093_v4 = vmul.f32 1.442695, %v1032_v54  ;;  %vm7118_vm2 = vmor %vm1511_vm15, %vm1512_vm13 }
 0x1f7   : > { %v6994_v32 = vpop.f32.mrf.mxu1  ;;  %5729 = vpow2.f32 %v1087_v62  ;;  %v1507_v62 = vmul.f32 %v7028_v53, %v6998_v22  ;;  %v1474_v42 = vsel %vm1471_vm12, %v1473_v16, %v1469_v27 }
 0x1f9   : > { %v1508_v31 = vsub.f32 1.0, %v1507_v62 }
 0x1fb   : > { %v1509_v0 = vmul.f32 %v7028_v53, %v1508_v31 }
 0x1fc   : > { %v1739_v36 = vpop.f32.mrf.mxu3 }
 0x1fd   : > { %v7013_v45 = vpack.c.bf16 %v1739_v36, %v1737_v2  ;;  %v961_v2 = vadd.f32 %v6808_v60, %v6939_v7  ;;  %v7038_v7 = vpop.eup %5725 }
 0x1fe   : > { %v7016_v40 = vpop.f32.mrf.mxu0  ;;  %v5728_v36 = vpop.eup %5727  ;;  %v1492_v55 = vmul.f32 %v7038_v7, %v7003_v43  ;;  %vm1497_vm14 = vweird.f32 %v7038_v7 }
 0x1ff   : > { %v7020_v49 = vpop.f32.mrf.mxu1  ;;  %v7055_v59 = vadd.f32 %v6149_v3, %v961_v2  ;;  %v5730_v47 = vpop.eup %5729  ;;  %vm7131_vm3 = vmor %vm1496_vm1, %vm1497_vm14 }
 0x200   : > { %v7078_v48 = vadd.f32 1.0, %v5730_v47  ;;  %v1493_v50 = vsub.f32 1.0, %v1492_v55  ;;  %v967_v18 = vpop.f32.mrf.mxu2  ;;  %v1510_v55 = vadd.f32 %v7028_v53, %v1509_v0 }
 0x201   : > { %1781 = vmatmul.bf16.gmra.mxu3 %v1653_v30  ;;  %1934 = vmatmul.bf16.gmra.mxu0 %v1653_v30  ;;  %v1031_v51 = vsub.f32 0.0, %v7055_v59  ;;  %v968_v16 = vadd.f32 %v6808_v60, %v967_v18 }
 0x202   : > { %2087 = vmatmul.bf16.gmra.mxu1 %v1653_v30  ;;  %v1488_v30 = vor.u32 1.1754944e-38, %v1487_v34  ;;  %v7073_v34 = vadd.f32 1.0, %v5728_v36  ;;  %vm1526_vm10 = vweird.f32 %v7078_v48 }
 0x203   : > { %v1091_v62 = vmul.f32 1.442695, %v1031_v51  ;;  %v7110_v31 = vadd.f32 %v6149_v3, %v968_v16 }
 0x204   : > { %v1742_v21 = vpop.f32.mrf.mxu3  ;;  %v1489_v17 = vsel %vm1486_vm11, %v1488_v30, %v1484_v58  ;;  %5731 = vrcp.f32 %v7073_v34  ;;  %v7085_v58 = vmul.f32 %v1474_v42, %v6845_v39  ;;  %vm1541_vm8 = vweird.f32 %v7073_v34 }
 0x205   : > { %v7081_v10 = vmul.f32 %v1489_v17, %v6832_v8  ;;  %5733 = vrcp.f32 %v7078_v48  ;;  %v1494_v8 = vmul.f32 %v7038_v7, %v1493_v50  ;;  %v1517_v50 = vand.u32 2147483648, %v6998_v22 }
 0x206   : > { %v7061_v33 = vpop.f32.mrf.mxu0  ;;  %9246 = vst [vmem:[#allocation25_spill] sm:$0xff] %v7085_v58  ;;  %5735 = vpow2.f32 %v1093_v4  ;;  %v1515_v4 = vand.u32 2147483647, %v6998_v22  ;;  %v1514_v22 = vsel %vm7118_vm2, %v7028_v53, %v1510_v55  ;;  %v1034_v55 = vsub.f32 0.0, %v7110_v31 }
 0x207   : > { %v7069_v2 = vpop.f32.mrf.mxu1  ;;  %9245 = vst [vmem:[#allocation24_spill] sm:$0xff] %v7081_v10  ;;  %v1654_v39 = vpack.c.bf16 %v7081_v10, %v7085_v58  ;;  %5737 = vpow2.f32 %v1091_v62  ;;  %v1495_v17 = vadd.f32 %v7038_v7, %v1494_v8  ;;  %v1518_v16 = vor.u32 1.1754944e-38, %v1517_v50 }
 0x208   : > { %vm1516_vm4 = vcmp.eq.f32.partialorder %v1515_v4, 8.507059e+37  ;;  %v1097_v9 = vmul.f32 1.442695, %v1034_v55 }
 0x209   : > { %v1519_v4 = vsel %vm1516_vm4, %v1518_v16, %v1514_v22 }
 0x20a   : > { %v7102_v54 = vpop.eup %5731  ;;  %v7155_v58 = vmul.f32 %v1519_v4, %v6890_v41 }
 0x20b   : > { %v7112_v51 = vpop.eup %5733  ;;  %v1537_v0 = vmul.f32 %v7102_v54, %v7073_v34  ;;  %vm1542_vm6 = vweird.f32 %v7102_v54 }
 0x20c   : > { %v1744_v36 = vpop.f32.mrf.mxu3  ;;  %v5736_v18 = vpop.eup %5735  ;;  %v1522_v53 = vmul.f32 %v7112_v51, %v7078_v48  ;;  %9251 = vst [vmem:[#allocation26_spill] sm:$0xff] %v7155_v58  ;;  %vm1527_vm7 = vweird.f32 %v7112_v51  ;;  %vm7184_vm9 = vmor %vm1541_vm8, %vm1542_vm6 }
 0x20d   : > { %v7088_v30 = vpack.c.bf16 %v1744_v36, %v1742_v21  ;;  %v966_v21 = vadd.f32 %v6808_v60, %v965_v20  ;;  %v1502_v60 = vand.u32 2147483648, %v7003_v43  ;;  %v1500_v36 = vand.u32 2147483647, %v7003_v43  ;;  %v5738_v26 = vpop.eup %5737  ;;  %vm1528_vm11 = vmor %vm1526_vm10, %vm1527_vm7 }
 0x20e   : > { %v7091_v47 = vpop.f32.mrf.mxu0  ;;  %v1499_v43 = vsel %vm7131_vm3, %v7038_v7, %v1495_v17  ;;  %v7147_v50 = vadd.f32 1.0, %v5736_v18  ;;  %v1538_v8 = vsub.f32 1.0, %v1537_v0  ;;  %v7152_v10 = vadd.f32 1.0, %v5738_v26 }
 0x20f   : > { %v7095_v27 = vpop.f32.mrf.mxu1  ;;  %v7129_v62 = vadd.f32 %v6149_v3, %v966_v21  ;;  %v1503_v20 = vor.u32 1.1754944e-38, %v1502_v60  ;;  %vm1501_vm5 = vcmp.eq.f32.partialorder %v1500_v36, 8.507059e+37  ;;  %v1523_v12 = vsub.f32 1.0, %v1522_v53 }
 0x210   : > { %5739 = vrcp.f32 %v7147_v50  ;;  %v1539_v22 = vmul.f32 %v7102_v54, %v1538_v8  ;;  %v1547_v53 = vand.u32 2147483648, %v7073_v34  ;;  %vm1571_vm1 = vweird.f32 %v7147_v50 }
 0x211   : > { %1786 = vmatmul.bf16.gmra.mxu3 %v1654_v39  ;;  %1939 = vmatmul.bf16.gmra.mxu0 %v1654_v39  ;;  %v1033_v7 = vsub.f32 0.0, %v7129_v62  ;;  %v1504_v17 = vsel %vm1501_vm5, %v1503_v20, %v1499_v43  ;;  %5741 = vrcp.f32 %v7152_v10  ;;  %v1524_v41 = vmul.f32 %v7112_v51, %v1523_v12 }
 0x212   : > { %2092 = vmatmul.bf16.gmra.mxu1 %v1654_v39  ;;  %v7159_v18 = vmul.f32 %v1504_v17, %v6903_v24  ;;  %5743 = vpow2.f32 %v1097_v9  ;;  %v1540_v24 = vadd.f32 %v7102_v54, %v1539_v22  ;;  %v1545_v9 = vand.u32 2147483647, %v7073_v34 }
 0x213   : > { %v1095_v36 = vmul.f32 1.442695, %v1033_v7  ;;  %v1525_v12 = vadd.f32 %v7112_v51, %v1524_v41  ;;  %v1532_v20 = vand.u32 2147483648, %v7078_v48  ;;  %v1530_v7 = vand.u32 2147483647, %v7078_v48 }
 0x214   : > { %v1747_v42 = vpop.f32.mrf.mxu3  ;;  %9252 = vst [vmem:[#allocation27_spill] sm:$0xff] %v7159_v18  ;;  %v1655_v43 = vpack.c.bf16 %v7155_v58, %v7159_v18  ;;  %v1544_v17 = vsel %vm7184_vm9, %v7102_v54, %v1540_v24  ;;  %vm1546_vm12 = vcmp.eq.f32.partialorder %v1545_v9, 8.507059e+37  ;;  %vm1556_vm3 = vweird.f32 %v7152_v10 }
 0x215   : > { %5745 = vpow2.f32 %v1095_v36  ;;  %v1529_v41 = vsel %vm1528_vm11, %v7112_v51, %v1525_v12  ;;  %v1533_v48 = vor.u32 1.1754944e-38, %v1532_v20  ;;  %vm1531_vm13 = vcmp.eq.f32.partialorder %v1530_v7, 8.507059e+37 }
 0x216   : > { %v7135_v39 = vpop.f32.mrf.mxu0  ;;  %v1577_v7 = vand.u32 2147483648, %v7147_v50 }
 0x217   : > { %v7143_v3 = vpop.f32.mrf.mxu1  ;;  %v1534_v24 = vsel %vm1531_vm13, %v1533_v48, %v1529_v41 }
 0x218   : > { %v7211_v51 = vmul.f32 %v1534_v24, %v6980_v5  ;;  %v1578_v48 = vor.u32 1.1754944e-38, %v1577_v7 }
 0x21a   : > { %9256 = vst [vmem:[#allocation29_spill] sm:$0xff] %v7211_v51 }
 0x21c   : > { %v1749_v60 = vpop.f32.mrf.mxu3 }
 0x21d   : > { %v7162_v0 = vpack.c.bf16 %v1749_v60, %v1747_v42  ;;  %v7174_v42 = vpop.eup %5739  ;;  %v1548_v60 = vor.u32 1.1754944e-38, %v1547_v53 }
 0x21e   : > { %v7165_v26 = vpop.f32.mrf.mxu0  ;;  %v7181_v55 = vpop.eup %5741  ;;  %v1567_v34 = vmul.f32 %v7174_v42, %v7147_v50  ;;  %vm1572_vm14 = vweird.f32 %v7174_v42 }
 0x21f   : > { %v7168_v16 = vpop.f32.mrf.mxu1  ;;  %v5744_v8 = vpop.eup %5743  ;;  %v1549_v11 = vsel %vm1546_vm12, %v1548_v60, %v1544_v17  ;;  %vm1557_vm15 = vweird.f32 %v7181_v55  ;;  %v1562_v60 = vand.u32 2147483648, %v7152_v10  ;;  %vm1573_vm2 = vmor %vm1571_vm1, %vm1572_vm14 }
 0x220   : > { %v5746_v36 = vpop.eup %5745  ;;  %v7202_v4 = vadd.f32 1.0, %v5744_v8  ;;  %v1568_v54 = vsub.f32 1.0, %v1567_v34  ;;  %v7207_v53 = vmul.f32 %v1549_v11, %v6961_v19  ;;  %vm1558_vm4 = vmor %vm1556_vm3, %vm1557_vm15 }
 0x221   : > { %1791 = vmatmul.bf16.gmra.mxu3 %v1655_v43  ;;  %1944 = vmatmul.bf16.gmra.mxu0 %v1655_v43  ;;  %v7204_v58 = vadd.f32 1.0, %v5746_v36  ;;  %v1560_v36 = vand.u32 2147483647, %v7152_v10 }
 0x222   : > { %2097 = vmatmul.bf16.gmra.mxu1 %v1655_v43  ;;  %v1552_v43 = vmul.f32 %v7181_v55, %v7152_v10  ;;  %9255 = vst [vmem:[#allocation28_spill] sm:$0xff] %v7207_v53  ;;  %5747 = vrcp.f32 %v7202_v4  ;;  %v1569_v12 = vmul.f32 %v7174_v42, %v1568_v54  ;;  %v1656_v11 = vpack.c.bf16 %v7207_v53, %v7211_v51 }
 0x223   : > { %5749 = vrcp.f32 %v7204_v58  ;;  %vm1561_vm6 = vcmp.eq.f32.partialorder %v1560_v36, 8.507059e+37  ;;  %vm1601_vm9 = vweird.f32 %v7202_v4  ;;  %vm1586_vm11 = vweird.f32 %v7204_v58 }
 0x224   : > { %v1553_v18 = vsub.f32 1.0, %v1552_v43  ;;  %v1570_v19 = vadd.f32 %v7174_v42, %v1569_v12 }
 0x226   : > { %v7195_v22 = vpop.f32.mrf.mxu0  ;;  %v1554_v20 = vmul.f32 %v7181_v55, %v1553_v18  ;;  %v1575_v18 = vand.u32 2147483647, %v7147_v50  ;;  %v1574_v41 = vsel %vm1573_vm2, %v7174_v42, %v1570_v19 }
 0x227   : > { %v7200_v21 = vpop.f32.mrf.mxu1 }
 0x228   : > { %v5748_v5 = vpop.eup %5747  ;;  %v1555_v17 = vadd.f32 %v7181_v55, %v1554_v20  ;;  %vm1576_vm5 = vcmp.eq.f32.partialorder %v1575_v18, 8.507059e+37  ;;  %v1563_v20 = vor.u32 1.1754944e-38, %v1562_v60  ;;  %v1607_v60 = vand.u32 2147483648, %v7202_v4 }
 0x229   : > { %v5750_v34 = vpop.eup %5749  ;;  %v1597_v43 = vmul.f32 %v5748_v5, %v7202_v4  ;;  %vm1602_vm7 = vweird.f32 %v5748_v5 }
 0x22a   : > { %v1559_v24 = vsel %vm1558_vm4, %v7181_v55, %v1555_v17  ;;  %v1582_v50 = vmul.f32 %v5750_v34, %v7204_v58  ;;  %vm1587_vm8 = vweird.f32 %v5750_v34  ;;  %vm1603_vm10 = vmor %vm1601_vm9, %vm1602_vm7 }
 0x22b   : > { %v1598_v53 = vsub.f32 1.0, %v1597_v43  ;;  %v1564_v51 = vsel %vm1561_vm6, %v1563_v20, %v1559_v24  ;;  %vm1588_vm12 = vmor %vm1586_vm11, %vm1587_vm8 }
 0x22c   : > { %v1583_v42 = vsub.f32 1.0, %v1582_v50  ;;  %v7242_v19 = vmul.f32 %v1564_v51, %v7055_v59  ;;  %v1605_v59 = vand.u32 2147483647, %v7202_v4  ;;  %v1590_v51 = vand.u32 2147483647, %v7204_v58 }
 0x22d   : > { %v1599_v7 = vmul.f32 %v5748_v5, %v1598_v53  ;;  %v1592_v53 = vand.u32 2147483648, %v7204_v58 }
 0x22e   : > { %v7215_v9 = vpop.f32.mrf.mxu0  ;;  %9258 = vst [vmem:[#allocation31_spill] sm:$0xff] %v7242_v19  ;;  %v1584_v6 = vmul.f32 %v5750_v34, %v1583_v42  ;;  %vm1606_vm13 = vcmp.eq.f32.partialorder %v1605_v59, 8.507059e+37  ;;  %vm1591_vm14 = vcmp.eq.f32.partialorder %v1590_v51, 8.507059e+37 }
 0x22f   : > { %v7218_v8 = vpop.f32.mrf.mxu1  ;;  %v1600_v18 = vadd.f32 %v5748_v5, %v1599_v7 }
 0x231   : > { %1796 = vmatmul.bf16.gmra.mxu3 %v1656_v11  ;;  %1949 = vmatmul.bf16.gmra.mxu0 %v1656_v11  ;;  %v1604_v36 = vsel %vm1603_vm10, %v5748_v5, %v1600_v18 }
 0x232   : > { %2102 = vmatmul.bf16.gmra.mxu1 %v1656_v11  ;;  %v1579_v11 = vsel %vm1576_vm5, %v1578_v48, %v1574_v41  ;;  %v1608_v41 = vor.u32 1.1754944e-38, %v1607_v60 }
 0x233   : > { %v7239_v10 = vmul.f32 %v1579_v11, %v7036_v44  ;;  %v1585_v44 = vadd.f32 %v5750_v34, %v1584_v6  ;;  %v1593_v6 = vor.u32 1.1754944e-38, %v1592_v53  ;;  %v3260_v53 = vpack.c.bf16 %v7200_v21, %v7168_v16 }
 0x234   : > { %v1609_v50 = vsel %vm1606_vm13, %v1608_v41, %v1604_v36  ;;  %v9261_v41 = vpack.c.bf16 %v7143_v3, %v7095_v27  ;;  %v2138_v16 = vpack.c.bf16 %v7195_v22, %v7165_v26  ;;  %v9264_v27 = vpack.c.bf16 %v6917_v46, %v6870_v25 }
 0x235   : > { %9257 = vst [vmem:[#allocation30_spill] sm:$0xff] %v7239_v10  ;;  %v1657_v17 = vpack.c.bf16 %v7239_v10, %v7242_v19  ;;  %v1589_v48 = vsel %vm1588_vm12, %v5750_v34, %v1585_v44  ;;  %v7253_v4 = vmul.f32 %v1609_v50, %v7110_v31  ;;  %v9266_v22 = vpack.c.bf16 %v7061_v33, %v7016_v40  ;;  %v1752_v33 = vpop.f32.mrf.mxu3 }
 0x236   : > { %v7234_v54 = vpop.f32.mrf.mxu0  ;;  %v1594_v20 = vsel %vm1591_vm14, %v1593_v6, %v1589_v48  ;;  %v9267_v25 = vpack.c.bf16 %v6986_v13, %v6941_v23 }
 0x237   : > { %v2065_v12 = vpop.f32.mrf.mxu1  ;;  %9259 = vst [vmem:[#allocation32_spill] sm:$0xff] %v7253_v4  ;;  %v7256_v11 = vmul.f32 %v1594_v20, %v7129_v62 }
 0x238   : > { %v3261_v59 = vpack.c.bf16 %v2065_v12, %v7218_v8 }
 0x239   : > { %9260 = vst [vmem:[#allocation33_spill] sm:$0xff] %v7256_v11  ;;  %v1658_v58 = vpack.c.bf16 %v7253_v4, %v7256_v11 }
 0x23d   : > { %v1754_v6 = vpop.f32.mrf.mxu3 }
 0x23e   : > { %v1915_v1 = vpop.f32.mrf.mxu0 }
 0x23f   : > { %v2068_v55 = vpop.f32.mrf.mxu1 }
 0x241   : > { %1801 = vmatmul.bf16.gmra.mxu3 %v1657_v17  ;;  %1954 = vmatmul.bf16.gmra.mxu0 %v1657_v17 }
 0x242   : > { %2107 = vmatmul.bf16.gmra.mxu1 %v1657_v17 }
 0x245   : > { %v1757_v20 = vpop.f32.mrf.mxu3 }
 0x246   : > { %v1917_v43 = vpop.f32.mrf.mxu0 }
 0x247   : > { %v2070_v24 = vpop.f32.mrf.mxu1  ;;  %v2140_v44 = vpack.c.bf16 %v1917_v43, %v1915_v1  ;;  %v9262_v1 = vpack.c.bf16 %v7069_v2, %v7020_v49  ;;  %v9265_v2 = vpack.c.bf16 %v7135_v39, %v7091_v47  ;;  %v9268_v47 = vpack.c.bf16 %v6909_v63, %v6866_v38 }
 0x248   : > { %v3262_v60 = vpack.c.bf16 %v2070_v24, %v2068_v55  ;;  %v2139_v55 = vpack.c.bf16 %v7234_v54, %v7215_v9  ;;  %v9263_v9 = vpack.c.bf16 %v6994_v32, %v6945_v15 }
 0x24d   : > { %v1759_v38 = vpop.f32.mrf.mxu3 }
 0x24e   : > { %v1920_v42 = vpop.f32.mrf.mxu0 }
 0x24f   : > { %v2073_v7 = vpop.f32.mrf.mxu1 }
 0x251   : > { %1806 = vmatmul.bf16.gmra.mxu3 %v1658_v58  ;;  %1959 = vmatmul.bf16.gmra.mxu0 %v1658_v58 }
 0x252   : > { %2112 = vmatmul.bf16.gmra.mxu1 %v1658_v58 }
 0x256   : > { %v1922_v5 = vpop.f32.mrf.mxu0 }
 0x257   : > { %v2075_v34 = vpop.f32.mrf.mxu1  ;;  %v2141_v17 = vpack.c.bf16 %v1922_v5, %v1920_v42  ;;  %v1762_v5 = vpop.f32.mrf.mxu3 }
 0x258   : > { %v3263_v18 = vpack.c.bf16 %v2075_v34, %v2073_v7 }
 0x259   : > { %2150 = vmatpush.bf16.xpose.msrb.mxu2 %v2141_v17 }
 0x25a   : > { %3272 = vmatpush.bf16.msra.mxu0 %v3263_v18 }
 0x25e   : > { %3273 = vmatpush.bf16.msra.mxu0 %v3262_v60  ;;  %v7260_v31 = vpop.f32.mrf.mxu0 }
 0x25f   : > { %v7262_v62 = vpop.f32.mrf.mxu1  ;;  %v1764_v60 = vpop.f32.mrf.mxu3 }
 0x261   : > { %2151 = vmatpush.bf16.xpose.msrb.mxu2 %v2140_v44 }
 0x262   : > { %3274 = vmatpush.bf16.msra.mxu0 %v3261_v59  ;;  %v7319_v59 = vpack.c.bf16 %v1754_v6, %v1752_v33 }
 0x266   : > { %3275 = vmatpush.bf16.msra.mxu0 %v3260_v53  ;;  %v7267_v51 = vpop.f32.mrf.mxu0 }
 0x267   : > { %v7269_v36 = vpop.f32.mrf.mxu1 }
 0x269   : > { %2152 = vmatpush.bf16.xpose.msrb.mxu2 %v2139_v55 }
 0x26a   : > { %3276 = vmatpush.bf16.msra.mxu0 %v9261_v41 }
 0x26e   : > { %3277 = vmatpush.bf16.msra.mxu0 %v9262_v1  ;;  %v7279_v8 = vpop.f32.mrf.mxu0 }
 0x26f   : > { %v7281_v21 = vpop.f32.mrf.mxu1 }
 0x271   : > { %2153 = vmatpush.bf16.xpose.msrb.mxu2 %v2138_v16  ;;  %v1767_v16 = vpop.f32.mrf.mxu3 }
 0x272   : > { %3278 = vmatpush.bf16.msra.mxu0 %v9263_v9 }
 0x276   : > { %3279 = vmatpush.bf16.msra.mxu0 %v9264_v27  ;;  %v7291_v3 = vpop.f32.mrf.mxu0 }
 0x277   : > { %v7293_v49 = vpop.f32.mrf.mxu1 }
 0x279   : > { %2154 = vmatpush.bf16.xpose.msrb.mxu2 %v9265_v2 }
 0x27e   : > { %v7298_v54 = vpop.f32.mrf.mxu0 }
 0x27f   : > { %v2088_v26 = vpop.f32.mrf.mxu1 }
 0x281   : > { %2155 = vmatpush.bf16.xpose.msrb.mxu2 %v9266_v22  ;;  %v1769_v22 = vpop.f32.mrf.mxu3 }
 0x286   : > { %v7303_v15 = vpop.f32.mrf.mxu0 }
 0x287   : > { %v2090_v32 = vpop.f32.mrf.mxu1 }
 0x289   : > { %2156 = vmatpush.bf16.xpose.msrb.mxu2 %v9267_v25 }
 0x28e   : > { %v7308_v46 = vpop.f32.mrf.mxu0 }
 0x28f   : > { %v2093_v12 = vpop.f32.mrf.mxu1 }
 0x291   : > { %2157 = vmatpush.bf16.xpose.msrb.mxu2 %v9268_v47  ;;  %v2123_v47 = vpack.c.bf16 %v1759_v38, %v1757_v20 }
 0x296   : > { %v7313_v39 = vpop.f32.mrf.mxu0 }
 0x297   : > { %v2095_v43 = vpop.f32.mrf.mxu1 }
 0x298   : > { %2158 = vmatmul.bf16.vlgmr.msrb.gmra.mxu2 %v6936_v52  ;;  %v3267_v6 = vpack.c.bf16 %v2095_v43, %v2093_v12  ;;  %v2145_v12 = vpack.c.bf16 %v7313_v39, %v7308_v46  ;;  %v2125_v43 = vpack.c.bf16 %v1769_v22, %v1767_v16 }
 0x29e   : > { %v1945_v40 = vpop.f32.mrf.mxu0 }
 0x29f   : > { %v2098_v48 = vpop.f32.mrf.mxu1 }
 0x2a6   : > { %v1947_v24 = vpop.f32.mrf.mxu0 }
 0x2a7   : > { %v2100_v50 = vpop.f32.mrf.mxu1 }
 0x2a8   : > { %2163 = vmatmul.bf16.gmra.mxu2 %v7013_v45  ;;  %v3268_v25 = vpack.c.bf16 %v2100_v50, %v2098_v48  ;;  %v2124_v48 = vpack.c.bf16 %v1764_v60, %v1762_v5 }
 0x2ae   : > { %v1950_v23 = vpop.f32.mrf.mxu0 }
 0x2af   : > { %v2103_v13 = vpop.f32.mrf.mxu1 }
 0x2b6   : > { %v1952_v42 = vpop.f32.mrf.mxu0 }
 0x2b7   : > { %v2105_v7 = vpop.f32.mrf.mxu1  ;;  %v2147_v33 = vpack.c.bf16 %v1952_v42, %v1950_v23 }
 0x2b8   : > { %2168 = vmatmul.bf16.gmra.mxu2 %v7088_v30  ;;  %v3269_v2 = vpack.c.bf16 %v2105_v7, %v2103_v13  ;;  %v3264_v13 = vpack.c.bf16 %v7269_v36, %v7262_v62  ;;  %v2142_v36 = vpack.c.bf16 %v7267_v51, %v7260_v31 }
 0x2be   : > { %v1955_v63 = vpop.f32.mrf.mxu0 }
 0x2bf   : > { %v2108_v58 = vpop.f32.mrf.mxu1 }
 0x2c6   : > { %v1957_v34 = vpop.f32.mrf.mxu0 }
 0x2c7   : > { %v2110_v17 = vpop.f32.mrf.mxu1  ;;  %v2148_v27 = vpack.c.bf16 %v1957_v34, %v1955_v63 }
 0x2c8   : > { %2173 = vmatmul.bf16.gmra.mxu2 %v7162_v0  ;;  %v3270_v9 = vpack.c.bf16 %v2110_v17, %v2108_v58  ;;  %v3265_v58 = vpack.c.bf16 %v7293_v49, %v7281_v21  ;;  %v2143_v21 = vpack.c.bf16 %v7291_v3, %v7279_v8 }
 0x2ce   : > { %v1960_v18 = vpop.f32.mrf.mxu0 }
 0x2cf   : > { %v2113_v44 = vpop.f32.mrf.mxu1 }
 0x2d6   : > { %v1962_v53 = vpop.f32.mrf.mxu0 }
 0x2d7   : > { %v2115_v55 = vpop.f32.mrf.mxu1  ;;  %v2149_v41 = vpack.c.bf16 %v1962_v53, %v1960_v18  ;;  %v3266_v18 = vpack.c.bf16 %v2090_v32, %v2088_v26  ;;  %v2146_v53 = vpack.c.bf16 %v1947_v24, %v1945_v40  ;;  %v2144_v26 = vpack.c.bf16 %v7303_v15, %v7298_v54 }
 0x2d8   : > { %v3271_v1 = vpack.c.bf16 %v2115_v55, %v2113_v44  ;;  %2178 = vmatmul.bf16.gmra.mxu2 %v7319_v59  ;;  %v1772_v44 = vpop.f32.mrf.mxu3 }
 0x2d9   : > { %2239 = vmatpush.bf16.xpose.msrb.mxu3 %v2149_v41 }
 0x2da   : > { %3361 = vmatpush.bf16.msra.mxu1 %v3271_v1 }
 0x2de   : > { %3362 = vmatpush.bf16.msra.mxu1 %v3270_v9 }
 0x2e0   : > { %v1774_v50 = vpop.f32.mrf.mxu3 }
 0x2e1   : > { %2240 = vmatpush.bf16.xpose.msrb.mxu3 %v2148_v27  ;;  %v2126_v46 = vpack.c.bf16 %v1774_v50, %v1772_v44 }
 0x2e2   : > { %3363 = vmatpush.bf16.msra.mxu1 %v3269_v2 }
 0x2e6   : > { %3364 = vmatpush.bf16.msra.mxu1 %v3268_v25 }
 0x2e8   : > { %2183 = vmatmul.bf16.gmra.mxu2 %v2123_v47  ;;  %v1777_v32 = vpop.f32.mrf.mxu3 }
 0x2e9   : > { %2241 = vmatpush.bf16.xpose.msrb.mxu3 %v2147_v33 }
 0x2ea   : > { %3365 = vmatpush.bf16.msra.mxu1 %v3267_v6 }
 0x2ee   : > { %3366 = vmatpush.bf16.msra.mxu1 %v3266_v18 }
 0x2f0   : > { %v1779_v62 = vpop.f32.mrf.mxu3 }
 0x2f1   : > { %2242 = vmatpush.bf16.xpose.msrb.mxu3 %v2146_v53  ;;  %v2127_v54 = vpack.c.bf16 %v1779_v62, %v1777_v32 }
 0x2f2   : > { %3367 = vmatpush.bf16.msra.mxu1 %v3265_v58 }
 0x2f6   : > { %3368 = vmatpush.bf16.msra.mxu1 %v3264_v13 }
 0x2f8   : > { %2188 = vmatmul.bf16.gmra.mxu2 %v2124_v48  ;;  %v1782_v49 = vpop.f32.mrf.mxu3 }
 0x2f9   : > { %2243 = vmatpush.bf16.xpose.msrb.mxu3 %v2145_v12 }
 0x300   : > { %v1784_v39 = vpop.f32.mrf.mxu3 }
 0x301   : > { %2244 = vmatpush.bf16.xpose.msrb.mxu3 %v2144_v26  ;;  %v2128_v8 = vpack.c.bf16 %v1784_v39, %v1782_v49 }
 0x308   : > { %2193 = vmatmul.bf16.gmra.mxu2 %v2125_v43  ;;  %v1787_v15 = vpop.f32.mrf.mxu3 }
 0x309   : > { %2245 = vmatpush.bf16.xpose.msrb.mxu3 %v2143_v21 }
 0x310   : > { %v1789_v40 = vpop.f32.mrf.mxu3 }
 0x311   : > { %2246 = vmatpush.bf16.xpose.msrb.mxu3 %v2142_v36  ;;  %v2129_v31 = vpack.c.bf16 %v1789_v40, %v1787_v15 }
 0x318   : > { %2198 = vmatmul.bf16.gmra.mxu2 %v2126_v46  ;;  %2247 = vmatmul.bf16.vlgmr.msrb.gmra.mxu3 %v6936_v52  ;;  %v1792_v3 = vpop.f32.mrf.mxu3 }
 0x31b   : > { %v7337_v24 = vpop.f32.mrf.mxu2 }
 0x320   : > { %v1794_v51 = vpop.f32.mrf.mxu3 }
 0x321   : > { %v2130_v20 = vpack.c.bf16 %v1794_v51, %v1792_v3 }
 0x323   : > { %v7340_v52 = vpop.f32.mrf.mxu2 }
 0x328   : > { %2203 = vmatmul.bf16.gmra.mxu2 %v2127_v54  ;;  %2252 = vmatmul.bf16.gmra.mxu3 %v7013_v45  ;;  %v1797_v23 = vpop.f32.mrf.mxu3 }
 0x32b   : > { %v7342_v42 = vpop.f32.mrf.mxu2 }
 0x330   : > { %v1799_v45 = vpop.f32.mrf.mxu3 }
 0x331   : > { %v2131_v38 = vpack.c.bf16 %v1799_v45, %v1797_v23 }
 0x333   : > { %v7345_v7 = vpop.f32.mrf.mxu2 }
 0x338   : > { %2208 = vmatmul.bf16.gmra.mxu2 %v2128_v8  ;;  %2257 = vmatmul.bf16.gmra.mxu3 %v7088_v30  ;;  %v1802_v30 = vpop.f32.mrf.mxu3 }
 0x33b   : > { %v7347_v63 = vpop.f32.mrf.mxu2 }
 0x340   : > { %v1804_v5 = vpop.f32.mrf.mxu3 }
 0x341   : > { %v2132_v34 = vpack.c.bf16 %v1804_v5, %v1802_v30 }
 0x348   : > { %2213 = vmatmul.bf16.gmra.mxu2 %v2129_v31  ;;  %2262 = vmatmul.bf16.gmra.mxu3 %v7162_v0  ;;  %v7349_v0 = vpop.f32.mrf.mxu2  ;;  %v1807_v17 = vpop.f32.mrf.mxu3 }
 0x350   : > { %v7351_v60 = vpop.f32.mrf.mxu2  ;;  %v1809_v55 = vpop.f32.mrf.mxu3 }
 0x358   : > { %2218 = vmatmul.bf16.gmra.mxu2 %v2130_v20  ;;  %2267 = vmatmul.bf16.gmra.mxu3 %v7319_v59  ;;  %v2133_v59 = vpack.c.bf16 %v1809_v55, %v1807_v17  ;;  %v7353_v41 = vpop.f32.mrf.mxu2 }
 0x360   : > { %v7378_v50 = vpop.f32.mrf.mxu2 }
 0x368   : > { %2223 = vmatmul.bf16.gmra.mxu2 %v2131_v38  ;;  %2272 = vmatmul.bf16.gmra.mxu3 %v2123_v47  ;;  %v7387_v36 = vpop.f32.mrf.mxu2 }
 0x378   : > { %2228 = vmatmul.bf16.gmra.mxu2 %v2132_v34  ;;  %2277 = vmatmul.bf16.gmra.mxu3 %v2124_v48 }
 0x388   : > { %2233 = vmatmul.bf16.gmra.mxu2 %v2133_v59  ;;  %2282 = vmatmul.bf16.gmra.mxu3 %v2125_v43 }
 0x398   : > { %2287 = vmatmul.bf16.gmra.mxu3 %v2126_v46 }
 0x39b   : > { %v2248_v1 = vpop.f32.mrf.mxu3 }
 0x39c   : > { %v2328_v16 = vmax.f32 %v7337_v24, %v2248_v1 }
 0x39e   : > { %2329 = vmax.xlane.f32.xlu0 %v2328_v16 }
 0x3a3   : > { %v2250_v9 = vpop.f32.mrf.mxu3 }
 0x3a4   : > { %v2331_v27 = vmax.f32 %v7340_v52, %v2250_v9 }
 0x3a6   : > { %2332 = vmax.xlane.f32.xlu0 %v2331_v27 }
 0x3a8   : > { %2292 = vmatmul.bf16.gmra.mxu3 %v2127_v54 }
 0x3ab   : > { %v2253_v2 = vpop.f32.mrf.mxu3 }
 0x3ac   : > { %v2334_v22 = vmax.f32 %v7342_v42, %v2253_v2 }
 0x3ae   : > { %2335 = vmax.xlane.f32.xlu1 %v2334_v22 }
 0x3b3   : > { %v7358_v25 = vpop.f32.mrf.mxu3 }
 0x3b4   : > { %v2337_v47 = vmax.f32 %v7345_v7, %v7358_v25 }
 0x3b6   : > { %2338 = vmax.xlane.f32.xlu1 %v2337_v47 }
 0x3b8   : > { %2297 = vmatmul.bf16.gmra.mxu3 %v2128_v8 }
 0x3bb   : > { %v7362_v33 = vpop.f32.mrf.mxu3 }
 0x3bc   : > { %v2340_v6 = vmax.f32 %v7347_v63, %v7362_v33 }
 0x3be   : > { %2341 = vmax.xlane.f32.xlu2 %v2340_v6 }
 0x3c3   : > { %v7366_v18 = vpop.f32.mrf.mxu3 }
 0x3c4   : > { %v2343_v44 = vmax.f32 %v7349_v0, %v7366_v18 }
 0x3c6   : > { %2344 = vmax.xlane.f32.xlu2 %v2343_v44 }
 0x3c8   : > { %2302 = vmatmul.bf16.gmra.mxu3 %v2129_v31 }
 0x3cb   : > { %v7370_v53 = vpop.f32.mrf.mxu3 }
 0x3cc   : > { %v2346_v58 = vmax.f32 %v7351_v60, %v7370_v53 }
 0x3ce   : > { %2347 = vmax.xlane.f32.xlu0 %v2346_v58 }
 0x3d3   : > { %v7374_v13 = vpop.f32.mrf.mxu3 }
 0x3d4   : > { %v2349_v48 = vmax.f32 %v7353_v41, %v7374_v13 }
 0x3d6   : > { %2350 = vmax.xlane.f32.xlu1 %v2349_v48 }
 0x3d8   : > { %2307 = vmatmul.bf16.gmra.mxu3 %v2130_v20 }
 0x3db   : > { %v7380_v12 = vpop.f32.mrf.mxu3 }
 0x3dc   : > { %v2352_v26 = vmax.f32 %v7378_v50, %v7380_v12 }
 0x3de   : > { %2353 = vmax.xlane.f32.xlu1 %v2352_v26 }
 0x3e3   : > { %v7384_v32 = vpop.f32.mrf.mxu3 }
 0x3e8   : > { %2312 = vmatmul.bf16.gmra.mxu3 %v2131_v38 }
 0x3eb   : > { %v7390_v40 = vpop.f32.mrf.mxu3 }
 0x3f3   : > { %v7405_v17 = vpop.f32.mrf.mxu3 }
 0x3f8   : > { %2317 = vmatmul.bf16.gmra.mxu3 %v2132_v34 }
 0x3fb   : > { %v7423_v58 = vpop.f32.mrf.mxu3 }
 0x408   : > { %2322 = vmatmul.bf16.gmra.mxu3 %v2133_v59  ;;  %v2355_v59 = vmax.f32 %v7387_v36, %v7384_v32 }
 0x411   : > { %v2330_v43 = vpop.xlane.xlu0 %2329 }
 0x412   : > { %v2424_v21 = vsub.f32 %v7337_v24, %v2330_v43  ;;  %v2425_v62 = vsub.f32 %v2248_v1, %v2330_v43  ;;  %v7396_v24 = vpop.f32.mrf.mxu2 }
 0x413   : > { %v2358_v44 = vmax.f32 %v7396_v24, %v7390_v40 }
 0x414   : > { %v2488_v49 = vmul.f32 1.442695, %v2424_v21  ;;  %v2490_v46 = vmul.f32 1.442695, %v2425_v62 }
 0x416   : > { %5751 = vpow2.f32 %v2488_v49 }
 0x417   : > { %5753 = vpow2.f32 %v2490_v46 }
 0x419   : > { %v2333_v39 = vpop.xlane.xlu0 %2332 }
 0x41a   : > { %v2426_v54 = vsub.f32 %v7340_v52, %v2333_v39  ;;  %v2427_v15 = vsub.f32 %v2250_v9, %v2333_v39  ;;  %v7411_v1 = vpop.f32.mrf.mxu2 }
 0x41b   : > { %v2361_v39 = vmax.f32 %v7411_v1, %v7405_v17 }
 0x41c   : > { %v7392_v8 = vpop.eup %5751  ;;  %v2492_v3 = vmul.f32 1.442695, %v2426_v54  ;;  %v2494_v31 = vmul.f32 1.442695, %v2427_v15  ;;  %v7437_v54 = vpop.f32.mrf.mxu3 }
 0x41d   : > { %v7394_v51 = vpop.eup %5753 }
 0x41e   : > { %5755 = vpow2.f32 %v2492_v3  ;;  %v2616_v23 = vadd.f32 %v7394_v51, %v7392_v8 }
 0x41f   : > { %5757 = vpow2.f32 %v2494_v31 }
 0x420   : > { %2617 = vadd.xlane.f32.xlu2 %v2616_v23 }
 0x421   : > { %v2336_v20 = vpop.xlane.xlu1 %2335 }
 0x422   : > { %v2428_v52 = vsub.f32 %v7342_v42, %v2336_v20  ;;  %v2429_v45 = vsub.f32 %v2253_v2, %v2336_v20 }
 0x424   : > { %v7401_v30 = vpop.eup %5755  ;;  %v2496_v38 = vmul.f32 1.442695, %v2428_v52  ;;  %v2498_v5 = vmul.f32 1.442695, %v2429_v45 }
 0x425   : > { %v7403_v34 = vpop.eup %5757 }
 0x426   : > { %5759 = vpow2.f32 %v2496_v38  ;;  %v2619_v55 = vadd.f32 %v7403_v34, %v7401_v30 }
 0x427   : > { %5761 = vpow2.f32 %v2498_v5 }
 0x428   : > { %2620 = vadd.xlane.f32.xlu0 %v2619_v55  ;;  %2356 = vmax.xlane.f32.xlu2 %v2355_v59  ;;  %v7453_v55 = vpop.f32.mrf.mxu3 }
 0x429   : > { %v2339_v42 = vpop.xlane.xlu1 %2338 }
 0x42a   : > { %v2430_v16 = vsub.f32 %v7345_v7, %v2339_v42  ;;  %v2431_v9 = vsub.f32 %v7358_v25, %v2339_v42  ;;  %v7425_v7 = vpop.f32.mrf.mxu2 }
 0x42b   : > { %v2364_v38 = vmax.f32 %v7425_v7, %v7423_v58 }
 0x42c   : > { %v7415_v27 = vpop.eup %5759  ;;  %v2500_v2 = vmul.f32 1.442695, %v2430_v16  ;;  %v2502_v22 = vmul.f32 1.442695, %v2431_v9 }
 0x42d   : > { %v7417_v47 = vpop.eup %5761 }
 0x42e   : > { %5763 = vpow2.f32 %v2500_v2  ;;  %v2622_v6 = vadd.f32 %v7417_v47, %v7415_v27 }
 0x42f   : > { %5765 = vpow2.f32 %v2502_v22 }
 0x430   : > { %2623 = vadd.xlane.f32.xlu0 %v2622_v6  ;;  %2359 = vmax.xlane.f32.xlu2 %v2358_v44 }
 0x431   : > { %v2342_v25 = vpop.xlane.xlu2 %2341 }
 0x432   : > { %v2432_v48 = vsub.f32 %v7347_v63, %v2342_v25  ;;  %v2433_v26 = vsub.f32 %v7362_v33, %v2342_v25  ;;  %v7441_v3 = vpop.f32.mrf.mxu2 }
 0x433   : > { %v2367_v6 = vmax.f32 %v7441_v3, %v7437_v54 }
 0x434   : > { %v7429_v43 = vpop.eup %5763  ;;  %v2504_v21 = vmul.f32 1.442695, %v2432_v48  ;;  %v2506_v62 = vmul.f32 1.442695, %v2433_v26 }
 0x435   : > { %v7431_v49 = vpop.eup %5765 }
 0x436   : > { %5767 = vpow2.f32 %v2504_v21  ;;  %v2625_v46 = vadd.f32 %v7431_v49, %v7429_v43 }
 0x437   : > { %5769 = vpow2.f32 %v2506_v62  ;;  %v7471_v62 = vpop.f32.mrf.mxu3 }
 0x438   : > { %2626 = vadd.xlane.f32.xlu1 %v2625_v46  ;;  %2362 = vmax.xlane.f32.xlu0 %v2361_v39 }
 0x439   : > { %v2345_v63 = vpop.xlane.xlu2 %2344 }
 0x43a   : > { %v2434_v33 = vsub.f32 %v7349_v0, %v2345_v63  ;;  %v2435_v15 = vsub.f32 %v7366_v18, %v2345_v63  ;;  %v7459_v2 = vpop.f32.mrf.mxu2 }
 0x43b   : > { %v2370_v39 = vmax.f32 %v7459_v2, %v7453_v55 }
 0x43c   : > { %v7443_v31 = vpop.eup %5767  ;;  %v2508_v23 = vmul.f32 1.442695, %v2434_v33  ;;  %v2510_v20 = vmul.f32 1.442695, %v2435_v15 }
 0x43d   : > { %v7445_v52 = vpop.eup %5769 }
 0x43e   : > { %5771 = vpow2.f32 %v2508_v23  ;;  %v2628_v45 = vadd.f32 %v7445_v52, %v7443_v31 }
 0x43f   : > { %5773 = vpow2.f32 %v2510_v20 }
 0x440   : > { %2629 = vadd.xlane.f32.xlu1 %v2628_v45  ;;  %2365 = vmax.xlane.f32.xlu0 %v2364_v38 }
 0x441   : > { %v2348_v0 = vpop.xlane.xlu0 %2347 }
 0x442   : > { %v2436_v18 = vsub.f32 %v7351_v60, %v2348_v0  ;;  %v2437_v5 = vsub.f32 %v7370_v53, %v2348_v0  ;;  %v7477_v63 = vpop.f32.mrf.mxu2 }
 0x443   : > { %v2373_v0 = vmax.f32 %v7477_v63, %v7471_v62 }
 0x444   : > { %v7455_v59 = vpop.eup %5771  ;;  %v2512_v42 = vmul.f32 1.442695, %v2436_v18  ;;  %v2514_v16 = vmul.f32 1.442695, %v2437_v5  ;;  %v7489_v18 = vpop.f32.mrf.mxu3 }
 0x445   : > { %v7457_v9 = vpop.eup %5773 }
 0x446   : > { %5775 = vpow2.f32 %v2512_v42  ;;  %v2631_v22 = vadd.f32 %v7457_v9, %v7455_v59 }
 0x447   : > { %5777 = vpow2.f32 %v2514_v16 }
 0x448   : > { %2632 = vadd.xlane.f32.xlu2 %v2631_v22  ;;  %2368 = vmax.xlane.f32.xlu1 %v2367_v6 }
 0x449   : > { %v2351_v60 = vpop.xlane.xlu1 %2350 }
 0x44a   : > { %v2438_v53 = vsub.f32 %v7353_v41, %v2351_v60  ;;  %v2439_v44 = vsub.f32 %v7374_v13, %v2351_v60 }
 0x44c   : > { %v7467_v25 = vpop.eup %5775  ;;  %v2516_v48 = vmul.f32 1.442695, %v2438_v53  ;;  %v2518_v26 = vmul.f32 1.442695, %v2439_v44  ;;  %v7501_v22 = vpop.f32.mrf.mxu3 }
 0x44d   : > { %v7469_v21 = vpop.eup %5777 }
 0x44e   : > { %5779 = vpow2.f32 %v2516_v48  ;;  %v2634_v46 = vadd.f32 %v7469_v21, %v7467_v25 }
 0x44f   : > { %5781 = vpow2.f32 %v2518_v26 }
 0x450   : > { %2635 = vadd.xlane.f32.xlu2 %v2634_v46  ;;  %2371 = vmax.xlane.f32.xlu1 %v2370_v39 }
 0x451   : > { %v2354_v41 = vpop.xlane.xlu1 %2353 }
 0x452   : > { %v2440_v13 = vsub.f32 %v7378_v50, %v2354_v41  ;;  %v2441_v33 = vsub.f32 %v7380_v12, %v2354_v41  ;;  %v7491_v50 = vpop.f32.mrf.mxu2 }
 0x453   : > { %v2376_v16 = vmax.f32 %v7491_v50, %v7489_v18 }
 0x454   : > { %v7481_v15 = vpop.eup %5779  ;;  %v2520_v23 = vmul.f32 1.442695, %v2440_v13  ;;  %v2522_v20 = vmul.f32 1.442695, %v2441_v33  ;;  %v7507_v53 = vpop.f32.mrf.mxu3 }
 0x455   : > { %v7483_v45 = vpop.eup %5781 }
 0x456   : > { %5783 = vpow2.f32 %v2520_v23  ;;  %v2637_v38 = vadd.f32 %v7483_v45, %v7481_v15 }
 0x457   : > { %5785 = vpow2.f32 %v2522_v20 }
 0x458   : > { %2638 = vadd.xlane.f32.xlu0 %v2637_v38  ;;  %2374 = vmax.xlane.f32.xlu2 %v2373_v0 }
 0x45a   : > { %v7503_v6 = vpop.f32.mrf.mxu2 }
 0x45b   : > { %v2379_v60 = vmax.f32 %v7503_v6, %v7501_v22 }
 0x45c   : > { %v7493_v12 = vpop.eup %5783 }
 0x45d   : > { %v7495_v5 = vpop.eup %5785 }
 0x45e   : > { %v2640_v42 = vadd.f32 %v7495_v5, %v7493_v12 }
 0x460   : > { %2641 = vadd.xlane.f32.xlu0 %v2640_v42  ;;  %2377 = vmax.xlane.f32.xlu2 %v2376_v16 }
 0x462   : > { %v7509_v44 = vpop.f32.mrf.mxu2 }
 0x463   : > { %v2382_v48 = vmax.f32 %v7509_v44, %v7507_v53 }
 0x468   : > { %2380 = vmax.xlane.f32.xlu0 %v2379_v60  ;;  %v7515_v60 = vpop.f32.mrf.mxu3 }
 0x470   : > { %2383 = vmax.xlane.f32.xlu0 %v2382_v48 }
 0x493   : > { %v2618_v26 = vpop.xlane.xlu2 %2617 }
 0x494   : > { %5787 = vrcp.f32 %v2618_v26  ;;  %v2723_v4 = vand.u32 2147483648, %v2618_v26  ;;  %vm2717_vm1 = vweird.f32 %v2618_v26 }
 0x49a   : > { %v5788_v46 = vpop.eup %5787 }
 0x49b   : > { %v2713_v39 = vmul.f32 %v5788_v46, %v2618_v26  ;;  %v2621_v41 = vpop.xlane.xlu0 %2620  ;;  %v2357_v13 = vpop.xlane.xlu2 %2356  ;;  %vm2718_vm15 = vweird.f32 %v5788_v46 }
 0x49c   : > { %5789 = vrcp.f32 %v2621_v41  ;;  %v2442_v23 = vsub.f32 %v7387_v36, %v2357_v13  ;;  %v2443_v20 = vsub.f32 %v7384_v32, %v2357_v13  ;;  %v2721_v36 = vand.u32 2147483647, %v2618_v26  ;;  %vm7522_vm2 = vmor %vm2717_vm1, %vm2718_vm15 }
 0x49d   : > { %v2714_v33 = vsub.f32 1.0, %v2713_v39  ;;  %v7519_v39 = vpop.f32.mrf.mxu2  ;;  %v2735_v26 = vand.u32 2147483647, %v2621_v41  ;;  %vm2731_vm5 = vweird.f32 %v2621_v41 }
 0x49e   : > { %v2524_v0 = vmul.f32 1.442695, %v2442_v23  ;;  %v2526_v42 = vmul.f32 1.442695, %v2443_v20  ;;  %v2737_v23 = vand.u32 2147483648, %v2621_v41  ;;  %vm2722_vm4 = vcmp.eq.f32.partialorder %v2721_v36, 8.507059e+37 }
 0x49f   : > { %v2715_v38 = vmul.f32 %v5788_v46, %v2714_v33  ;;  %vm2736_vm7 = vcmp.eq.f32.partialorder %v2735_v26, 8.507059e+37 }
 0x4a0   : > { %5791 = vpow2.f32 %v2524_v0 }
 0x4a1   : > { %v2716_v48 = vadd.f32 %v5788_v46, %v2715_v38  ;;  %5793 = vpow2.f32 %v2526_v42  ;;  %v2724_v42 = vor.u32 1.1754944e-38, %v2723_v4 }
 0x4a2   : > { %v5790_v16 = vpop.eup %5789 }
 0x4a3   : > { %v2727_v11 = vmul.f32 %v5790_v16, %v2621_v41  ;;  %v7517_v10 = vpop.xlane.xlu0 %2623  ;;  %v2360_v19 = vpop.xlane.xlu2 %2359  ;;  %v2720_v33 = vsel %vm7522_vm2, %v5788_v46, %v2716_v48  ;;  %vm2732_vm3 = vweird.f32 %v5790_v16 }
 0x4a4   : > { %5795 = vrcp.f32 %v7517_v10  ;;  %v2444_v20 = vsub.f32 %v7396_v24, %v2360_v19  ;;  %v2445_v38 = vsub.f32 %v7390_v40, %v2360_v19  ;;  %vm2733_vm6 = vmor %vm2731_vm5, %vm2732_vm3  ;;  %v2738_v19 = vor.u32 1.1754944e-38, %v2737_v23 }
 0x4a5   : > { %v2728_v13 = vsub.f32 1.0, %v2727_v11  ;;  %v2725_v11 = vsel %vm2722_vm4, %v2724_v42, %v2720_v33  ;;  %v7549_v33 = vpop.f32.mrf.mxu2  ;;  %vm2745_vm9 = vweird.f32 %v7517_v10 }
 0x4a6   : > { %v7530_v0 = vpop.eup %5791  ;;  %v2528_v29 = vmul.f32 1.442695, %v2444_v20  ;;  %v2530_v28 = vmul.f32 1.442695, %v2445_v38  ;;  %v3160_v41 = vmul.f32 %v7392_v8, %v2725_v11 }
 0x4a7   : > { %v2729_v61 = vmul.f32 %v5790_v16, %v2728_v13  ;;  %v7532_v14 = vpop.eup %5793  ;;  %v3161_v13 = vmul.f32 %v7394_v51, %v2725_v11 }
 0x4a8   : > { %v2643_v46 = vadd.f32 %v7532_v14, %v7530_v0  ;;  %5797 = vpow2.f32 %v2528_v29 }
 0x4a9   : > { %v2730_v35 = vadd.f32 %v5790_v16, %v2729_v61  ;;  %5799 = vpow2.f32 %v2530_v28  ;;  %v7542_v61 = vpop.f32.mrf.mxu3 }
 0x4aa   : > { %v7536_v24 = vpop.eup %5795  ;;  %2644 = vadd.xlane.f32.xlu1 %v2643_v46 }
 0x4ab   : > { %v2734_v4 = vsel %vm2733_vm6, %v5790_v16, %v2730_v35  ;;  %v2741_v40 = vmul.f32 %v7536_v24, %v7517_v10  ;;  %v7540_v48 = vpop.xlane.xlu1 %2626  ;;  %v2363_v36 = vpop.xlane.xlu0 %2362  ;;  %vm2746_vm8 = vweird.f32 %v7536_v24 }
 0x4ac   : > { %v2739_v32 = vsel %vm2736_vm7, %v2738_v19, %v2734_v4  ;;  %5801 = vrcp.f32 %v7540_v48  ;;  %v2446_v28 = vsub.f32 %v7411_v1, %v2363_v36  ;;  %v2447_v23 = vsub.f32 %v7405_v17, %v2363_v36  ;;  %vm7574_vm10 = vmor %vm2745_vm9, %vm2746_vm8 }
 0x4ad   : > { %v3162_v35 = vmul.f32 %v7401_v30, %v2739_v32  ;;  %v3163_v29 = vmul.f32 %v7403_v34, %v2739_v32  ;;  %v2742_v16 = vsub.f32 1.0, %v2741_v40  ;;  %v2751_v4 = vand.u32 2147483648, %v7517_v10 }
 0x4ae   : > { %v7553_v42 = vpop.eup %5797  ;;  %v2532_v26 = vmul.f32 1.442695, %v2446_v28  ;;  %v2534_v46 = vmul.f32 1.442695, %v2447_v23  ;;  %vm2759_vm12 = vweird.f32 %v7540_v48 }
 0x4af   : > { %v3224_v20 = vpack.c.bf16 %v3162_v35, %v3160_v41  ;;  %v3225_v38 = vpack.c.bf16 %v3163_v29, %v3161_v13  ;;  %v2743_v8 = vmul.f32 %v7536_v24, %v2742_v16  ;;  %v7556_v51 = vpop.eup %5799  ;;  %v2749_v13 = vand.u32 2147483647, %v7517_v10 }
 0x4b0   : > { %5803 = vpow2.f32 %v2532_v26  ;;  %v2646_v34 = vadd.f32 %v7556_v51, %v7553_v42  ;;  %v2765_v35 = vand.u32 2147483648, %v7540_v48 }
 0x4b1   : > { %3280 = vmatmul.bf16.vlgmr.msra.gmra.mxu0 %v3224_v20  ;;  %3369 = vmatmul.bf16.vlgmr.msra.gmra.mxu1 %v3225_v38  ;;  %5805 = vpow2.f32 %v2534_v46  ;;  %v2744_v19 = vadd.f32 %v7536_v24, %v2743_v8  ;;  %v7569_v32 = vpop.f32.mrf.mxu3  ;;  %v2752_v8 = vor.u32 1.1754944e-38, %v2751_v4  ;;  %vm2750_vm13 = vcmp.eq.f32.partialorder %v2749_v13, 8.507059e+37 }
 0x4b2   : > { %v5802_v30 = vpop.eup %5801  ;;  %2647 = vadd.xlane.f32.xlu1 %v2646_v34 }
 0x4b3   : > { %v2755_v1 = vmul.f32 %v5802_v30, %v7540_v48  ;;  %v7561_v17 = vpop.xlane.xlu1 %2629  ;;  %v2366_v11 = vpop.xlane.xlu0 %2365  ;;  %vm2760_vm11 = vweird.f32 %v5802_v30  ;;  %v2748_v10 = vsel %vm7574_vm10, %v7536_v24, %v2744_v19  ;;  %v2385_v24 = vmax.f32 %v7519_v39, %v7515_v60 }
 0x4b4   : > { %5807 = vrcp.f32 %v7561_v17  ;;  %v2448_v36 = vsub.f32 %v7425_v7, %v2366_v11  ;;  %v2449_v41 = vsub.f32 %v7423_v58, %v2366_v11  ;;  %v7580_v7 = vpop.f32.mrf.mxu2  ;;  %v2763_v58 = vand.u32 2147483647, %v7540_v48  ;;  %vm7591_vm14 = vmor %vm2759_vm12, %vm2760_vm11 }
 0x4b5   : > { %v2756_v40 = vsub.f32 1.0, %v2755_v1  ;;  %v2766_v11 = vor.u32 1.1754944e-38, %v2765_v35  ;;  %vm2773_vm2 = vweird.f32 %v7561_v17 }
 0x4b6   : > { %v2536_v28 = vmul.f32 1.442695, %v2448_v36  ;;  %v2538_v23 = vmul.f32 1.442695, %v2449_v41  ;;  %v7578_v20 = vpop.eup %5803  ;;  %vm2764_vm15 = vcmp.eq.f32.partialorder %v2763_v58, 8.507059e+37 }
 0x4b7   : > { %v2757_v16 = vmul.f32 %v5802_v30, %v2756_v40  ;;  %v7586_v38 = vpop.eup %5805  ;;  %v2753_v40 = vsel %vm2750_vm13, %v2752_v8, %v2748_v10 }
 0x4b8   : > { %5809 = vpow2.f32 %v2536_v28  ;;  %v2649_v1 = vadd.f32 %v7586_v38, %v7578_v20 }
 0x4b9   : > { %v2758_v26 = vadd.f32 %v5802_v30, %v2757_v16  ;;  %5811 = vpow2.f32 %v2538_v23  ;;  %v3164_v16 = vmul.f32 %v7415_v27, %v2753_v40  ;;  %v3165_v23 = vmul.f32 %v7417_v47, %v2753_v40  ;;  %v7616_v34 = vpop.f32.mrf.mxu3 }
 0x4ba   : > { %v7589_v46 = vpop.eup %5807  ;;  %2650 = vadd.xlane.f32.xlu2 %v2649_v1  ;;  %2386 = vmax.xlane.f32.xlu1 %v2385_v24  ;;  %v2779_v40 = vand.u32 2147483648, %v7561_v17 }
 0x4bb   : > { %v2769_v19 = vmul.f32 %v7589_v46, %v7561_v17  ;;  %v7601_v48 = vpop.xlane.xlu2 %2632  ;;  %v2369_v4 = vpop.xlane.xlu1 %2368  ;;  %v2762_v36 = vsel %vm7591_vm14, %v5802_v30, %v2758_v26  ;;  %vm2774_vm1 = vweird.f32 %v7589_v46 }
 0x4bc   : > { %5813 = vrcp.f32 %v7601_v48  ;;  %v2450_v13 = vsub.f32 %v7441_v3, %v2369_v4  ;;  %v2451_v35 = vsub.f32 %v7437_v54, %v2369_v4  ;;  %v2767_v29 = vsel %vm2764_vm15, %v2766_v11, %v2762_v36  ;;  %v7621_v47 = vpop.f32.mrf.mxu2  ;;  %vm7639_vm3 = vmor %vm2773_vm2, %vm2774_vm1 }
 0x4bd   : > { %v2770_v41 = vsub.f32 1.0, %v2769_v19  ;;  %v3166_v28 = vmul.f32 %v7429_v43, %v2767_v29  ;;  %v3167_v10 = vmul.f32 %v7431_v49, %v2767_v29  ;;  %v2388_v49 = vmax.f32 %v7549_v33, %v7542_v61 }
 0x4be   : > { %v7612_v30 = vpop.eup %5809  ;;  %v2540_v58 = vmul.f32 1.442695, %v2450_v13  ;;  %v2542_v8 = vmul.f32 1.442695, %v2451_v35  ;;  %v2777_v35 = vand.u32 2147483647, %v7561_v17  ;;  %vm2787_vm5 = vweird.f32 %v7601_v48 }
 0x4bf   : > { %v7614_v26 = vpop.eup %5811  ;;  %v2771_v3 = vmul.f32 %v7589_v46, %v2770_v41  ;;  %v3226_v54 = vpack.c.bf16 %v3166_v28, %v3164_v16  ;;  %v3227_v1 = vpack.c.bf16 %v3167_v10, %v3165_v23  ;;  %v2793_v29 = vand.u32 2147483648, %v7601_v48 }
 0x4c0   : > { %5815 = vpow2.f32 %v2540_v58  ;;  %v2652_v27 = vadd.f32 %v7614_v26, %v7612_v30  ;;  %vm2778_vm6 = vcmp.eq.f32.partialorder %v2777_v35, 8.507059e+37 }
 0x4c1   : > { %5817 = vpow2.f32 %v2542_v8  ;;  %3285 = vmatmul.bf16.gmra.mxu0 %v3226_v54  ;;  %3374 = vmatmul.bf16.gmra.mxu1 %v3227_v1  ;;  %v2772_v4 = vadd.f32 %v7589_v46, %v2771_v3 }
 0x4c2   : > { %v5814_v43 = vpop.eup %5813  ;;  %2653 = vadd.xlane.f32.xlu2 %v2652_v27  ;;  %2389 = vmax.xlane.f32.xlu1 %v2388_v49  ;;  %v7654_v27 = vpop.f32.mrf.mxu3 }
 0x4c3   : > { %v2783_v24 = vmul.f32 %v5814_v43, %v7601_v48  ;;  %v7626_v11 = vpop.xlane.xlu2 %2635  ;;  %v2372_v19 = vpop.xlane.xlu1 %2371  ;;  %vm2788_vm4 = vweird.f32 %v5814_v43  ;;  %v2776_v17 = vsel %vm7639_vm3, %v7589_v46, %v2772_v4  ;;  %v2391_v46 = vmax.f32 %v7580_v7, %v7569_v32 }
 0x4c4   : > { %5819 = vrcp.f32 %v7626_v11  ;;  %v2452_v41 = vsub.f32 %v7459_v2, %v2372_v19  ;;  %v2453_v13 = vsub.f32 %v7453_v55, %v2372_v19  ;;  %v2780_v2 = vor.u32 1.1754944e-38, %v2779_v40  ;;  %vm7656_vm7 = vmor %vm2787_vm5, %vm2788_vm4 }
 0x4c5   : > { %v2784_v36 = vsub.f32 1.0, %v2783_v24  ;;  %v2791_v55 = vand.u32 2147483647, %v7601_v48  ;;  %v2794_v24 = vor.u32 1.1754944e-38, %v2793_v29  ;;  %vm2801_vm10 = vweird.f32 %v7626_v11 }
 0x4c6   : > { %v7637_v16 = vpop.eup %5815  ;;  %v2544_v10 = vmul.f32 1.442695, %v2452_v41  ;;  %v2546_v58 = vmul.f32 1.442695, %v2453_v13  ;;  %v2781_v40 = vsel %vm2778_vm6, %v2780_v2, %v2776_v17  ;;  %v7669_v41 = vpop.f32.mrf.mxu2 }
 0x4c7   : > { %v2785_v23 = vmul.f32 %v5814_v43, %v2784_v36  ;;  %v7643_v8 = vpop.eup %5817  ;;  %vm2792_vm8 = vcmp.eq.f32.partialorder %v2791_v55, 8.507059e+37 }
 0x4c8   : > { %5821 = vpow2.f32 %v2544_v10  ;;  %v2655_v54 = vadd.f32 %v7643_v8, %v7637_v16 }
 0x4c9   : > { %v2786_v3 = vadd.f32 %v5814_v43, %v2785_v23  ;;  %5823 = vpow2.f32 %v2546_v58  ;;  %v3168_v23 = vmul.f32 %v7443_v31, %v2781_v40  ;;  %v3169_v58 = vmul.f32 %v7445_v52, %v2781_v40 }
 0x4ca   : > { %v7652_v1 = vpop.eup %5819  ;;  %2656 = vadd.xlane.f32.xlu0 %v2655_v54  ;;  %2392 = vmax.xlane.f32.xlu2 %v2391_v46  ;;  %v2394_v52 = vmax.f32 %v7621_v47, %v7616_v34  ;;  %v7693_v40 = vpop.f32.mrf.mxu3 }
 0x4cb   : > { %v2797_v48 = vmul.f32 %v7652_v1, %v7626_v11  ;;  %v7664_v19 = vpop.xlane.xlu0 %2638  ;;  %v2375_v4 = vpop.xlane.xlu2 %2374  ;;  %v2790_v36 = vsel %vm7656_vm7, %v5814_v43, %v2786_v3  ;;  %vm2802_vm9 = vweird.f32 %v7652_v1 }
 0x4cc   : > { %5825 = vrcp.f32 %v7664_v19  ;;  %v2454_v35 = vsub.f32 %v7477_v63, %v2375_v4  ;;  %v2455_v29 = vsub.f32 %v7471_v62, %v2375_v4  ;;  %v2795_v28 = vsel %vm2792_vm8, %v2794_v24, %v2790_v36  ;;  %vm7698_vm11 = vmor %vm2801_vm10, %vm2802_vm9 }
 0x4cd   : > { %v2798_v13 = vsub.f32 1.0, %v2797_v48  ;;  %v3170_v10 = vmul.f32 %v7455_v59, %v2795_v28  ;;  %v3171_v43 = vmul.f32 %v7457_v9, %v2795_v28  ;;  %v2805_v48 = vand.u32 2147483647, %v7626_v11 }
 0x4ce   : > { %v7677_v2 = vpop.eup %5821  ;;  %v2548_v17 = vmul.f32 1.442695, %v2454_v35  ;;  %v2550_v3 = vmul.f32 1.442695, %v2455_v29  ;;  %v2807_v4 = vand.u32 2147483648, %v7626_v11  ;;  %vm2815_vm14 = vweird.f32 %v7664_v19 }
 0x4cf   : > { %v2799_v55 = vmul.f32 %v7652_v1, %v2798_v13  ;;  %v7680_v54 = vpop.eup %5823  ;;  %v3228_v63 = vpack.c.bf16 %v3170_v10, %v3168_v23  ;;  %v3229_v49 = vpack.c.bf16 %v3171_v43, %v3169_v58  ;;  %v2819_v28 = vand.u32 2147483647, %v7664_v19  ;;  %v7706_v58 = vpop.f32.mrf.mxu2 }
 0x4d0   : > { %5827 = vpow2.f32 %v2548_v17  ;;  %v2658_v31 = vadd.f32 %v7680_v54, %v7677_v2  ;;  %v2821_v23 = vand.u32 2147483648, %v7664_v19  ;;  %vm2806_vm13 = vcmp.eq.f32.partialorder %v2805_v48, 8.507059e+37 }
 0x4d1   : > { %5829 = vpow2.f32 %v2550_v3  ;;  %3290 = vmatmul.bf16.gmra.mxu0 %v3228_v63  ;;  %3379 = vmatmul.bf16.gmra.mxu1 %v3229_v49  ;;  %v2800_v59 = vadd.f32 %v7652_v1, %v2799_v55  ;;  %v2808_v17 = vor.u32 1.1754944e-38, %v2807_v4  ;;  %v2397_v3 = vmax.f32 %v7669_v41, %v7654_v27 }
 0x4d2   : > { %v5826_v62 = vpop.eup %5825  ;;  %2659 = vadd.xlane.f32.xlu0 %v2658_v31  ;;  %2395 = vmax.xlane.f32.xlu2 %v2394_v52  ;;  %v2822_v31 = vor.u32 1.1754944e-38, %v2821_v23  ;;  %vm2820_vm1 = vcmp.eq.f32.partialorder %v2819_v28, 8.507059e+37  ;;  %v7727_v23 = vpop.f32.mrf.mxu3 }
 0x4d3   : > { %v2811_v9 = vmul.f32 %v5826_v62, %v7664_v19  ;;  %v7689_v46 = vpop.xlane.xlu0 %2641  ;;  %v2378_v24 = vpop.xlane.xlu2 %2377  ;;  %vm2816_vm12 = vweird.f32 %v5826_v62 }
 0x4d4   : > { %v2456_v13 = vsub.f32 %v7491_v50, %v2378_v24  ;;  %v2457_v35 = vsub.f32 %v7489_v18, %v2378_v24  ;;  %v2804_v18 = vsel %vm7698_vm11, %v7652_v1, %v2800_v59  ;;  %vm2817_vm15 = vmor %vm2815_vm14, %vm2816_vm12  ;;  %vm2829_vm3 = vweird.f32 %v7689_v46 }
 0x4d5   : > { %v2812_v36 = vsub.f32 1.0, %v2811_v9  ;;  %v2809_v52 = vsel %vm2806_vm13, %v2808_v17, %v2804_v18 }
 0x4d6   : > { %v7704_v10 = vpop.eup %5827  ;;  %v2552_v11 = vmul.f32 1.442695, %v2456_v13  ;;  %v2554_v55 = vmul.f32 1.442695, %v2457_v35  ;;  %v3172_v19 = vmul.f32 %v7467_v25, %v2809_v52 }
 0x4d7   : > { %v2813_v43 = vmul.f32 %v5826_v62, %v2812_v36  ;;  %v7711_v50 = vpop.eup %5829  ;;  %v3173_v36 = vmul.f32 %v7469_v21, %v2809_v52  ;;  %v2400_v21 = vmax.f32 %v7706_v58, %v7693_v40 }
 0x4d8   : > { %5831 = vpow2.f32 %v2552_v11  ;;  %v2661_v49 = vadd.f32 %v7711_v50, %v7704_v10 }
 0x4d9   : > { %v2814_v63 = vadd.f32 %v5826_v62, %v2813_v43  ;;  %5833 = vpow2.f32 %v2554_v55 }
 0x4da   : > { %2662 = vadd.xlane.f32.xlu1 %v2661_v49  ;;  %2398 = vmax.xlane.f32.xlu0 %v2397_v3 }
 0x4db   : > { %v2381_v1 = vpop.xlane.xlu0 %2380  ;;  %v2818_v59 = vsel %vm2817_vm15, %v5826_v62, %v2814_v63 }
 0x4dc   : > { %v2458_v9 = vsub.f32 %v7503_v6, %v2381_v1  ;;  %v2459_v24 = vsub.f32 %v7501_v22, %v2381_v1  ;;  %v2823_v48 = vsel %vm2820_vm1, %v2822_v31, %v2818_v59  ;;  %v7731_v22 = vpop.f32.mrf.mxu2  ;;  %v7748_v31 = vpop.f32.mrf.mxu3 }
 0x4dd   : > { %v3174_v4 = vmul.f32 %v7481_v15, %v2823_v48  ;;  %v3175_v13 = vmul.f32 %v7483_v45, %v2823_v48  ;;  %v5600_v15 = vld [vmem:[%s9094_s13 + $0x38] sm:$0xff]  ;;  %v2403_v52 = vmax.f32 %v7731_v22, %v7727_v23 }
 0x4de   : > { %v2556_v35 = vmul.f32 1.442695, %v2458_v9  ;;  %v2558_v29 = vmul.f32 1.442695, %v2459_v24  ;;  %v7725_v28 = vpop.eup %5831  ;;  %3530 = vmatpush.bf16.msra.mxu2 %v5600_v15  ;;  %v5595_v15 = vld [vmem:[%s9094_s13 + $0x10] sm:$0xff] }
 0x4df   : > { %v3230_v62 = vpack.c.bf16 %v3174_v4, %v3172_v19  ;;  %v3231_v43 = vpack.c.bf16 %v3175_v13, %v3173_v36  ;;  %v7729_v6 = vpop.eup %5833 }
 0x4e0   : > { %5835 = vpow2.f32 %v2556_v35  ;;  %v2664_v25 = vadd.f32 %v7729_v6, %v7725_v28  ;;  %v5599_v35 = vld [vmem:[%s9094_s13 + $0x30] sm:$0xff] }
 0x4e1   : > { %5837 = vpow2.f32 %v2558_v29  ;;  %3295 = vmatmul.bf16.gmra.mxu0 %v3230_v62  ;;  %3384 = vmatmul.bf16.gmra.mxu1 %v3231_v43  ;;  %v5598_v29 = vld [vmem:[%s9094_s13 + $0x28] sm:$0xff]  ;;  %v5597_v62 = vld [vmem:[%s9094_s13 + $0x20] sm:$0xff] }
 0x4e2   : > { %2665 = vadd.xlane.f32.xlu1 %v2664_v25  ;;  %2401 = vmax.xlane.f32.xlu0 %v2400_v21  ;;  %v5596_v25 = vld [vmem:[%s9094_s13 + $0x18] sm:$0xff] }
 0x4e3   : > { %v2384_v45 = vpop.xlane.xlu0 %2383  ;;  %3531 = vmatpush.bf16.msra.mxu2 %v5599_v35 }
 0x4e4   : > { %v2460_v11 = vsub.f32 %v7509_v44, %v2384_v45  ;;  %v2461_v55 = vsub.f32 %v7507_v53, %v2384_v45  ;;  %v7752_v44 = vpop.f32.mrf.mxu2  ;;  %v7762_v24 = vpop.f32.mrf.mxu3 }
 0x4e5   : > { %v2406_v9 = vmax.f32 %v7752_v44, %v7748_v31 }
 0x4e6   : > { %v7742_v18 = vpop.eup %5835  ;;  %v2560_v17 = vmul.f32 1.442695, %v2460_v11  ;;  %v2562_v3 = vmul.f32 1.442695, %v2461_v55  ;;  %v5594_v55 = vld [vmem:[%s9094_s13 + $0x8] sm:$0xff] }
 0x4e7   : > { %v7744_v63 = vpop.eup %5837  ;;  %3532 = vmatpush.bf16.msra.mxu2 %v5598_v29 }
 0x4e8   : > { %5839 = vpow2.f32 %v2560_v17  ;;  %v2667_v49 = vadd.f32 %v7744_v63, %v7742_v18 }
 0x4e9   : > { %5841 = vpow2.f32 %v2562_v3 }
 0x4ea   : > { %2668 = vadd.xlane.f32.xlu2 %v2667_v49  ;;  %2404 = vmax.xlane.f32.xlu1 %v2403_v52  ;;  %5843 = vrcp.f32 %v7689_v46  ;;  %v5593_v49 = vld [vmem:[%s9094_s13] sm:$0xff] }
 0x4eb   : > { %3533 = vmatpush.bf16.msra.mxu2 %v5597_v62 }
 0x4ec   : > { %v7764_v48 = vpop.f32.mrf.mxu2  ;;  %v7768_v4 = vpop.f32.mrf.mxu3 }
 0x4ed   : > { %v2409_v19 = vmax.f32 %v7764_v48, %v7762_v24 }
 0x4ee   : > { %v7754_v53 = vpop.eup %5839 }
 0x4ef   : > { %v7756_v1 = vpop.eup %5841  ;;  %3534 = vmatpush.bf16.msra.mxu2 %v5596_v25 }
 0x4f0   : > { %9281 = vst [vmem:[#allocation34_spill] sm:$0xff] %v7756_v1  ;;  %v2670_v59 = vadd.f32 %v7756_v1, %v7754_v53  ;;  %v5844_v43 = vpop.eup %5843 }
 0x4f1   : > { %v2825_v21 = vmul.f32 %v5844_v43, %v7689_v46  ;;  %vm2830_vm2 = vweird.f32 %v5844_v43 }
 0x4f2   : > { %2671 = vadd.xlane.f32.xlu2 %v2670_v59  ;;  %2407 = vmax.xlane.f32.xlu1 %v2406_v9  ;;  %v2835_v9 = vand.u32 2147483648, %v7689_v46  ;;  %vm2831_vm4 = vmor %vm2829_vm3, %vm2830_vm2 }
 0x4f3   : > { %v2826_v45 = vsub.f32 1.0, %v2825_v21  ;;  %3535 = vmatpush.bf16.msra.mxu2 %v5595_v15 }
 0x4f4   : > { %v7770_v36 = vpop.f32.mrf.mxu2  ;;  %v2836_v15 = vor.u32 1.1754944e-38, %v2835_v9 }
 0x4f5   : > { %v2412_v13 = vmax.f32 %v7770_v36, %v7768_v4  ;;  %v2827_v17 = vmul.f32 %v5844_v43, %v2826_v45 }
 0x4f7   : > { %3536 = vmatpush.bf16.msra.mxu2 %v5594_v55  ;;  %v2828_v52 = vadd.f32 %v5844_v43, %v2827_v17 }
 0x4f9   : > { %v2832_v21 = vsel %vm2831_vm4, %v5844_v43, %v2828_v52 }
 0x4fa   : > { %2410 = vmax.xlane.f32.xlu2 %v2409_v19 }
 0x4fb   : > { %3537 = vmatpush.bf16.msra.mxu2 %v5593_v49 }
 0x502   : > { %2413 = vmax.xlane.f32.xlu2 %v2412_v13  ;;  %v2833_v13 = vand.u32 2147483647, %v7689_v46 }
 0x504   : > { %vm2834_vm6 = vcmp.eq.f32.partialorder %v2833_v13, 8.507059e+37 }
 0x505   : > { %v2837_v17 = vsel %vm2834_vm6, %v2836_v15, %v2832_v21 }
 0x51d   : > { %v2645_v11 = vpop.xlane.xlu1 %2644 }
 0x51e   : > { %5845 = vrcp.f32 %v2645_v11  ;;  %v2849_v29 = vand.u32 2147483648, %v2645_v11  ;;  %v2847_v25 = vand.u32 2147483647, %v2645_v11  ;;  %vm2843_vm7 = vweird.f32 %v2645_v11 }
 0x520   : > { %v2850_v55 = vor.u32 1.1754944e-38, %v2849_v29  ;;  %vm2848_vm9 = vcmp.eq.f32.partialorder %v2847_v25, 8.507059e+37 }
 0x524   : > { %v5846_v3 = vpop.eup %5845 }
 0x525   : > { %v2839_v59 = vmul.f32 %v5846_v3, %v2645_v11  ;;  %v7798_v19 = vpop.xlane.xlu1 %2647  ;;  %vm2844_vm5 = vweird.f32 %v5846_v3  ;;  %v3176_v11 = vmul.f32 %v7493_v12, %v2837_v17 }
 0x526   : > { %5847 = vrcp.f32 %v7798_v19  ;;  %vm2845_vm8 = vmor %vm2843_vm7, %vm2844_vm5  ;;  %vm2857_vm11 = vweird.f32 %v7798_v19 }
 0x527   : > { %v2840_v35 = vsub.f32 1.0, %v2839_v59 }
 0x529   : > { %v2841_v62 = vmul.f32 %v5846_v3, %v2840_v35 }
 0x52b   : > { %v2842_v45 = vadd.f32 %v5846_v3, %v2841_v62 }
 0x52c   : > { %v7803_v49 = vpop.eup %5847 }
 0x52d   : > { %v2846_v37 = vsel %vm2845_vm8, %v5846_v3, %v2842_v45  ;;  %v2853_v57 = vmul.f32 %v7803_v49, %v7798_v19  ;;  %v7807_v35 = vpop.xlane.xlu2 %2650  ;;  %v2387_v1 = vpop.xlane.xlu1 %2386  ;;  %v3177_v3 = vmul.f32 %v7495_v5, %v2837_v17  ;;  %vm2858_vm10 = vweird.f32 %v7803_v49 }
 0x52e   : > { %v3281_v46 = vpop.f32.mrf.mxu0  ;;  %v3370_v59 = vpop.f32.mrf.mxu1  ;;  %v2851_v43 = vsel %vm2848_vm9, %v2850_v55, %v2846_v37  ;;  %5849 = vrcp.f32 %v7807_v35  ;;  %v2462_v9 = vsub.f32 %v7519_v39, %v2387_v1  ;;  %v2463_v13 = vsub.f32 %v7515_v60, %v2387_v1  ;;  %vm7834_vm12 = vmor %vm2857_vm11, %vm2858_vm10 }
 0x52f   : > { %v2854_v52 = vsub.f32 1.0, %v2853_v57  ;;  %v3178_v29 = vmul.f32 %v7530_v0, %v2851_v43  ;;  %v3179_v62 = vmul.f32 %v7532_v14, %v2851_v43  ;;  %v3371_v0 = vadd.f32 %v3370_v59, %v3281_v46 }
 0x530   : > { %v2564_v25 = vmul.f32 1.442695, %v2462_v9  ;;  %v2566_v21 = vmul.f32 1.442695, %v2463_v13  ;;  %v2863_v46 = vand.u32 2147483648, %v7798_v19  ;;  %vm2871_vm15 = vweird.f32 %v7807_v35 }
 0x531   : > { %v3232_v15 = vpack.c.bf16 %v3178_v29, %v3176_v11  ;;  %v2855_v37 = vmul.f32 %v7803_v49, %v2854_v52  ;;  %v3233_v45 = vpack.c.bf16 %v3179_v62, %v3177_v3  ;;  %v2861_v9 = vand.u32 2147483647, %v7798_v19 }
 0x532   : > { %5851 = vpow2.f32 %v2564_v25 }
 0x533   : > { %3300 = vmatmul.bf16.gmra.mxu0 %v3232_v15  ;;  %5853 = vpow2.f32 %v2566_v21  ;;  %3389 = vmatmul.bf16.gmra.mxu1 %v3233_v45  ;;  %v2856_v55 = vadd.f32 %v7803_v49, %v2855_v37  ;;  %v2864_v37 = vor.u32 1.1754944e-38, %v2863_v46  ;;  %v2875_v45 = vand.u32 2147483647, %v7807_v35 }
 0x534   : > { %v5850_v12 = vpop.eup %5849  ;;  %vm2862_vm14 = vcmp.eq.f32.partialorder %v2861_v9, 8.507059e+37 }
 0x535   : > { %v2867_v60 = vmul.f32 %v5850_v12, %v7807_v35  ;;  %v7818_v1 = vpop.xlane.xlu2 %2653  ;;  %v2390_v5 = vpop.xlane.xlu1 %2389  ;;  %vm2872_vm13 = vweird.f32 %v5850_v12  ;;  %v2860_v21 = vsel %vm7834_vm12, %v7803_v49, %v2856_v55  ;;  %vm2876_vm2 = vcmp.eq.f32.partialorder %v2875_v45, 8.507059e+37 }
 0x536   : > { %v3283_v57 = vpop.f32.mrf.mxu0  ;;  %v3372_v39 = vpop.f32.mrf.mxu1  ;;  %5855 = vrcp.f32 %v7818_v1  ;;  %v2464_v43 = vsub.f32 %v7549_v33, %v2390_v5  ;;  %v2465_v11 = vsub.f32 %v7542_v61, %v2390_v5  ;;  %v2877_v61 = vand.u32 2147483648, %v7807_v35  ;;  %vm2873_vm1 = vmor %vm2871_vm15, %vm2872_vm13 }
 0x537   : > { %v3373_v14 = vadd.f32 %v3372_v39, %v3283_v57  ;;  %v2868_v17 = vsub.f32 1.0, %v2867_v60  ;;  %v2865_v55 = vsel %vm2862_vm14, %v2864_v37, %v2860_v21  ;;  %vm2885_vm4 = vweird.f32 %v7818_v1 }
 0x538   : > { %v7827_v59 = vpop.eup %5851  ;;  %v2568_v29 = vmul.f32 1.442695, %v2464_v43  ;;  %v2570_v3 = vmul.f32 1.442695, %v2465_v11 }
 0x539   : > { %v3450_v52 = vpack.c.bf16 %v3373_v14, %v3371_v0  ;;  %v2869_v13 = vmul.f32 %v5850_v12, %v2868_v17  ;;  %v7830_v62 = vpop.eup %5853  ;;  %v2878_v17 = vor.u32 1.1754944e-38, %v2877_v61 }
 0x53a   : > { %5857 = vpow2.f32 %v2568_v29  ;;  %v2673_v19 = vadd.f32 %v7830_v62, %v7827_v59  ;;  %v3180_v29 = vmul.f32 %v7553_v42, %v2865_v55 }
 0x53b   : > { %3538 = vmatmul.bf16.vlgmr.msra.gmra.mxu2 %v3450_v52  ;;  %v2870_v25 = vadd.f32 %v5850_v12, %v2869_v13  ;;  %5859 = vpow2.f32 %v2570_v3 }
 0x53c   : > { %v7844_v15 = vpop.eup %5855  ;;  %2674 = vadd.xlane.f32.xlu0 %v2673_v19 }
 0x53d   : > { %v7847_v57 = vpop.xlane.xlu0 %2656  ;;  %v2881_v39 = vmul.f32 %v7844_v15, %v7818_v1  ;;  %v2393_v60 = vpop.xlane.xlu2 %2392  ;;  %v2874_v11 = vsel %vm2873_vm1, %v5850_v12, %v2870_v25  ;;  %vm2886_vm3 = vweird.f32 %v7844_v15 }
 0x53e   : > { %5861 = vrcp.f32 %v7847_v57  ;;  %v3286_v0 = vpop.f32.mrf.mxu0  ;;  %v2466_v49 = vsub.f32 %v7580_v7, %v2393_v60  ;;  %v2467_v5 = vsub.f32 %v7569_v32, %v2393_v60  ;;  %v3375_v14 = vpop.f32.mrf.mxu1  ;;  %v2879_v13 = vsel %vm2876_vm2, %v2878_v17, %v2874_v11  ;;  %vm7888_vm5 = vmor %vm2885_vm4, %vm2886_vm3 }
 0x53f   : > { %v2882_v43 = vsub.f32 1.0, %v2881_v39  ;;  %v3182_v32 = vmul.f32 %v7578_v20, %v2879_v13  ;;  %v3181_v7 = vmul.f32 %v7556_v51, %v2865_v55  ;;  %v3183_v33 = vmul.f32 %v7586_v38, %v2879_v13 }
 0x540   : > { %v2572_v35 = vmul.f32 1.442695, %v2466_v49  ;;  %v2574_v52 = vmul.f32 1.442695, %v2467_v5  ;;  %v7856_v46 = vpop.eup %5857  ;;  %v2891_v51 = vand.u32 2147483648, %v7818_v1  ;;  %v2905_v55 = vand.u32 2147483648, %v7847_v57 }
 0x541   : > { %v2883_v9 = vmul.f32 %v7844_v15, %v2882_v43  ;;  %v7860_v3 = vpop.eup %5859  ;;  %v3234_v19 = vpack.c.bf16 %v3182_v32, %v3180_v29  ;;  %v3235_v42 = vpack.c.bf16 %v3183_v33, %v3181_v7  ;;  %v2889_v5 = vand.u32 2147483647, %v7818_v1  ;;  %v7900_v32 = vpop.f32.mrf.mxu2 }
 0x542   : > { %5863 = vpow2.f32 %v2572_v35  ;;  %v2676_v61 = vadd.f32 %v7860_v3, %v7856_v46  ;;  %v3376_v17 = vadd.f32 %v3375_v14, %v3286_v0  ;;  %v7884_v35 = vpop.f32.mrf.mxu3  ;;  %v2892_v0 = vor.u32 1.1754944e-38, %v2891_v51 }
 0x543   : > { %5865 = vpow2.f32 %v2574_v52  ;;  %v2884_v37 = vadd.f32 %v7844_v15, %v2883_v9  ;;  %3305 = vmatmul.bf16.gmra.mxu0 %v3234_v19  ;;  %3394 = vmatmul.bf16.gmra.mxu1 %v3235_v42  ;;  %v2903_v14 = vand.u32 2147483647, %v7847_v57  ;;  %vm2899_vm7 = vweird.f32 %v7847_v57 }
 0x544   : > { %v7865_v12 = vpop.eup %5861  ;;  %2677 = vadd.xlane.f32.xlu0 %v2676_v61  ;;  %vm2890_vm8 = vcmp.eq.f32.partialorder %v2889_v5, 8.507059e+37  ;;  %v2906_v19 = vor.u32 1.1754944e-38, %v2905_v55 }
 0x545   : > { %v2895_v25 = vmul.f32 %v7865_v12, %v7847_v57  ;;  %v7871_v21 = vpop.xlane.xlu0 %2659  ;;  %v2396_v20 = vpop.xlane.xlu2 %2395  ;;  %vm2900_vm6 = vweird.f32 %v7865_v12  ;;  %v2888_v29 = vsel %vm7888_vm5, %v7844_v15, %v2884_v37  ;;  %v2415_v15 = vmax.f32 %v7900_v32, %v7884_v35 }
 0x546   : > { %5867 = vrcp.f32 %v7871_v21  ;;  %v3288_v38 = vpop.f32.mrf.mxu0  ;;  %v2468_v39 = vsub.f32 %v7621_v47, %v2396_v20  ;;  %v2469_v60 = vsub.f32 %v7616_v34, %v2396_v20  ;;  %v3377_v49 = vpop.f32.mrf.mxu1  ;;  %vm7910_vm9 = vmor %vm2899_vm7, %vm2900_vm6  ;;  %v2893_v51 = vsel %vm2890_vm8, %v2892_v0, %v2888_v29 }
 0x547   : > { %v2896_v45 = vsub.f32 1.0, %v2895_v25  ;;  %v3378_v43 = vadd.f32 %v3377_v49, %v3288_v38  ;;  %vm2904_vm10 = vcmp.eq.f32.partialorder %v2903_v14, 8.507059e+37  ;;  %v3184_v55 = vmul.f32 %v7612_v30, %v2893_v51 }
 0x548   : > { %v7882_v11 = vpop.eup %5863  ;;  %v2576_v34 = vmul.f32 1.442695, %v2468_v39  ;;  %v2578_v1 = vmul.f32 1.442695, %v2469_v60  ;;  %vm2913_vm12 = vweird.f32 %v7871_v21 }
 0x549   : > { %v2897_v47 = vmul.f32 %v7865_v12, %v2896_v45  ;;  %v7894_v9 = vpop.eup %5865  ;;  %v3451_v13 = vpack.c.bf16 %v3378_v43, %v3376_v17 }
 0x54a   : > { %5869 = vpow2.f32 %v2576_v34  ;;  %v2679_v33 = vadd.f32 %v7894_v9, %v7882_v11 }
 0x54b   : > { %v2898_v7 = vadd.f32 %v7865_v12, %v2897_v47  ;;  %5871 = vpow2.f32 %v2578_v1  ;;  %3543 = vmatmul.bf16.gmra.mxu2 %v3451_v13  ;;  %v3185_v47 = vmul.f32 %v7614_v26, %v2893_v51 }
 0x54c   : > { %v7906_v61 = vpop.eup %5867  ;;  %2680 = vadd.xlane.f32.xlu1 %v2679_v33  ;;  %2416 = vmax.xlane.f32.xlu0 %v2415_v15 }
 0x54d   : > { %v2909_v57 = vmul.f32 %v7906_v61, %v7871_v21  ;;  %v7918_v42 = vpop.xlane.xlu1 %2662  ;;  %v2399_v37 = vpop.xlane.xlu0 %2398  ;;  %v2902_v20 = vsel %vm7910_vm9, %v7865_v12, %v2898_v7  ;;  %vm2914_vm11 = vweird.f32 %v7906_v61 }
 0x54e   : > { %5873 = vrcp.f32 %v7918_v42  ;;  %v3291_v38 = vpop.f32.mrf.mxu0  ;;  %v2470_v39 = vsub.f32 %v7669_v41, %v2399_v37  ;;  %v2471_v60 = vsub.f32 %v7654_v27, %v2399_v37  ;;  %v3380_v49 = vpop.f32.mrf.mxu1  ;;  %v2907_v5 = vsel %vm2904_vm10, %v2906_v19, %v2902_v20  ;;  %vm7954_vm13 = vmor %vm2913_vm12, %vm2914_vm11 }
 0x54f   : > { %v2910_v45 = vsub.f32 1.0, %v2909_v57  ;;  %v3186_v17 = vmul.f32 %v7637_v16, %v2907_v5  ;;  %v3187_v34 = vmul.f32 %v7643_v8, %v2907_v5  ;;  %v2919_v19 = vand.u32 2147483648, %v7871_v21 }
 0x550   : > { %v7928_v43 = vpop.eup %5869  ;;  %v2580_v52 = vmul.f32 1.442695, %v2470_v39  ;;  %v2582_v12 = vmul.f32 1.442695, %v2471_v60  ;;  %v3381_v57 = vadd.f32 %v3380_v49, %v3291_v38  ;;  %v2917_v20 = vand.u32 2147483647, %v7871_v21 }
 0x551   : > { %v7932_v1 = vpop.eup %5871  ;;  %v2911_v41 = vmul.f32 %v7906_v61, %v2910_v45  ;;  %v3236_v27 = vpack.c.bf16 %v3186_v17, %v3184_v55  ;;  %v3237_v0 = vpack.c.bf16 %v3187_v34, %v3185_v47  ;;  %vm2927_vm1 = vweird.f32 %v7918_v42 }
 0x552   : > { %5875 = vpow2.f32 %v2580_v52  ;;  %v2682_v30 = vadd.f32 %v7932_v1, %v7928_v43  ;;  %v2920_v52 = vor.u32 1.1754944e-38, %v2919_v19  ;;  %vm2918_vm15 = vcmp.eq.f32.partialorder %v2917_v20, 8.507059e+37 }
 0x553   : > { %5877 = vpow2.f32 %v2582_v12  ;;  %v2912_v29 = vadd.f32 %v7906_v61, %v2911_v41  ;;  %3310 = vmatmul.bf16.gmra.mxu0 %v3236_v27  ;;  %3399 = vmatmul.bf16.gmra.mxu1 %v3237_v0  ;;  %v2931_v12 = vand.u32 2147483647, %v7918_v42 }
 0x554   : > { %v5874_v14 = vpop.eup %5873  ;;  %2683 = vadd.xlane.f32.xlu1 %v2682_v30 }
 0x555   : > { %v2923_v16 = vmul.f32 %v5874_v14, %v7918_v42  ;;  %v7938_v13 = vpop.xlane.xlu1 %2665  ;;  %v2402_v26 = vpop.xlane.xlu0 %2401  ;;  %vm2928_vm14 = vweird.f32 %v5874_v14  ;;  %v2916_v55 = vsel %vm7954_vm13, %v7906_v61, %v2912_v29  ;;  %vm2932_vm3 = vcmp.eq.f32.partialorder %v2931_v12, 8.507059e+37 }
 0x556   : > { %5879 = vrcp.f32 %v7938_v13  ;;  %v3293_v8 = vpop.f32.mrf.mxu0  ;;  %v2472_v33 = vsub.f32 %v7706_v58, %v2402_v26  ;;  %v2473_v25 = vsub.f32 %v7693_v40, %v2402_v26  ;;  %v3382_v15 = vpop.f32.mrf.mxu1  ;;  %v2933_v58 = vand.u32 2147483648, %v7918_v42  ;;  %vm2929_vm2 = vmor %vm2927_vm1, %vm2928_vm14 }
 0x557   : > { %v2924_v7 = vsub.f32 1.0, %v2923_v16  ;;  %v3383_v37 = vadd.f32 %v3382_v15, %v3293_v8  ;;  %v2921_v30 = vsel %vm2918_vm15, %v2920_v52, %v2916_v55  ;;  %vm2941_vm6 = vweird.f32 %v7938_v13 }
 0x558   : > { %v7947_v51 = vpop.eup %5875  ;;  %v2584_v39 = vmul.f32 1.442695, %v2472_v33  ;;  %v2586_v60 = vmul.f32 1.442695, %v2473_v25  ;;  %v2934_v16 = vor.u32 1.1754944e-38, %v2933_v58  ;;  %v3188_v15 = vmul.f32 %v7677_v2, %v2921_v30 }
 0x559   : > { %v2925_v45 = vmul.f32 %v5874_v14, %v2924_v7  ;;  %v7950_v5 = vpop.eup %5877  ;;  %v3452_v38 = vpack.c.bf16 %v3383_v37, %v3381_v57 }
 0x55a   : > { %5881 = vpow2.f32 %v2584_v39  ;;  %v2685_v21 = vadd.f32 %v7950_v5, %v7947_v51 }
 0x55b   : > { %v2926_v49 = vadd.f32 %v5874_v14, %v2925_v45  ;;  %5883 = vpow2.f32 %v2586_v60  ;;  %3548 = vmatmul.bf16.gmra.mxu2 %v3452_v38 }
 0x55c   : > { %v7964_v17 = vpop.eup %5879  ;;  %2686 = vadd.xlane.f32.xlu2 %v2685_v21 }
 0x55d   : > { %v7967_v47 = vpop.xlane.xlu2 %2668  ;;  %v2937_v34 = vmul.f32 %v7964_v17, %v7938_v13  ;;  %v2405_v41 = vpop.xlane.xlu1 %2404  ;;  %v2930_v29 = vsel %vm2929_vm2, %v5874_v14, %v2926_v49  ;;  %vm2942_vm4 = vweird.f32 %v7964_v17 }
 0x55e   : > { %5885 = vrcp.f32 %v7967_v47  ;;  %v2474_v61 = vsub.f32 %v7731_v22, %v2405_v41  ;;  %v2475_v27 = vsub.f32 %v7727_v23, %v2405_v41  ;;  %v3296_v0 = vpop.f32.mrf.mxu0  ;;  %v3385_v8 = vpop.f32.mrf.mxu1  ;;  %v2935_v25 = vsel %vm2932_vm3, %v2934_v16, %v2930_v29  ;;  %vm8006_vm8 = vmor %vm2941_vm6, %vm2942_vm4 }
 0x55f   : > { %v2938_v26 = vsub.f32 1.0, %v2937_v34  ;;  %v3190_v22 = vmul.f32 %v7704_v10, %v2935_v25  ;;  %v3189_v23 = vmul.f32 %v7680_v54, %v2921_v30  ;;  %v3191_v57 = vmul.f32 %v7711_v50, %v2935_v25 }
 0x560   : > { %v2588_v42 = vmul.f32 1.442695, %v2474_v61  ;;  %v2590_v7 = vmul.f32 1.442695, %v2475_v27  ;;  %v7976_v33 = vpop.eup %5881  ;;  %v2947_v10 = vand.u32 2147483648, %v7938_v13  ;;  %v2961_v55 = vand.u32 2147483648, %v7967_v47 }
 0x561   : > { %v7979_v19 = vpop.eup %5883  ;;  %v2939_v14 = vmul.f32 %v7964_v17, %v2938_v26  ;;  %v3238_v39 = vpack.c.bf16 %v3190_v22, %v3188_v15  ;;  %v3239_v2 = vpack.c.bf16 %v3191_v57, %v3189_v23  ;;  %v2959_v40 = vand.u32 2147483647, %v7967_v47 }
 0x562   : > { %5887 = vpow2.f32 %v2588_v42  ;;  %v2688_v20 = vadd.f32 %v7979_v19, %v7976_v33  ;;  %v3386_v52 = vadd.f32 %v3385_v8, %v3296_v0  ;;  %vm2955_vm7 = vweird.f32 %v7967_v47 }
 0x563   : > { %5889 = vpow2.f32 %v2590_v7  ;;  %v2940_v21 = vadd.f32 %v7964_v17, %v2939_v14  ;;  %3315 = vmatmul.bf16.gmra.mxu0 %v3238_v39  ;;  %3404 = vmatmul.bf16.gmra.mxu1 %v3239_v2  ;;  %v2962_v29 = vor.u32 1.1754944e-38, %v2961_v55  ;;  %vm2960_vm10 = vcmp.eq.f32.partialorder %v2959_v40, 8.507059e+37 }
 0x564   : > { %v5886_v37 = vpop.eup %5885  ;;  %2689 = vadd.xlane.f32.xlu0 %v2688_v20 }
 0x565   : > { %v2951_v45 = vmul.f32 %v5886_v37, %v7967_v47  ;;  %v7988_v60 = vpop.xlane.xlu2 %2671  ;;  %v2408_v54 = vpop.xlane.xlu1 %2407  ;;  %vm2956_vm5 = vweird.f32 %v5886_v37  ;;  %v2948_v47 = vor.u32 1.1754944e-38, %v2947_v10 }
 0x566   : > { %v2476_v58 = vsub.f32 %v7752_v44, %v2408_v54  ;;  %v2477_v38 = vsub.f32 %v7748_v31, %v2408_v54  ;;  %v3298_v49 = vpop.f32.mrf.mxu0  ;;  %v3387_v12 = vpop.f32.mrf.mxu1  ;;  %v2945_v31 = vand.u32 2147483647, %v7938_v13  ;;  %vm2957_vm9 = vmor %vm2955_vm7, %vm2956_vm5  ;;  %v2944_v13 = vsel %vm8006_vm8, %v7964_v17, %v2940_v21 }
 0x567   : > { %v2952_v50 = vsub.f32 1.0, %v2951_v45  ;;  %v3388_v30 = vadd.f32 %v3387_v12, %v3298_v49  ;;  %v8038_v49 = vpop.f32.mrf.mxu2  ;;  %vm2969_vm13 = vweird.f32 %v7988_v60 }
 0x568   : > { %v7997_v34 = vpop.eup %5887  ;;  %v2592_v61 = vmul.f32 1.442695, %v2476_v58  ;;  %v2594_v27 = vmul.f32 1.442695, %v2477_v38  ;;  %vm2946_vm11 = vcmp.eq.f32.partialorder %v2945_v31, 8.507059e+37  ;;  %v8036_v38 = vpop.f32.mrf.mxu3 }
 0x569   : > { %v2953_v41 = vmul.f32 %v5886_v37, %v2952_v50  ;;  %v7999_v16 = vpop.eup %5889  ;;  %v3453_v26 = vpack.c.bf16 %v3388_v30, %v3386_v52  ;;  %v2949_v23 = vsel %vm2946_vm11, %v2948_v47, %v2944_v13  ;;  %v2418_v55 = vmax.f32 %v8038_v49, %v8036_v38 }
 0x56a   : > { %5891 = vpow2.f32 %v2592_v61  ;;  %v2691_v8 = vadd.f32 %v7999_v16, %v7997_v34  ;;  %v3193_v2 = vmul.f32 %v7729_v6, %v2949_v23  ;;  %v5953_v30 = vmov 0.0  }
 0x56b   : > { %v2954_v0 = vadd.f32 %v5886_v37, %v2953_v41  ;;  %5893 = vpow2.f32 %v2594_v27  ;;  %3553 = vmatmul.bf16.gmra.mxu2 %v3453_v26  ;;  %3653 = vst [vmem:[#allocation2 + $0x10] sm:$0xff] %v5953_v30 }
 0x56c   : > { %2692 = vadd.xlane.f32.xlu1 %v2691_v8  ;;  %3654 = vst [vmem:[#allocation2 + $0x18] sm:$0xff] %v5953_v30 }
 0x56d   : > { %v2411_v42 = vpop.xlane.xlu2 %2410  ;;  %v2958_v7 = vsel %vm2957_vm9, %v5886_v37, %v2954_v0  ;;  %v3192_v37 = vmul.f32 %v7725_v28, %v2949_v23  ;;  %3651 = vst [vmem:[#allocation2] sm:$0xff] %v5953_v30 }
 0x56e   : > { %v2478_v25 = vsub.f32 %v7764_v48, %v2411_v42  ;;  %v2479_v15 = vsub.f32 %v7762_v24, %v2411_v42  ;;  %v2963_v22 = vsel %vm2960_vm10, %v2962_v29, %v2958_v7  ;;  %3652 = vst [vmem:[#allocation2 + $0x8] sm:$0xff] %v5953_v30 }
 0x56f   : > { %v3194_v20 = vmul.f32 %v7742_v18, %v2963_v22  ;;  %v3195_v45 = vmul.f32 %v7744_v63, %v2963_v22  ;;  %v8050_v12 = vpop.f32.mrf.mxu2  ;;  %3655 = vst [vmem:[#allocation2 + $0x20] sm:$0xff] %v5953_v30 }
 0x570   : > { %v2596_v57 = vmul.f32 1.442695, %v2478_v25  ;;  %v2598_v14 = vmul.f32 1.442695, %v2479_v15  ;;  %v8020_v17 = vpop.eup %5891  ;;  %v8048_v52 = vpop.f32.mrf.mxu3  ;;  %3656 = vst [vmem:[#allocation2 + $0x28] sm:$0xff] %v5953_v30 }
 0x571   : > { %v8022_v39 = vpop.eup %5893  ;;  %v3240_v48 = vpack.c.bf16 %v3194_v20, %v3192_v37  ;;  %v3241_v10 = vpack.c.bf16 %v3195_v45, %v3193_v2  ;;  %v2421_v41 = vmax.f32 %v8050_v12, %v8048_v52  ;;  %3657 = vst [vmem:[#allocation2 + $0x30] sm:$0xff] %v5953_v30 }
 0x572   : > { %5895 = vpow2.f32 %v2596_v57  ;;  %v2694_v24 = vadd.f32 %v8022_v39, %v8020_v17  ;;  %3658 = vst [vmem:[#allocation2 + $0x38] sm:$0xff] %v5953_v30  ;;  %v2975_v57 = vand.u32 2147483648, %v7988_v60 }
 0x573   : > { %5897 = vpow2.f32 %v2598_v14  ;;  %3320 = vmatmul.bf16.gmra.mxu0 %v3240_v48  ;;  %3409 = vmatmul.bf16.gmra.mxu1 %v3241_v10  ;;  %3659 = vst [vmem:[#allocation2 + $0x40] sm:$0xff] %v5953_v30  ;;  %v2973_v14 = vand.u32 2147483647, %v7988_v60 }
 0x574   : > { %2695 = vadd.xlane.f32.xlu2 %v2694_v24  ;;  %3660 = vst [vmem:[#allocation2 + $0x48] sm:$0xff] %v5953_v30 }
 0x575   : > { %v2414_v54 = vpop.xlane.xlu2 %2413  ;;  %3661 = vst [vmem:[#allocation2 + $0x50] sm:$0xff] %v5953_v30  ;;  %vm2974_vm1 = vcmp.eq.f32.partialorder %v2973_v14, 8.507059e+37 }
 0x576   : > { %v2480_v18 = vsub.f32 %v7770_v36, %v2414_v54  ;;  %v2481_v63 = vsub.f32 %v7768_v4, %v2414_v54  ;;  %3662 = vst [vmem:[#allocation2 + $0x58] sm:$0xff] %v5953_v30 }
 0x577   : > { %3663 = vst [vmem:[#allocation2 + $0x60] sm:$0xff] %v5953_v30 }
 0x578   : > { %v8030_v50 = vpop.eup %5895  ;;  %v2600_v40 = vmul.f32 1.442695, %v2480_v18  ;;  %v2602_v28 = vmul.f32 1.442695, %v2481_v63  ;;  %3664 = vst [vmem:[#allocation2 + $0x68] sm:$0xff] %v5953_v30  ;;  %v2976_v18 = vor.u32 1.1754944e-38, %v2975_v57 }
 0x579   : > { %v8032_v58 = vpop.eup %5897  ;;  %3665 = vst [vmem:[#allocation2 + $0x70] sm:$0xff] %v5953_v30 }
 0x57a   : > { %5899 = vpow2.f32 %v2600_v40  ;;  %v2697_v6 = vadd.f32 %v8032_v58, %v8030_v50  ;;  %3666 = vst [vmem:[#allocation2 + $0x78] sm:$0xff] %v5953_v30 }
 0x57b   : > { %5901 = vpow2.f32 %v2602_v28  ;;  %3667 = vst [vmem:[#allocation2 + $0x80] sm:$0xff] %v5953_v30 }
 0x57c   : > { %2698 = vadd.xlane.f32.xlu0 %v2697_v6  ;;  %5903 = vrcp.f32 %v7988_v60  ;;  %3668 = vst [vmem:[#allocation2 + $0x88] sm:$0xff] %v5953_v30 }
 0x57d   : > { %3669 = vst [vmem:[#allocation2 + $0x90] sm:$0xff] %v5953_v30 }
 0x57e   : > { %3670 = vst [vmem:[#allocation2 + $0x98] sm:$0xff] %v5953_v30 }
 0x57f   : > { %3671 = vst [vmem:[#allocation2 + $0xa0] sm:$0xff] %v5953_v30 }
 0x580   : > { %v8040_v36 = vpop.eup %5899  ;;  %3672 = vst [vmem:[#allocation2 + $0xa8] sm:$0xff] %v5953_v30 }
 0x581   : > { %v8042_v4 = vpop.eup %5901  ;;  %3673 = vst [vmem:[#allocation2 + $0xb0] sm:$0xff] %v5953_v30 }
 0x582   : > { %v2700_v21 = vadd.f32 %v8042_v4, %v8040_v36  ;;  %v8055_v61 = vpop.eup %5903  ;;  %3674 = vst [vmem:[#allocation2 + $0xb8] sm:$0xff] %v5953_v30 }
 0x583   : > { %v2965_v27 = vmul.f32 %v8055_v61, %v7988_v60  ;;  %vm2970_vm12 = vweird.f32 %v8055_v61  ;;  %3675 = vst [vmem:[#allocation2 + $0xc0] sm:$0xff] %v5953_v30 }
 0x584   : > { %2701 = vadd.xlane.f32.xlu1 %v2700_v21  ;;  %2419 = vmax.xlane.f32.xlu0 %v2418_v55  ;;  %vm8089_vm14 = vmor %vm2969_vm13, %vm2970_vm12  ;;  %3676 = vst [vmem:[#allocation2 + $0xc8] sm:$0xff] %v5953_v30 }
 0x585   : > { %v2966_v26 = vsub.f32 1.0, %v2965_v27  ;;  %3677 = vst [vmem:[#allocation2 + $0xd0] sm:$0xff] %v5953_v30 }
 0x586   : > { %3678 = vst [vmem:[#allocation2 + $0xd8] sm:$0xff] %v5953_v30 }
 0x587   : > { %v2967_v8 = vmul.f32 %v8055_v61, %v2966_v26  ;;  %3679 = vst [vmem:[#allocation2 + $0xe0] sm:$0xff] %v5953_v30 }
 0x588   : > { %3680 = vst [vmem:[#allocation2 + $0xe8] sm:$0xff] %v5953_v30 }
 0x589   : > { %v2968_v25 = vadd.f32 %v8055_v61, %v2967_v8  ;;  %3681 = vst [vmem:[#allocation2 + $0xf0] sm:$0xff] %v5953_v30 }
 0x58a   : > { %3682 = vst [vmem:[#allocation2 + $0xf8] sm:$0xff] %v5953_v30 }
 0x58b   : > { %v2972_v10 = vsel %vm8089_vm14, %v8055_v61, %v2968_v25  ;;  %3683 = vst [vmem:[#allocation2 + $0x100] sm:$0xff] %v5953_v30 }
 0x58c   : > { %2422 = vmax.xlane.f32.xlu1 %v2421_v41  ;;  %v2977_v41 = vsel %vm2974_vm1, %v2976_v18, %v2972_v10  ;;  %3684 = vst [vmem:[#allocation2 + $0x108] sm:$0xff] %v5953_v30 }
 0x58d   : > { %3685 = vst [vmem:[#allocation2 + $0x110] sm:$0xff] %v5953_v30 }
 0x58e   : > { %3686 = vst [vmem:[#allocation2 + $0x118] sm:$0xff] %v5953_v30 }
 0x58f   : > { %3687 = vst [vmem:[#allocation2 + $0x120] sm:$0x3] %v5953_v30 }
 0x5af   : > { %v8061_v31 = vpop.xlane.xlu0 %2674 }
 0x5b0   : > { %v3301_v44 = vpop.f32.mrf.mxu0  ;;  %5905 = vrcp.f32 %v8061_v31  ;;  %v3390_v0 = vpop.f32.mrf.mxu1  ;;  %v2989_v60 = vand.u32 2147483648, %v8061_v31  ;;  %v2987_v63 = vand.u32 2147483647, %v8061_v31  ;;  %vm2983_vm2 = vweird.f32 %v8061_v31 }
 0x5b1   : > { %v3391_v22 = vadd.f32 %v3390_v0, %v3301_v44 }
 0x5b2   : > { %v2990_v61 = vor.u32 1.1754944e-38, %v2989_v60  ;;  %vm2988_vm4 = vcmp.eq.f32.partialorder %v2987_v63, 8.507059e+37 }
 0x5b6   : > { %v5906_v29 = vpop.eup %5905 }
 0x5b7   : > { %v2979_v13 = vmul.f32 %v5906_v29, %v8061_v31  ;;  %v8074_v47 = vpop.xlane.xlu0 %2677  ;;  %vm2984_vm15 = vweird.f32 %v5906_v29 }
 0x5b8   : > { %v3303_v42 = vpop.f32.mrf.mxu0  ;;  %5907 = vrcp.f32 %v8074_v47  ;;  %v3392_v7 = vpop.f32.mrf.mxu1  ;;  %vm8114_vm3 = vmor %vm2983_vm2, %vm2984_vm15  ;;  %vm2997_vm6 = vweird.f32 %v8074_v47  ;;  %v3003_v2 = vand.u32 2147483648, %v8074_v47  ;;  %v3001_v60 = vand.u32 2147483647, %v8074_v47 }
 0x5b9   : > { %v2980_v15 = vsub.f32 1.0, %v2979_v13  ;;  %v3393_v23 = vadd.f32 %v3392_v7, %v3303_v42  ;;  %v9296_v42 = vld [vmem:[#allocation34_spill] sm:$0xff] }
 0x5ba   : > { %v3197_v7 = vmul.f32 %v9296_v42, %v2977_v41  ;;  %vm3002_vm11 = vcmp.eq.f32.partialorder %v3001_v60, 8.507059e+37 }
 0x5bb   : > { %v2981_v20 = vmul.f32 %v5906_v29, %v2980_v15  ;;  %v3454_v45 = vpack.c.bf16 %v3393_v23, %v3391_v22  ;;  %v9297_v22 = vld [vmem:[#allocation3_spill] sm:$0xff] }
 0x5bd   : > { %v2982_v48 = vadd.f32 %v5906_v29, %v2981_v20  ;;  %3558 = vmatmul.bf16.gmra.mxu2 %v3454_v45 }
 0x5be   : > { %v3539_v37 = vpop.f32.mrf.mxu2  ;;  %v8102_v54 = vpop.eup %5907 }
 0x5bf   : > { %v8094_v24 = vadd.f32 %v3539_v37, %v6341_v56  ;;  %v8105_v56 = vpop.xlane.xlu1 %2680  ;;  %v2993_v40 = vmul.f32 %v8102_v54, %v8074_v47  ;;  %v2417_v28 = vpop.xlane.xlu0 %2416  ;;  %v2986_v31 = vsel %vm8114_vm3, %v5906_v29, %v2982_v48  ;;  %vm2998_vm5 = vweird.f32 %v8102_v54 }
 0x5c0   : > { %5909 = vrcp.f32 %v8105_v56  ;;  %v2482_v21 = vsub.f32 %v7900_v32, %v2417_v28  ;;  %v2483_v55 = vsub.f32 %v7884_v35, %v2417_v28  ;;  %v3306_v26 = vpop.f32.mrf.mxu0  ;;  %v3395_v8 = vpop.f32.mrf.mxu1  ;;  %v2991_v35 = vsel %vm2988_vm4, %v2990_v61, %v2986_v31  ;;  %vm8158_vm8 = vmor %vm2997_vm6, %vm2998_vm5 }
 0x5c1   : > { %3688 = vst [vmem:[#allocation2 + $0x11] sm:$0xff] %v8094_v24  ;;  %v2994_v27 = vsub.f32 1.0, %v2993_v40  ;;  %v3196_v32 = vmul.f32 %v7754_v53, %v2977_v41  ;;  %v3198_v29 = vmul.f32 %v7827_v59, %v2991_v35  ;;  %v3199_v15 = vmul.f32 %v7830_v62, %v2991_v35 }
 0x5c2   : > { %v2604_v44 = vmul.f32 1.442695, %v2482_v21  ;;  %v2606_v0 = vmul.f32 1.442695, %v2483_v55  ;;  %v3017_v18 = vand.u32 2147483648, %v8105_v56  ;;  %v3396_v47 = vadd.f32 %v3395_v8, %v3306_v26 }
 0x5c3   : > { %v2995_v13 = vmul.f32 %v8102_v54, %v2994_v27  ;;  %v3242_v53 = vpack.c.bf16 %v3198_v29, %v3196_v32  ;;  %v3243_v20 = vpack.c.bf16 %v3199_v15, %v3197_v7  ;;  %v3015_v21 = vand.u32 2147483647, %v8105_v56 }
 0x5c4   : > { %5911 = vpow2.f32 %v2604_v44  ;;  %vm3011_vm9 = vweird.f32 %v8105_v56  ;;  %v3004_v44 = vor.u32 1.1754944e-38, %v3003_v2  ;;  %v3018_v8 = vor.u32 1.1754944e-38, %v3017_v18  ;;  %v9303_v18 = vld [vmem:[#allocation5_spill] sm:$0xff] }
 0x5c5   : > { %5913 = vpow2.f32 %v2606_v0  ;;  %v2996_v59 = vadd.f32 %v8102_v54, %v2995_v13  ;;  %3325 = vmatmul.bf16.gmra.mxu0 %v3242_v53  ;;  %3414 = vmatmul.bf16.gmra.mxu1 %v3243_v20  ;;  %vm3016_vm12 = vcmp.eq.f32.partialorder %v3015_v21, 8.507059e+37 }
 0x5c6   : > { %v3541_v25 = vpop.f32.mrf.mxu2  ;;  %v5910_v57 = vpop.eup %5909 }
 0x5c7   : > { %v8132_v23 = vadd.f32 %v3541_v25, %v9297_v22  ;;  %v3007_v14 = vmul.f32 %v5910_v57, %v8105_v56  ;;  %v8137_v45 = vpop.xlane.xlu1 %2683  ;;  %vm3012_vm7 = vweird.f32 %v5910_v57  ;;  %v3000_v27 = vsel %vm8158_vm8, %v8102_v54, %v2996_v59  ;;  %v9302_v25 = vld [vmem:[#allocation4_spill] sm:$0xff] }
 0x5c8   : > { %5915 = vrcp.f32 %v8137_v45  ;;  %v3308_v63 = vpop.f32.mrf.mxu0  ;;  %v3397_v40 = vpop.f32.mrf.mxu1  ;;  %vm8174_vm10 = vmor %vm3011_vm9, %vm3012_vm7  ;;  %v3005_v32 = vsel %vm3002_vm11, %v3004_v44, %v3000_v27  ;;  %vm3025_vm14 = vweird.f32 %v8137_v45  ;;  %v3029_v6 = vand.u32 2147483647, %v8137_v45 }
 0x5c9   : > { %v3008_v62 = vsub.f32 1.0, %v3007_v14  ;;  %v3997_v37 = vpack.c.bf16 %v8132_v23, %v8094_v24  ;;  %v3398_v55 = vadd.f32 %v3397_v40, %v3308_v63  ;;  %v3200_v53 = vmul.f32 %v7856_v46, %v3005_v32  ;;  %3689 = vst [vmem:[#allocation2 + $0x19] sm:$0xff] %v8132_v23 }
 0x5ca   : > { %v8149_v48 = vpop.eup %5911  ;;  %v3201_v20 = vmul.f32 %v7860_v3, %v3005_v32  ;;  %v3031_v40 = vand.u32 2147483648, %v8137_v45  ;;  %vm3030_vm3 = vcmp.eq.f32.partialorder %v3029_v6, 8.507059e+37 }
 0x5cb   : > { %v3009_v10 = vmul.f32 %v5910_v57, %v3008_v62  ;;  %v8154_v28 = vpop.eup %5913  ;;  %v3455_v56 = vpack.c.bf16 %v3398_v55, %v3396_v47 }
 0x5cc   : > { %v2703_v61 = vadd.f32 %v8154_v28, %v8149_v48 }
 0x5cd   : > { %v3010_v41 = vadd.f32 %v5910_v57, %v3009_v10  ;;  %3563 = vmatmul.bf16.gmra.mxu2 %v3455_v56 }
 0x5ce   : > { %v8171_v31 = vpop.eup %5915  ;;  %v3544_v26 = vpop.f32.mrf.mxu2  ;;  %2704 = vadd.xlane.f32.xlu2 %v2703_v61 }
 0x5cf   : > { %v3021_v13 = vmul.f32 %v8171_v31, %v8137_v45  ;;  %v8182_v54 = vpop.xlane.xlu2 %2686  ;;  %v3014_v35 = vsel %vm8174_vm10, %v5910_v57, %v3010_v41  ;;  %v8191_v29 = vadd.f32 %v3544_v26, %v9302_v25  ;;  %vm3026_vm13 = vweird.f32 %v8171_v31 }
 0x5d0   : > { %5917 = vrcp.f32 %v8182_v54  ;;  %v3019_v7 = vsel %vm3016_vm12, %v3018_v8, %v3014_v35  ;;  %v3311_v57 = vpop.f32.mrf.mxu0  ;;  %v3400_v14 = vpop.f32.mrf.mxu1  ;;  %v3045_v47 = vand.u32 2147483648, %v8182_v54  ;;  %vm8218_vm15 = vmor %vm3025_vm14, %vm3026_vm13  ;;  %v3043_v27 = vand.u32 2147483647, %v8182_v54 }
 0x5d1   : > { %v3022_v42 = vsub.f32 1.0, %v3021_v13  ;;  %v3202_v15 = vmul.f32 %v7882_v11, %v3019_v7  ;;  %v3203_v22 = vmul.f32 %v7894_v9, %v3019_v7  ;;  %3690 = vst [vmem:[#allocation2 + $0x21] sm:$0xff] %v8191_v29  ;;  %v3401_v44 = vadd.f32 %v3400_v14, %v3311_v57 }
 0x5d2   : > { %v3032_v8 = vor.u32 1.1754944e-38, %v3031_v40  ;;  %vm3039_vm2 = vweird.f32 %v8182_v54  ;;  %vm3044_vm5 = vcmp.eq.f32.partialorder %v3043_v27, 8.507059e+37 }
 0x5d3   : > { %v3023_v59 = vmul.f32 %v8171_v31, %v3022_v42  ;;  %v3244_v62 = vpack.c.bf16 %v3202_v15, %v3200_v53  ;;  %v3245_v2 = vpack.c.bf16 %v3203_v22, %v3201_v20  ;;  %v3046_v42 = vor.u32 1.1754944e-38, %v3045_v47 }
 0x5d5   : > { %v3024_v3 = vadd.f32 %v8171_v31, %v3023_v59  ;;  %3330 = vmatmul.bf16.gmra.mxu0 %v3244_v62  ;;  %3419 = vmatmul.bf16.gmra.mxu1 %v3245_v2 }
 0x5d6   : > { %v5918_v60 = vpop.eup %5917  ;;  %v3546_v11 = vpop.f32.mrf.mxu2 }
 0x5d7   : > { %v3035_v9 = vmul.f32 %v5918_v60, %v8182_v54  ;;  %v8203_v10 = vpop.xlane.xlu0 %2689  ;;  %v8206_v46 = vadd.f32 %v3546_v11, %v9303_v18  ;;  %vm3040_vm1 = vweird.f32 %v5918_v60  ;;  %v3028_v26 = vsel %vm8218_vm15, %v8171_v31, %v3024_v3  ;;  %v9306_v31 = vld [vmem:[#allocation6_spill] sm:$0xff] }
 0x5d8   : > { %5919 = vrcp.f32 %v8203_v10  ;;  %v3313_v55 = vpop.f32.mrf.mxu0  ;;  %v3402_v41 = vpop.f32.mrf.mxu1  ;;  %vm3041_vm4 = vmor %vm3039_vm2, %vm3040_vm1  ;;  %v3033_v15 = vsel %vm3030_vm3, %v3032_v8, %v3028_v26  ;;  %vm3053_vm7 = vweird.f32 %v8203_v10 }
 0x5d9   : > { %v3036_v30 = vsub.f32 1.0, %v3035_v9  ;;  %3691 = vst [vmem:[#allocation2 + $0x29] sm:$0xff] %v8206_v46  ;;  %v3998_v63 = vpack.c.bf16 %v8206_v46, %v8191_v29  ;;  %v3403_v0 = vadd.f32 %v3402_v41, %v3313_v55  ;;  %v3204_v62 = vmul.f32 %v7928_v43, %v3033_v15  ;;  %v3788_v29 = vld [vmem:[#allocation2 + $0x18] sm:$0xff]  ;;  %v3787_v46 = vld [vmem:[#allocation2 + $0x10] sm:$0xff] }
 0x5da   : > { %v3205_v2 = vmul.f32 %v7932_v1, %v3033_v15  ;;  %v3059_v1 = vand.u32 2147483648, %v8203_v10  ;;  %v3057_v55 = vand.u32 2147483647, %v8203_v10 }
 0x5db   : > { %v3037_v21 = vmul.f32 %v5918_v60, %v3036_v30  ;;  %v3456_v13 = vpack.c.bf16 %v3403_v0, %v3401_v44 }
 0x5dc   : > { %vm3058_vm11 = vcmp.eq.f32.partialorder %v3057_v55, 8.507059e+37  ;;  %v9311_v55 = vld [vmem:[#allocation9_spill] sm:$0xff] }
 0x5dd   : > { %v3038_v56 = vadd.f32 %v5918_v60, %v3037_v21  ;;  %3568 = vmatmul.bf16.gmra.mxu2 %v3456_v13 }
 0x5de   : > { %v8226_v45 = vpop.eup %5919  ;;  %v3549_v32 = vpop.f32.mrf.mxu2 }
 0x5df   : > { %v8229_v35 = vpop.xlane.xlu1 %2692  ;;  %v3049_v7 = vmul.f32 %v8226_v45, %v8203_v10  ;;  %v8235_v25 = vadd.f32 %v3549_v32, %v9306_v31  ;;  %v3042_v22 = vsel %vm3041_vm4, %v5918_v60, %v3038_v56  ;;  %vm3054_vm6 = vweird.f32 %v8226_v45 }
 0x5e0   : > { %5921 = vrcp.f32 %v8229_v35  ;;  %v3047_v57 = vsel %vm3044_vm5, %v3046_v42, %v3042_v22  ;;  %v3316_v20 = vpop.f32.mrf.mxu0  ;;  %v3405_v59 = vpop.f32.mrf.mxu1  ;;  %v3071_v41 = vand.u32 2147483647, %v8229_v35  ;;  %v3073_v61 = vand.u32 2147483648, %v8229_v35  ;;  %vm8260_vm8 = vmor %vm3053_vm7, %vm3054_vm6 }
 0x5e1   : > { %v3050_v54 = vsub.f32 1.0, %v3049_v7  ;;  %3692 = vst [vmem:[#allocation2 + $0x31] sm:$0xff] %v8235_v25  ;;  %v3206_v14 = vmul.f32 %v7947_v51, %v3047_v57  ;;  %v3207_v53 = vmul.f32 %v7950_v5, %v3047_v57  ;;  %v9307_v5 = vld [vmem:[#allocation7_spill] sm:$0xff]  ;;  %v3406_v26 = vadd.f32 %v3405_v59, %v3316_v20 }
 0x5e2   : > { %v3060_v32 = vor.u32 1.1754944e-38, %v3059_v1  ;;  %vm3067_vm10 = vweird.f32 %v8229_v35  ;;  %v3074_v22 = vor.u32 1.1754944e-38, %v3073_v61  ;;  %vm3072_vm13 = vcmp.eq.f32.partialorder %v3071_v41, 8.507059e+37 }
 0x5e3   : > { %v3051_v9 = vmul.f32 %v8226_v45, %v3050_v54  ;;  %v3246_v18 = vpack.c.bf16 %v3206_v14, %v3204_v62  ;;  %v3247_v3 = vpack.c.bf16 %v3207_v53, %v3205_v2  ;;  %v9310_v54 = vld [vmem:[#allocation8_spill] sm:$0xff] }
 0x5e5   : > { %v3052_v43 = vadd.f32 %v8226_v45, %v3051_v9  ;;  %3335 = vmatmul.bf16.gmra.mxu0 %v3246_v18  ;;  %3424 = vmatmul.bf16.gmra.mxu1 %v3247_v3 }
 0x5e6   : > { %v5922_v11 = vpop.eup %5921  ;;  %v3551_v40 = vpop.f32.mrf.mxu2 }
 0x5e7   : > { %v3063_v60 = vmul.f32 %v5922_v11, %v8229_v35  ;;  %v8244_v30 = vpop.xlane.xlu2 %2695  ;;  %v8248_v6 = vadd.f32 %v3551_v40, %v9307_v5  ;;  %vm3068_vm9 = vweird.f32 %v5922_v11  ;;  %v3056_v10 = vsel %vm8260_vm8, %v8226_v45, %v3052_v43 }
 0x5e8   : > { %5923 = vrcp.f32 %v8244_v30  ;;  %v3318_v27 = vpop.f32.mrf.mxu0  ;;  %v3407_v44 = vpop.f32.mrf.mxu1  ;;  %vm3069_vm12 = vmor %vm3067_vm10, %vm3068_vm9  ;;  %v3061_v53 = vsel %vm3058_vm11, %v3060_v32, %v3056_v10  ;;  %vm3081_vm1 = vweird.f32 %v8244_v30 }
 0x5e9   : > { %v3064_v51 = vsub.f32 1.0, %v3063_v60  ;;  %3693 = vst [vmem:[#allocation2 + $0x39] sm:$0xff] %v8248_v6  ;;  %v3999_v47 = vpack.c.bf16 %v8248_v6, %v8235_v25  ;;  %v3408_v8 = vadd.f32 %v3407_v44, %v3318_v27  ;;  %v3208_v9 = vmul.f32 %v7976_v33, %v3061_v53  ;;  %v4066_v25 = vld [vmem:[#allocation2 + $0x12] sm:$0xff] }
 0x5ea   : > { %v3209_v18 = vmul.f32 %v7979_v19, %v3061_v53 }
 0x5eb   : > { %v3065_v21 = vmul.f32 %v5922_v11, %v3064_v51  ;;  %v3457_v31 = vpack.c.bf16 %v3408_v8, %v3406_v26  ;;  %v3085_v26 = vand.u32 2147483647, %v8244_v30 }
 0x5ed   : > { %v3066_v56 = vadd.f32 %v5922_v11, %v3065_v21  ;;  %3573 = vmatmul.bf16.gmra.mxu2 %v3457_v31  ;;  %vm3086_vm6 = vcmp.eq.f32.partialorder %v3085_v26, 8.507059e+37 }
 0x5ee   : > { %v8264_v13 = vpop.eup %5923  ;;  %v3554_v15 = vpop.f32.mrf.mxu2 }
 0x5ef   : > { %v8266_v42 = vpop.xlane.xlu0 %2698  ;;  %v3077_v7 = vmul.f32 %v8264_v13, %v8244_v30  ;;  %v8276_v57 = vadd.f32 %v3554_v15, %v9310_v54  ;;  %v3070_v45 = vsel %vm3069_vm12, %v5922_v11, %v3066_v56  ;;  %vm3082_vm14 = vweird.f32 %v8264_v13 }
 0x5f0   : > { %5925 = vrcp.f32 %v8266_v42  ;;  %v3075_v35 = vsel %vm3072_vm13, %v3074_v22, %v3070_v45  ;;  %v3321_v62 = vpop.f32.mrf.mxu0  ;;  %v3410_v2 = vpop.f32.mrf.mxu1  ;;  %v3099_v61 = vand.u32 2147483647, %v8266_v42  ;;  %v3101_v27 = vand.u32 2147483648, %v8266_v42  ;;  %vm8301_vm2 = vmor %vm3081_vm1, %vm3082_vm14 }
 0x5f1   : > { %v3078_v14 = vsub.f32 1.0, %v3077_v7  ;;  %3694 = vst [vmem:[#allocation2 + $0x41] sm:$0xff] %v8276_v57  ;;  %v3210_v20 = vmul.f32 %v7997_v34, %v3075_v35  ;;  %v3211_v59 = vmul.f32 %v7999_v16, %v3075_v35  ;;  %v3087_v34 = vand.u32 2147483648, %v8244_v30 }
 0x5f2   : > { %vm3095_vm3 = vweird.f32 %v8266_v42  ;;  %v3102_v7 = vor.u32 1.1754944e-38, %v3101_v27  ;;  %v3411_v31 = vadd.f32 %v3410_v2, %v3321_v62  ;;  %vm3100_vm5 = vcmp.eq.f32.partialorder %v3099_v61, 8.507059e+37 }
 0x5f3   : > { %v3079_v60 = vmul.f32 %v8264_v13, %v3078_v14  ;;  %v3248_v51 = vpack.c.bf16 %v3210_v20, %v3208_v9  ;;  %v3249_v11 = vpack.c.bf16 %v3211_v59, %v3209_v18  ;;  %v3088_v22 = vor.u32 1.1754944e-38, %v3087_v34 }
 0x5f4   : > { %vm9162_vm1 = vmmov 1  }
 0x5f5   : > { %v3080_v41 = vadd.f32 %v8264_v13, %v3079_v60  ;;  %3340 = vmatmul.bf16.gmra.mxu0 %v3248_v51  ;;  %3429 = vmatmul.bf16.gmra.mxu1 %v3249_v11 }
 0x5f6   : > { %v5926_v3 = vpop.eup %5925  ;;  %v3556_v1 = vpop.f32.mrf.mxu2 }
 0x5f7   : > { %v3091_v40 = vmul.f32 %v5926_v3, %v8266_v42  ;;  %v8285_v5 = vpop.xlane.xlu1 %2701  ;;  %v2420_v43 = vpop.xlane.xlu0 %2419  ;;  %v8291_v19 = vadd.f32 %v3556_v1, %v9311_v55  ;;  %vm3096_vm15 = vweird.f32 %v5926_v3  ;;  %v3084_v14 = vsel %vm8301_vm2, %v8264_v13, %v3080_v41  ;;  %v9314_v1 = vld [vmem:[#allocation10_spill] sm:$0xff] }
 0x5f8   : > { %v2484_v21 = vsub.f32 %v8038_v49, %v2420_v43  ;;  %v2485_v33 = vsub.f32 %v8036_v38, %v2420_v43  ;;  %v3323_v32 = vpop.f32.mrf.mxu0  ;;  %v3412_v10 = vpop.f32.mrf.mxu1  ;;  %vm3097_vm4 = vmor %vm3095_vm3, %vm3096_vm15  ;;  %v3089_v62 = vsel %vm3086_vm6, %v3088_v22, %v3084_v14  ;;  %vm3109_vm8 = vweird.f32 %v8285_v5 }
 0x5f9   : > { %v3092_v16 = vsub.f32 1.0, %v3091_v40  ;;  %3695 = vst [vmem:[#allocation2 + $0x49] sm:$0xff] %v8291_v19  ;;  %v4000_v38 = vpack.c.bf16 %v8291_v19, %v8276_v57  ;;  %v3413_v15 = vadd.f32 %v3412_v10, %v3323_v32  ;;  %v3113_v26 = vand.u32 2147483647, %v8285_v5  ;;  %v9333_v57 = vld [vmem:[#allocation19_spill] sm:$0xff] }
 0x5fa   : > { %v2608_v0 = vmul.f32 1.442695, %v2484_v21  ;;  %v2610_v56 = vmul.f32 1.442695, %v2485_v33 }
 0x5fb   : > { %v3093_v44 = vmul.f32 %v5926_v3, %v3092_v16  ;;  %v3458_v53 = vpack.c.bf16 %v3413_v15, %v3411_v31  ;;  %vm3114_vm11 = vcmp.eq.f32.partialorder %v3113_v26, 8.507059e+37  ;;  %v9321_v26 = vld [vmem:[#allocation15_spill] sm:$0xff] }
 0x5fc   : > { %5927 = vpow2.f32 %v2608_v0 }
 0x5fd   : > { %v3094_v8 = vadd.f32 %v5926_v3, %v3093_v44  ;;  %5929 = vpow2.f32 %v2610_v56  ;;  %3578 = vmatmul.bf16.gmra.mxu2 %v3458_v53  ;;  %v3115_v44 = vand.u32 2147483648, %v8285_v5  ;;  %v9315_v56 = vld [vmem:[#allocation11_spill] sm:$0xff] }
 0x5ff   : > { %v2423_v54 = vpop.xlane.xlu1 %2422  ;;  %v3098_v30 = vsel %vm3097_vm4, %v5926_v3, %v3094_v8  ;;  %v3116_v31 = vor.u32 1.1754944e-38, %v3115_v44 }
 0x600   : > { %v2486_v42 = vsub.f32 %v8050_v12, %v2423_v54  ;;  %v2487_v45 = vsub.f32 %v8048_v52, %v2423_v54  ;;  %v3103_v35 = vsel %vm3100_vm5, %v3102_v7, %v3098_v30  ;;  %v3212_v12 = vmul.f32 %v8020_v17, %v3089_v62 }
 0x601   : > { %v3214_v9 = vmul.f32 %v8030_v50, %v3103_v35  ;;  %v3215_v18 = vmul.f32 %v8032_v58, %v3103_v35  ;;  %v3213_v52 = vmul.f32 %v8022_v39, %v3089_v62 }
 0x602   : > { %v2612_v20 = vmul.f32 1.442695, %v2486_v42  ;;  %v2614_v59 = vmul.f32 1.442695, %v2487_v45  ;;  %v8313_v2 = vpop.eup %5927 }
 0x603   : > { %v8317_v60 = vpop.eup %5929  ;;  %v3250_v3 = vpack.c.bf16 %v3214_v9, %v3212_v12  ;;  %v3251_v40 = vpack.c.bf16 %v3215_v18, %v3213_v52  ;;  %v9318_v18 = vld [vmem:[#allocation12_spill] sm:$0xff] }
 0x604   : > { %5931 = vpow2.f32 %v2612_v20  ;;  %v2706_v13 = vadd.f32 %v8317_v60, %v8313_v2 }
 0x605   : > { %5933 = vpow2.f32 %v2614_v59  ;;  %3345 = vmatmul.bf16.gmra.mxu0 %v3250_v3  ;;  %3434 = vmatmul.bf16.gmra.mxu1 %v3251_v40 }
 0x606   : > { %2707 = vadd.xlane.f32.xlu2 %v2706_v13  ;;  %5935 = vrcp.f32 %v8285_v5 }
 0x60a   : > { %v8323_v51 = vpop.eup %5931 }
 0x60b   : > { %v8325_v11 = vpop.eup %5933 }
 0x60c   : > { %v2709_v50 = vadd.f32 %v8325_v11, %v8323_v51  ;;  %v5936_v17 = vpop.eup %5935 }
 0x60d   : > { %v3105_v39 = vmul.f32 %v5936_v17, %v8285_v5  ;;  %vm3110_vm7 = vweird.f32 %v5936_v17 }
 0x60e   : > { %2710 = vadd.xlane.f32.xlu0 %v2709_v50  ;;  %vm8341_vm9 = vmor %vm3109_vm8, %vm3110_vm7 }
 0x60f   : > { %v3106_v58 = vsub.f32 1.0, %v3105_v39 }
 0x611   : > { %v3107_v21 = vmul.f32 %v5936_v17, %v3106_v58 }
 0x613   : > { %v3108_v61 = vadd.f32 %v5936_v17, %v3107_v21 }
 0x615   : > { %v3112_v7 = vsel %vm8341_vm9, %v5936_v17, %v3108_v61 }
 0x616   : > { %v3117_v42 = vsel %vm3114_vm11, %v3116_v31, %v3112_v7 }
 0x617   : > { %v3216_v9 = vmul.f32 %v8040_v36, %v3117_v42  ;;  %v3217_v13 = vmul.f32 %v8042_v4, %v3117_v42 }
 0x640   : > { %v3559_v43 = vpop.f32.mrf.mxu2 }
 0x641   : > { %v2705_v34 = vpop.xlane.xlu2 %2704  ;;  %v8332_v16 = vadd.f32 %v3559_v43, %v9314_v1  ;;  %v9319_v43 = vld [vmem:[#allocation13_spill] sm:$0xff] }
 0x642   : > { %5937 = vrcp.f32 %v2705_v34  ;;  %v3326_v33 = vpop.f32.mrf.mxu0  ;;  %v3415_v55 = vpop.f32.mrf.mxu1  ;;  %v3129_v10 = vand.u32 2147483648, %v2705_v34  ;;  %v3127_v22 = vand.u32 2147483647, %v2705_v34  ;;  %vm3123_vm12 = vweird.f32 %v2705_v34 }
 0x643   : > { %3696 = vst [vmem:[#allocation2 + $0x51] sm:$0xff] %v8332_v16  ;;  %v3416_v30 = vadd.f32 %v3415_v55, %v3326_v33  ;;  %v3720_v55 = vlaneseq }
 0x644   : > { %v3130_v45 = vor.u32 1.1754944e-38, %v3129_v10  ;;  %vm3128_vm14 = vcmp.eq.f32.partialorder %v3127_v22, 8.507059e+37 }
 0x645   : > { %v8355_v44 = vshrl.u32 %v3720_v55, 7 }
 0x647   : > { %v3753_v24 = vand.u32 15, %v8355_v44 }
 0x648   : > { %v5938_v41 = vpop.eup %5937  ;;  %v3561_v27 = vpop.f32.mrf.mxu2 }
 0x649   : > { %v3119_v0 = vmul.f32 %v5938_v41, %v2705_v34  ;;  %v8337_v49 = vadd.f32 %v3561_v27, %v9315_v56  ;;  %vm3124_vm10 = vweird.f32 %v5938_v41 }
 0x64a   : > { %v3328_v54 = vpop.f32.mrf.mxu0  ;;  %v3417_v14 = vpop.f32.mrf.mxu1  ;;  %vm3125_vm13 = vmor %vm3123_vm12, %vm3124_vm10 }
 0x64b   : > { %v3120_v32 = vsub.f32 1.0, %v3119_v0  ;;  %3697 = vst [vmem:[#allocation2 + $0x59] sm:$0xff] %v8337_v49  ;;  %v3418_v5 = vadd.f32 %v3417_v14, %v3328_v54  ;;  %v3735_v0 = vadd.s32 112, %v8355_v44  ;;  %v3733_v14 = vadd.s32 96, %v8355_v44 }
 0x64d   : > { %v3121_v15 = vmul.f32 %v5938_v41, %v3120_v32  ;;  %v3459_v35 = vpack.c.bf16 %v3418_v5, %v3416_v30  ;;  %v3767_v31 = vand.u32 15, %v3735_v0  ;;  %v9322_v5 = vld [vmem:[#allocation16_spill] sm:$0xff] }
 0x64f   : > { %v3122_v53 = vadd.f32 %v5938_v41, %v3121_v15  ;;  %3583 = vmatmul.bf16.gmra.mxu2 %v3459_v35  ;;  %vm3831_vm15 = vcmp.ne.s32.totalorder %v3767_v31, 0  ;;  %v3746_v35 = vadd.s32 200, %v8355_v44 }
 0x650   : > { %v3564_v59 = vpop.f32.mrf.mxu2  ;;  %vm8364_vm2 = vmpackc.low %vm9162_vm1, %vm3831_vm15 }
 0x651   : > { %v3126_v20 = vsel %vm3125_vm13, %v5938_v41, %v3122_v53  ;;  %v3629_v12 = vadd.f32 %v3564_v59, %v9318_v18  ;;  %v3765_v18 = vand.u32 15, %v3733_v14 }
 0x652   : > { %v3131_v62 = vsel %vm3128_vm14, %v3130_v45, %v3126_v20  ;;  %v3331_v40 = vpop.f32.mrf.mxu0  ;;  %v3420_v50 = vpop.f32.mrf.mxu1 }
 0x653   : > { %v3218_v52 = vmul.f32 %v8149_v48, %v3131_v62  ;;  %v3219_v3 = vmul.f32 %v8154_v28, %v3131_v62  ;;  %3698 = vst [vmem:[#allocation2 + $0x61] sm:$0xff] %v3629_v12  ;;  %v3421_v21 = vadd.f32 %v3420_v50, %v3331_v40  ;;  %v9320_v28 = vld [vmem:[#allocation14_spill] sm:$0xff]  ;;  %vm3829_vm3 = vcmp.ne.s32.totalorder %v3765_v18, 0  ;;  %v9325_v50 = vld [vmem:[#allocation17_spill] sm:$0xff] }
 0x654   : > { %vm8379_vm4 = vmpackc.low %vm9162_vm1, %vm3829_vm3 }
 0x655   : > { %v3252_v17 = vpack.c.bf16 %v3218_v52, %v3216_v9  ;;  %v3253_v39 = vpack.c.bf16 %v3219_v3, %v3217_v13  ;;  %v3731_v13 = vadd.s32 80, %v8355_v44 }
 0x657   : > { %3350 = vmatmul.bf16.gmra.mxu0 %v3252_v17  ;;  %3439 = vmatmul.bf16.gmra.mxu1 %v3253_v39 }
 0x658   : > { %v3566_v58 = vpop.f32.mrf.mxu2 }
 0x659   : > { %v3630_v34 = vadd.f32 %v3566_v58, %v9319_v43 }
 0x65a   : > { %v3333_v36 = vpop.f32.mrf.mxu0  ;;  %v3422_v1 = vpop.f32.mrf.mxu1  ;;  %v3797_v39 = vld [vmem:[#allocation2 + $0x60] sm:$0xff] }
 0x65b   : > { %3699 = vst [vmem:[#allocation2 + $0x69] sm:$0xff] %v3630_v34  ;;  %v3423_v33 = vadd.f32 %v3422_v1, %v3333_v36  ;;  %v4002_v9 = vpack.c.bf16 %v3630_v34, %v3629_v12  ;;  %v4001_v36 = vpack.c.bf16 %v8337_v49, %v8332_v16  ;;  %v3763_v1 = vand.u32 15, %v3731_v13 }
 0x65c   : > { %v3729_v16 = vadd.s32 64, %v8355_v44 }
 0x65d   : > { %v3460_v48 = vpack.c.bf16 %v3423_v33, %v3421_v21  ;;  %vm3827_vm5 = vcmp.ne.s32.totalorder %v3763_v1, 0 }
 0x65e   : > { %vm8398_vm6 = vmpackc.low %vm9162_vm1, %vm3827_vm5 }
 0x65f   : > { %3588 = vmatmul.bf16.gmra.mxu2 %v3460_v48 }
 0x660   : > { %v3569_v4 = vpop.f32.mrf.mxu2 }
 0x661   : > { %v3631_v41 = vadd.f32 %v3569_v4, %v9320_v28 }
 0x662   : > { %v3336_v61 = vpop.f32.mrf.mxu0  ;;  %v3425_v27 = vpop.f32.mrf.mxu1  ;;  %v3798_v40 = vld [vmem:[#allocation2 + $0x68] sm:$0xff] }
 0x663   : > { %3700 = vst [vmem:[#allocation2 + $0x71] sm:$0xff] %v3631_v41  ;;  %v3426_v15 = vadd.f32 %v3425_v27, %v3336_v61  ;;  %v8384_v34 = vpack.c.bf16 %v3798_v40, %v3797_v39  ;;  %v3796_v27 = vld [vmem:[#allocation2 + $0x58] sm:$0xff]  ;;  %v3794_v40 = vld [vmem:[#allocation2 + $0x48] sm:$0xff] }
 0x664   : > { %v4391_v23 = vld [vmem:[#allocation2 + $0x69] sm:$0xff] }
 0x668   : > { %v3571_v56 = vpop.f32.mrf.mxu2 }
 0x669   : > { %v3632_v8 = vadd.f32 %v3571_v56, %v9321_v26  ;;  %v9328_v56 = vld [vmem:[#allocation18_spill] sm:$0xff] }
 0x66a   : > { %v3338_v32 = vpop.f32.mrf.mxu0  ;;  %v3427_v10 = vpop.f32.mrf.mxu1  ;;  %v3799_v42 = vld [vmem:[#allocation2 + $0x70] sm:$0xff] }
 0x66b   : > { %3701 = vst [vmem:[#allocation2 + $0x79] sm:$0xff] %v3632_v8  ;;  %v4003_v7 = vpack.c.bf16 %v3632_v8, %v3631_v41  ;;  %v3428_v22 = vadd.f32 %v3427_v10, %v3338_v32  ;;  %v3795_v8 = vld [vmem:[#allocation2 + $0x50] sm:$0xff] }
 0x66d   : > { %4012 = vmatpush.bf16.xpose.msra.mxu3 %v4003_v7  ;;  %v3461_v54 = vpack.c.bf16 %v3428_v22, %v3426_v15  ;;  %v8403_v22 = vpack.c.bf16 %v3796_v27, %v3795_v8  ;;  %v3725_v8 = vadd.s32 32, %v8355_v44 }
 0x66f   : > { %3593 = vmatmul.bf16.gmra.mxu2 %v3461_v54  ;;  %v3761_v54 = vand.u32 15, %v3729_v16 }
 0x670   : > { %v3574_v30 = vpop.f32.mrf.mxu2 }
 0x671   : > { %v8361_v53 = vadd.f32 %v3574_v30, %v9322_v5  ;;  %vm3825_vm10 = vcmp.ne.s32.totalorder %v3761_v54, 0  ;;  %v3790_v54 = vld [vmem:[#allocation2 + $0x28] sm:$0xff] }
 0x672   : > { %v3800_v45 = vld [vmem:[#allocation2 + $0x78] sm:$0xff]  ;;  %v3341_v20 = vpop.f32.mrf.mxu0  ;;  %v3430_v59 = vpop.f32.mrf.mxu1  ;;  %vm8422_vm14 = vmpackc.low %vm9162_vm1, %vm3825_vm10 }
 0x673   : > { %3702 = vst [vmem:[#allocation2 + $0x81] sm:$0xff] %v8361_v53  ;;  %v8369_v62 = vpack.c.bf16 %v3800_v45, %v3799_v42  ;;  %v3431_v48 = vadd.f32 %v3430_v59, %v3341_v20 }
 0x675   : > { %5243 = vmatpush.bf16.xpose.msk.msrb.mxu1 %vm8364_vm2, %v8369_v62  ;;  %4013 = vmatpush.bf16.xpose.msra.mxu3 %v4002_v9  ;;  %v3727_v9 = vadd.s32 48, %v8355_v44 }
 0x678   : > { %v3576_v3 = vpop.f32.mrf.mxu2 }
 0x679   : > { %v2708_v52 = vpop.xlane.xlu2 %2707  ;;  %v8376_v17 = vadd.f32 %v3576_v3, %v9325_v50  ;;  %v3793_v50 = vld [vmem:[#allocation2 + $0x40] sm:$0xff] }
 0x67a   : > { %5939 = vrcp.f32 %v2708_v52  ;;  %v3343_v58 = vpop.f32.mrf.mxu0  ;;  %v3432_v43 = vpop.f32.mrf.mxu1  ;;  %v3143_v14 = vand.u32 2147483648, %v2708_v52  ;;  %vm3137_vm8 = vweird.f32 %v2708_v52  ;;  %v3141_v5 = vand.u32 2147483647, %v2708_v52  ;;  %v4580_v42 = vld [vmem:[#allocation2 + $0x80] sm:$0xff] }
 0x67b   : > { %3703 = vst [vmem:[#allocation2 + $0x89] sm:$0xff] %v8376_v17  ;;  %v3433_v55 = vadd.f32 %v3432_v43, %v3343_v58 }
 0x67c   : > { %v3144_v18 = vor.u32 1.1754944e-38, %v3143_v14  ;;  %vm3142_vm12 = vcmp.eq.f32.partialorder %v3141_v5, 8.507059e+37  ;;  %v9338_v5 = vmov 0 }
 0x67d   : > { %5246 = vmatpush.bf16.xpose.msk.msrb.mxu1 %vm8379_vm4, %v8384_v34  ;;  %4014 = vmatpush.bf16.xpose.msra.mxu3 %v4001_v36  ;;  %v3462_v41 = vpack.c.bf16 %v3433_v55, %v3431_v48  ;;  %v3759_v48 = vand.u32 15, %v3727_v9  ;;  %v8484_v9 = vpack.c.bf16 %v3788_v29, %v3787_v46  ;;  %v4766_v29 = vld [vmem:[#allocation2 + $0x72] sm:$0xff] }
 0x67f   : > { %3598 = vmatmul.bf16.gmra.mxu2 %v3462_v41  ;;  %vm3823_vm5 = vcmp.ne.s32.totalorder %v3759_v48, 0  ;;  %v9345_v48 = vld [vmem:[#allocation20_spill] sm:$0xff] }
 0x680   : > { %v5940_v33 = vpop.eup %5939  ;;  %v3579_v49 = vpop.f32.mrf.mxu2 }
 0x681   : > { %v2711_v4 = vpop.xlane.xlu0 %2710  ;;  %v3133_v28 = vmul.f32 %v5940_v33, %v2708_v52  ;;  %v8395_v26 = vadd.f32 %v3579_v49, %v9328_v56  ;;  %vm3138_vm7 = vweird.f32 %v5940_v33 }
 0x682   : > { %5941 = vrcp.f32 %v2711_v4  ;;  %v3346_v31 = vpop.f32.mrf.mxu0  ;;  %v3435_v15 = vpop.f32.mrf.mxu1  ;;  %vm8411_vm9 = vmor %vm3137_vm8, %vm3138_vm7  ;;  %v3157_v20 = vand.u32 2147483648, %v2711_v4  ;;  %v3155_v13 = vand.u32 2147483647, %v2711_v4  ;;  %vm3151_vm13 = vweird.f32 %v2711_v4  ;;  %v4581_v14 = vld [vmem:[#allocation2 + $0x88] sm:$0xff] }
 0x683   : > { %v3134_v61 = vsub.f32 1.0, %v3133_v28  ;;  %3704 = vst [vmem:[#allocation2 + $0x91] sm:$0xff] %v8395_v26  ;;  %vm8443_vm7 = vmpackc.low %vm9162_vm1, %vm3823_vm5 }
 0x684   : > { %v3158_v43 = vor.u32 1.1754944e-38, %v3157_v20  ;;  %vm3156_vm3 = vcmp.eq.f32.partialorder %v3155_v13, 8.507059e+37  ;;  %v8468_v20 = vpack.c.bf16 %v4581_v14, %v4580_v42  ;;  %v4767_v14 = vld [vmem:[#allocation2 + $0x7a] sm:$0xff] }
 0x685   : > { %v3135_v0 = vmul.f32 %v5940_v33, %v3134_v61  ;;  %5249 = vmatpush.bf16.xpose.msk.msrb.mxu1 %vm8398_vm6, %v8403_v22  ;;  %4015 = vmatpush.bf16.xpose.msra.mxu3 %v4000_v38  ;;  %v8548_v46 = vpack.c.bf16 %v4767_v14, %v4766_v29  ;;  %v4759_v29 = vld [vmem:[#allocation2 + $0x3a] sm:$0xff] }
 0x687   : > { %v3136_v7 = vadd.f32 %v5940_v33, %v3135_v0 }
 0x688   : > { %v5942_v10 = vpop.eup %5941  ;;  %v3581_v3 = vpop.f32.mrf.mxu2 }
 0x689   : > { %v3147_v30 = vmul.f32 %v5942_v10, %v2711_v4  ;;  %v3140_v59 = vsel %vm8411_vm9, %v5940_v33, %v3136_v7  ;;  %vm3152_vm11 = vweird.f32 %v5942_v10  ;;  %v8419_v19 = vadd.f32 %v3581_v3, %v9333_v57  ;;  %v9344_v3 = vld [vmem:[#allocation21_spill] sm:$0xff] }
 0x68a   : > { %v3145_v58 = vsel %vm3142_vm12, %v3144_v18, %v3140_v59  ;;  %vm3153_vm15 = vmor %vm3151_vm13, %vm3152_vm11  ;;  %v3348_v36 = vpop.f32.mrf.mxu0  ;;  %v3437_v1 = vpop.f32.mrf.mxu1  ;;  %v8427_v33 = vpack.c.bf16 %v3794_v40, %v3793_v50  ;;  %v3436_v4 = vadd.f32 %v3435_v15, %v3346_v31  ;;  %v3792_v31 = vld [vmem:[#allocation2 + $0x38] sm:$0xff]  ;;  %v3791_v15 = vld [vmem:[#allocation2 + $0x30] sm:$0xff]  ;;  %vm3817_vm12 = vcmp.ne.s32.totalorder %v3753_v24, 0 }
 0x68b   : > { %v3148_v45 = vsub.f32 1.0, %v3147_v30  ;;  %3705 = vst [vmem:[#allocation2 + $0x99] sm:$0xff] %v8419_v19  ;;  %v3438_v28 = vadd.f32 %v3437_v1, %v3348_v36  ;;  %v3220_v16 = vmul.f32 %v8313_v2, %v3145_v58  ;;  %v3221_v0 = vmul.f32 %v8317_v60, %v3145_v58  ;;  %v4582_v6 = vld [vmem:[#allocation2 + $0x90] sm:$0xff]  ;;  %v3789_v30 = vld [vmem:[#allocation2 + $0x20] sm:$0xff]  ;;  %vm8506_vm13 = vmpackc.low %vm9162_vm1, %vm3817_vm12 }
 0x68c   : > { %v8447_v2 = vpack.c.bf16 %v3792_v31, %v3791_v15  ;;  %v3734_v58 = vadd.s32 104, %v8355_v44  ;;  %v5437_v15 = vld [vmem:[%s9095_s14 + $0x6] sm:$0x1] }
 0x68d   : > { %v3149_v52 = vmul.f32 %v5942_v10, %v3148_v45  ;;  %5252 = vmatpush.bf16.xpose.msk.msrb.mxu1 %vm8422_vm14, %v8427_v33  ;;  %4016 = vmatpush.bf16.xpose.msra.mxu3 %v3999_v47  ;;  %v3463_v49 = vpack.c.bf16 %v3438_v28, %v3436_v4  ;;  %v8466_v45 = vpack.c.bf16 %v3790_v54, %v3789_v30  ;;  %v9352_v30 = vld [vmem:[#allocation22_spill] sm:$0xff] }
 0x68f   : > { %v3150_v38 = vadd.f32 %v5942_v10, %v3149_v52  ;;  %3603 = vmatmul.bf16.gmra.mxu2 %v3463_v49  ;;  %v3736_v52 = vadd.s32 120, %v8355_v44 }
 0x691   : > { %v3154_v41 = vsel %vm3153_vm15, %v5942_v10, %v3150_v38  ;;  %v3768_v57 = vand.u32 15, %v3736_v52 }
 0x692   : > { %v3159_v61 = vsel %vm3156_vm3, %v3158_v43, %v3154_v41  ;;  %v4583_v47 = vld [vmem:[#allocation2 + $0x98] sm:$0xff]  ;;  %v9346_v41 = vmov 0 }
 0x693   : > { %v3222_v27 = vmul.f32 %v8323_v51, %v3159_v61  ;;  %v3223_v56 = vmul.f32 %v8325_v11, %v3159_v61  ;;  %v8449_v60 = vpack.c.bf16 %v4583_v47, %v4582_v6  ;;  %v3757_v51 = vand.u32 15, %v3725_v8  ;;  %v4770_v61 = vld [vmem:[#allocation2 + $0x92] sm:$0xff]  ;;  %v4768_v6 = vld [vmem:[#allocation2 + $0x82] sm:$0xff] }
 0x694   : > { %v3723_v11 = vadd.s32 16, %v8355_v44  ;;  %vm4111_vm15 = vcmp.ne.s32.totalorder %v3768_v57, 15  ;;  %v4708_v57 = vld [vmem:[#allocation2 + $0x111] sm:$0xff] }
 0x695   : > { %v3254_v10 = vpack.c.bf16 %v3222_v27, %v3220_v16  ;;  %v3255_v7 = vpack.c.bf16 %v3223_v56, %v3221_v0  ;;  %5255 = vmatpush.bf16.xpose.msk.msrb.mxu1 %vm8443_vm7, %v8447_v2  ;;  %5440 = vmatpush.bf16.xpose.msk.msrb.mxu2 %vm8364_vm2, %v8449_v60  ;;  %vm3821_vm8 = vcmp.ne.s32.totalorder %v3757_v51, 0  ;;  %vm8518_vm3 = vmpackc.low %vm4111_vm15, %vm9162_vm1  ;;  %v3766_v27 = vand.u32 15, %v3734_v58 }
 0x696   : > { %4017 = vmatpush.bf16.xpose.msra.mxu3 %v3998_v63  ;;  %vm8462_vm9 = vmpackc.low %vm9162_vm1, %vm3821_vm8  ;;  %v3755_v59 = vand.u32 15, %v3723_v11  ;;  %v9340_v63 = vmov 0  ;;  %v9347_v41 = vsel %vm8518_vm3, 4294967295, %v9346_v41  ;;  %v3732_v56 = vadd.s32 88, %v8355_v44 }
 0x697   : > { %3355 = vmatmul.bf16.gmra.mxu0 %v3254_v10  ;;  %3444 = vmatmul.bf16.gmra.mxu1 %v3255_v7  ;;  %v9339_v5 = vsel %vm8462_vm9, 4294967295, %v9338_v5  ;;  %vm4109_vm5 = vcmp.ne.s32.totalorder %v3766_v27, 15  ;;  %v4769_v10 = vld [vmem:[#allocation2 + $0x8a] sm:$0xff]  ;;  %v3730_v11 = vadd.s32 72, %v8355_v44 }
 0x698   : > { %vm3819_vm10 = vcmp.ne.s32.totalorder %v3755_v59, 0  ;;  %v9349_v7 = vld [vmem:[#allocation23_spill] sm:$0xff]  ;;  %vm8532_vm8 = vmpackc.low %vm4109_vm5, %vm9162_vm1  ;;  %v8536_v47 = vpack.c.bf16 %v4769_v10, %v4768_v6  ;;  %v3764_v51 = vand.u32 15, %v3732_v56 }
 0x699   : > { %vm8480_vm11 = vmpackc.low %vm9162_vm1, %vm3819_vm10  ;;  %v3762_v24 = vand.u32 15, %v3730_v11  ;;  %v4760_v11 = vld [vmem:[#allocation2 + $0x42] sm:$0xff] }
 0x69a   : > { %v9341_v63 = vsel %vm8480_vm11, 4294967295, %v9340_v63  ;;  %vm4107_vm10 = vcmp.ne.s32.totalorder %v3764_v51, 15  ;;  %v9363_v51 = vmov 0 }
 0x69b   : > { %vm8544_vm12 = vmpackc.low %vm4107_vm10, %vm9162_vm1  ;;  %vm4105_vm15 = vcmp.ne.s32.totalorder %v3762_v24, 15  ;;  %v9365_v24 = vld [vmem:[#allocation26_spill] sm:$0xff] }
 0x69c   : > { %vm8558_vm5 = vmpackc.low %vm4105_vm15, %vm9162_vm1 }
 0x69d   : > { %5258 = vmatpush.bf16.xpose.msk.msrb.mxu1 %vm8462_vm9, %v8466_v45  ;;  %5443 = vmatpush.bf16.xpose.msk.msrb.mxu2 %vm8379_vm4, %v8468_v20 }
 0x69e   : > { %4018 = vmatpush.bf16.xpose.msra.mxu3 %v3997_v37 }
 0x6a5   : > { %5261 = vmatpush.bf16.xpose.msk.msrb.mxu1 %vm8480_vm11, %v8484_v9  ;;  %5446 = vmatpush.bf16.xpose.msk.msrb.mxu2 %vm8398_vm6, %v8369_v62 }
 0x6ad   : > { %5449 = vmatpush.bf16.xpose.msk.msrb.mxu2 %vm8422_vm14, %v8384_v34 }
 0x6b5   : > { %5452 = vmatpush.bf16.xpose.msk.msrb.mxu2 %vm8443_vm7, %v8403_v22 }
 0x6bd   : > { %5455 = vmatpush.bf16.xpose.msk.msrb.mxu2 %vm8462_vm9, %v8427_v33 }
 0x6c5   : > { %5458 = vmatpush.bf16.xpose.msk.msrb.mxu2 %vm8480_vm11, %v8447_v2 }
 0x6cd   : > { %5461 = vmatpush.bf16.xpose.msk.msrb.mxu2 %vm8506_vm13, %v8466_v45 }
 0x6d2   : > { %v3584_v13 = vpop.f32.mrf.mxu2 }
 0x6d3   : > { %v3637_v40 = vadd.f32 %v3584_v13, %v9344_v3  ;;  %v4765_v13 = vld [vmem:[#allocation2 + $0x6a] sm:$0xff]  ;;  %v9356_v3 = vld [vmem:[#allocation25_spill] sm:$0xff] }
 0x6d4   : > { %v3351_v37 = vpop.f32.mrf.mxu0  ;;  %v3440_v18 = vpop.f32.mrf.mxu1 }
 0x6d5   : > { %3706 = vst [vmem:[#allocation2 + $0xa1] sm:$0xff] %v3637_v40  ;;  %v3441_v43 = vadd.f32 %v3440_v18, %v3351_v37  ;;  %v3728_v18 = vadd.s32 56, %v8355_v44 }
 0x6d7   : > { %v3760_v58 = vand.u32 15, %v3728_v18 }
 0x6d9   : > { %vm4103_vm10 = vcmp.ne.s32.totalorder %v3760_v58, 15 }
 0x6da   : > { %v3586_v36 = vpop.f32.mrf.mxu2  ;;  %vm8570_vm15 = vmpackc.low %vm4103_vm10, %vm9162_vm1 }
 0x6db   : > { %v3638_v4 = vadd.f32 %v3586_v36, %v9345_v48  ;;  %v9359_v48 = vld [vmem:[#allocation24_spill] sm:$0xff] }
 0x6dc   : > { %v3353_v38 = vpop.f32.mrf.mxu0  ;;  %v3442_v50 = vpop.f32.mrf.mxu1  ;;  %v4771_v16 = vld [vmem:[#allocation2 + $0x9a] sm:$0xff] }
 0x6dd   : > { %v3443_v1 = vadd.f32 %v3442_v50, %v3353_v38  ;;  %3707 = vst [vmem:[#allocation2 + $0xa9] sm:$0xff] %v3638_v4  ;;  %v8522_v49 = vpack.c.bf16 %v4771_v16, %v4770_v61  ;;  %v8524_v0 = vpack.c.bf16 %v3638_v4, %v3637_v40  ;;  %v4764_v38 = vld [vmem:[#allocation2 + $0x62] sm:$0xff]  ;;  %v4762_v61 = vld [vmem:[#allocation2 + $0x52] sm:$0xff] }
 0x6de   : > { %v8562_v50 = vpack.c.bf16 %v4765_v13, %v4764_v38  ;;  %v4758_v13 = vld [vmem:[#allocation2 + $0x32] sm:$0xff]  ;;  %v3805_v55 = vld [vmem:[#allocation2 + $0xa0] sm:$0xff] }
 0x6df   : > { %v3464_v28 = vpack.c.bf16 %v3443_v1, %v3441_v43  ;;  %9348 = vst [vmem:[#allocation34_spill] sm:$0xff] %v8524_v0  ;;  %5490 = vmatpush.bf16.xpose.msk.msra.mxu2 %vm8518_vm3, %v8522_v49  ;;  %v3726_v43 = vadd.s32 40, %v8355_v44  ;;  %v4763_v1 = vld [vmem:[#allocation2 + $0x5a] sm:$0xff] }
 0x6e0   : > { %v8574_v16 = vpack.c.bf16 %v4763_v1, %v4762_v61  ;;  %v4757_v1 = vld [vmem:[#allocation2 + $0x2a] sm:$0xff]  ;;  %v9369_v61 = vmov 0 }
 0x6e1   : > { %3608 = vmatmul.bf16.gmra.mxu2 %v3464_v28  ;;  %v3758_v27 = vand.u32 15, %v3726_v43  ;;  %v4475_v28 = vld [vmem:[#allocation2 + $0x9a] sm:$0xff] }
 0x6e2   : > { %v3589_v8 = vpop.f32.mrf.mxu2 }
 0x6e3   : > { %v3639_v31 = vadd.f32 %v3589_v8, %v9349_v7  ;;  %vm4101_vm0 = vcmp.ne.s32.totalorder %v3758_v27, 15  ;;  %v3724_v8 = vadd.s32 24, %v8355_v44  ;;  %v4761_v7 = vld [vmem:[#allocation2 + $0x4a] sm:$0xff]  ;;  %v4756_v27 = vld [vmem:[#allocation2 + $0x22] sm:$0xff] }
 0x6e4   : > { %vm8584_vm10 = vmpackc.low %vm4101_vm0, %vm9162_vm1 }
 0x6e5   : > { %3708 = vst [vmem:[#allocation2 + $0xb1] sm:$0xff] %v3639_v31  ;;  %v9364_v51 = vsel %vm8584_vm10, 4294967295, %v9363_v51  ;;  %v3756_v14 = vand.u32 15, %v3724_v8  ;;  %v8613_v8 = vpack.c.bf16 %v4757_v1, %v4756_v27 }
 0x6e7   : > { %5493 = vmatpush.bf16.xpose.msk.msra.mxu2 %vm8532_vm8, %v8536_v47  ;;  %vm4099_vm11 = vcmp.ne.s32.totalorder %v3756_v14, 15 }
 0x6e8   : > { %vm8596_vm0 = vmpackc.low %vm4099_vm11, %vm9162_vm1 }
 0x6ea   : > { %v3591_v54 = vpop.f32.mrf.mxu2 }
 0x6eb   : > { %v3640_v42 = vadd.f32 %v3591_v54, %v9352_v30  ;;  %v8588_v54 = vpack.c.bf16 %v4761_v7, %v4760_v11  ;;  %v3722_v30 = vadd.s32 8, %v8355_v44 }
 0x6ec   : > { %v3807_v21 = vld [vmem:[#allocation2 + $0xb0] sm:$0xff] }
 0x6ed   : > { %3709 = vst [vmem:[#allocation2 + $0xb9] sm:$0xff] %v3640_v42  ;;  %v8550_v37 = vpack.c.bf16 %v3640_v42, %v3639_v31  ;;  %v9362_v31 = vld [vmem:[#allocation27_spill] sm:$0xff] }
 0x6ee   : > { %v4085_v39 = vld [vmem:[#allocation2 + $0xaa] sm:$0xff] }
 0x6ef   : > { %9355 = vst [vmem:[#allocation3_spill] sm:$0xff] %v8550_v37  ;;  %5496 = vmatpush.bf16.xpose.msk.msra.mxu2 %vm8544_vm12, %v8548_v46 }
 0x6f2   : > { %v3594_v52 = vpop.f32.mrf.mxu2 }
 0x6f3   : > { %v3641_v40 = vadd.f32 %v3594_v52, %v9356_v3  ;;  %v9366_v52 = vmov 0  ;;  %v8600_v3 = vpack.c.bf16 %v4759_v29, %v4758_v13 }
 0x6f4   : > { %v9367_v52 = vsel %vm8596_vm0, 4294967295, %v9366_v52 }
 0x6f5   : > { %3710 = vst [vmem:[#allocation2 + $0xc1] sm:$0xff] %v3641_v40 }
 0x6f7   : > { %5499 = vmatpush.bf16.xpose.msk.msra.mxu2 %vm8558_vm5, %v8562_v50 }
 0x6fa   : > { %v3596_v36 = vpop.f32.mrf.mxu2 }
 0x6fb   : > { %v3642_v4 = vadd.f32 %v3596_v36, %v9359_v48  ;;  %v9368_v48 = vld [vmem:[#allocation29_spill] sm:$0xff] }
 0x6fc   : > { %v4087_v32 = vld [vmem:[#allocation2 + $0xba] sm:$0xff] }
 0x6fd   : > { %3711 = vst [vmem:[#allocation2 + $0xc9] sm:$0xff] %v3642_v4  ;;  %v8576_v56 = vpack.c.bf16 %v3642_v4, %v3641_v40  ;;  %v3754_v40 = vand.u32 15, %v3722_v30  ;;  %v9371_v30 = vld [vmem:[#allocation28_spill] sm:$0xff] }
 0x6ff   : > { %5502 = vmatpush.bf16.xpose.msk.msra.mxu2 %vm8570_vm15, %v8574_v16  ;;  %vm4097_vm9 = vcmp.ne.s32.totalorder %v3754_v40, 15 }
 0x700   : > { %vm8609_vm11 = vmpackc.low %vm4097_vm9, %vm9162_vm1 }
 0x701   : > { %v9370_v61 = vsel %vm8609_vm11, 4294967295, %v9369_v61 }
 0x702   : > { %v3599_v10 = vpop.f32.mrf.mxu2 }
 0x703   : > { %v3643_v6 = vadd.f32 %v3599_v10, %v9362_v31 }
 0x705   : > { %3712 = vst [vmem:[#allocation2 + $0xd1] sm:$0xff] %v3643_v6 }
 0x707   : > { %5505 = vmatpush.bf16.xpose.msk.msra.mxu2 %vm8584_vm10, %v8588_v54 }
 0x70a   : > { %v3601_v42 = vpop.f32.mrf.mxu2 }
 0x70b   : > { %v3644_v18 = vadd.f32 %v3601_v42, %v9365_v24  ;;  %v3962_v24 = vld [vmem:[#allocation2 + $0x1] sm:$0xff] }
 0x70c   : > { %v4089_v12 = vld [vmem:[#allocation2 + $0xca] sm:$0xff] }
 0x70d   : > { %3713 = vst [vmem:[#allocation2 + $0xd9] sm:$0xff] %v3644_v18  ;;  %v8602_v38 = vpack.c.bf16 %v3644_v18, %v3643_v6  ;;  %v3963_v18 = vld [vmem:[#allocation2 + $0x9] sm:$0xff] }
 0x70e   : > { %v3996_v13 = vpack.c.bf16 %v3963_v18, %v3962_v24  ;;  %v3747_v24 = vadd.s32 208, %v8355_v44 }
 0x70f   : > { %5508 = vmatpush.bf16.xpose.msk.msra.mxu2 %vm8596_vm0, %v8600_v3 }
 0x710   : > { %4019 = vmatpush.bf16.xpose.msra.mxu3 %v3996_v13 }
 0x712   : > { %v3604_v36 = vpop.f32.mrf.mxu2 }
 0x713   : > { %v3645_v4 = vadd.f32 %v3604_v36, %v9368_v48  ;;  %v3751_v36 = vadd.s32 240, %v8355_v44  ;;  %v9374_v48 = vld [vmem:[#allocation30_spill] sm:$0xff] }
 0x714   : > { %v3356_v58 = vpop.f32.mrf.mxu0  ;;  %v3445_v43 = vpop.f32.mrf.mxu1 }
 0x715   : > { %3714 = vst [vmem:[#allocation2 + $0xe1] sm:$0xff] %v3645_v4  ;;  %v3446_v31 = vadd.f32 %v3445_v43, %v3356_v58  ;;  %v9373_v58 = vld [vmem:[#allocation31_spill] sm:$0xff] }
 0x717   : > { %5511 = vmatpush.bf16.xpose.msk.msra.mxu2 %vm8609_vm11, %v8613_v8 }
 0x71a   : > { %v3606_v14 = vpop.f32.mrf.mxu2 }
 0x71b   : > { %v8619_v42 = vadd.f32 %v3606_v14, %v9371_v30 }
 0x71c   : > { %v3358_v10 = vpop.f32.mrf.mxu0  ;;  %v3447_v7 = vpop.f32.mrf.mxu1  ;;  %v3813_v13 = vld [vmem:[#allocation2 + $0xe0] sm:$0xff] }
 0x71d   : > { %v3448_v6 = vadd.f32 %v3447_v7, %v3358_v10  ;;  %9372 = vst [vmem:[#allocation4_spill] sm:$0xff] %v8619_v42  ;;  %v8623_v29 = vpack.c.bf16 %v8619_v42, %v3645_v4  ;;  %v3783_v7 = vand.u32 15, %v3751_v36  ;;  %v3749_v4 = vadd.s32 224, %v8355_v44 }
 0x71e   : > { %3715 = vst [vmem:[#allocation2 + $0xe9] sm:$0xff] %v8619_v42  ;;  %v3745_v36 = vadd.s32 192, %v8355_v44  ;;  %v9387_v42 = vmov 0 }
 0x71f   : > { %v3465_v11 = vpack.c.bf16 %v3448_v6, %v3446_v31  ;;  %vm3847_vm9 = vcmp.ne.s32.totalorder %v3783_v7, 0  ;;  %v3781_v30 = vand.u32 15, %v3749_v4 }
 0x720   : > { %vm8633_vm11 = vmpackc.low %vm9162_vm1, %vm3847_vm9  ;;  %v3777_v4 = vand.u32 15, %v3745_v36 }
 0x721   : > { %3613 = vmatmul.bf16.gmra.mxu2 %v3465_v11  ;;  %v9375_v11 = vmov 0  ;;  %vm3845_vm0 = vcmp.ne.s32.totalorder %v3781_v30, 0  ;;  %v8668_v30 = vld [vmem:[#allocation2] sm:$0xff] }
 0x722   : > { %v9376_v11 = vsel %vm8633_vm11, 4294967295, %v9375_v11  ;;  %vm8645_vm10 = vmpackc.low %vm9162_vm1, %vm3845_vm0  ;;  %vm3841_vm0 = vcmp.ne.s32.totalorder %v3777_v4, 0  ;;  %9381 = vst [vmem:[#allocation5_spill] sm:$0xff] %v8668_v30  ;;  %v3808_v4 = vld [vmem:[#allocation2 + $0xb8] sm:$0xff] }
 0x725   : > { %v3814_v18 = vld [vmem:[#allocation2 + $0xe8] sm:$0xff] }
 0x731   : > { %4658 = vmatmul.bf16.vlgmr.msrb.gmra.mxu2 %v5437_v15 }
 0x764   : > { %v3609_v40 = vpop.f32.mrf.mxu2 }
 0x765   : > { %v3647_v43 = vadd.f32 %v3609_v40, %v9373_v58  ;;  %v9377_v40 = vmov 0  ;;  %v8649_v58 = vpack.c.bf16 %v3814_v18, %v3813_v13  ;;  %v3809_v18 = vld [vmem:[#allocation2 + $0xc0] sm:$0xff]  ;;  %v9382_v13 = vmov 0 }
 0x766   : > { %v9378_v40 = vsel %vm8645_vm10, 4294967295, %v9377_v40 }
 0x767   : > { %3716 = vst [vmem:[#allocation2 + $0xf1] sm:$0xff] %v3647_v43 }
 0x76c   : > { %v3611_v1 = vpop.f32.mrf.mxu2 }
 0x76d   : > { %v3648_v27 = vadd.f32 %v3611_v1, %v9374_v48  ;;  %v3812_v1 = vld [vmem:[#allocation2 + $0xd8] sm:$0xff]  ;;  %v3811_v48 = vld [vmem:[#allocation2 + $0xd0] sm:$0xff] }
 0x76e   : > { %v3815_v31 = vld [vmem:[#allocation2 + $0xf0] sm:$0xff]  ;;  %v8661_v7 = vpack.c.bf16 %v3812_v1, %v3811_v48  ;;  %v5240_v1 = vld [vmem:[%s9095_s14 + $0x1] sm:$0x1]  ;;  %v3741_v48 = vadd.s32 160, %v8355_v44 }
 0x76f   : > { %3717 = vst [vmem:[#allocation2 + $0xf9] sm:$0xff] %v3648_v27  ;;  %v8628_v10 = vpack.c.bf16 %v3648_v27, %v3647_v43  ;;  %v3779_v43 = vand.u32 15, %v3747_v24  ;;  %v9379_v27 = vmov 0  ;;  %v5263_v24 = vpack.c.bf16 %v8668_v30, %v8668_v30  ;;  %4020 = vmatmul.bf16.vlgmr.msra.gmra.mxu3 %v5240_v1 }
 0x771   : > { %4025 = vmatpush.bf16.xpose.msrb.mxu0 %v8628_v10  ;;  %vm3843_vm9 = vcmp.ne.s32.totalorder %v3779_v43, 0  ;;  %5264 = vmatpush.bf16.xpose.msk.msrb.mxu1 %vm8506_vm13, %v5263_v24  ;;  %v3773_v24 = vand.u32 15, %v3741_v48  ;;  %v3752_v48 = vadd.s32 248, %v8355_v44 }
 0x776   : > { %v3816_v6 = vld [vmem:[#allocation2 + $0xf8] sm:$0xff] }
 0x777   : > { %v8637_v14 = vpack.c.bf16 %v3816_v6, %v3815_v31  ;;  %v3743_v31 = vadd.s32 176, %v8355_v44  ;;  %v3810_v6 = vld [vmem:[#allocation2 + $0xc8] sm:$0xff] }
 0x778   : > { %v8679_v43 = vpack.c.bf16 %v3810_v6, %v3809_v18  ;;  %v9384_v6 = vmov 0  ;;  %v3739_v18 = vadd.s32 144, %v8355_v44 }
 0x779   : > { %5267 = vmatpush.bf16.xpose.msk.msrb.mxu3 %vm8633_vm11, %v8637_v14  ;;  %4026 = vmatpush.bf16.xpose.msrb.mxu0 %v8623_v29  ;;  %vm8657_vm11 = vmpackc.low %vm9162_vm1, %vm3843_vm9  ;;  %v3775_v36 = vand.u32 15, %v3743_v31  ;;  %v8694_v31 = vpack.c.bf16 %v3808_v4, %v3807_v21 }
 0x77a   : > { %v9380_v27 = vsel %vm8657_vm11, 4294967295, %v9379_v27  ;;  %vm8673_vm9 = vmpackc.low %vm9162_vm1, %vm3841_vm0  ;;  %v3771_v21 = vand.u32 15, %v3739_v18  ;;  %v9392_v18 = vmov 0 }
 0x77b   : > { %v9383_v13 = vsel %vm8673_vm9, 4294967295, %v9382_v13  ;;  %vm3839_vm0 = vcmp.ne.s32.totalorder %v3775_v36, 0  ;;  %9386 = vst [vmem:[#allocation6_spill] sm:$0xff] %v8694_v31  ;;  %v3806_v36 = vld [vmem:[#allocation2 + $0xa8] sm:$0xff] }
 0x77c   : > { %v8706_v30 = vpack.c.bf16 %v3806_v36, %v3805_v55  ;;  %v3784_v55 = vand.u32 15, %v3752_v48 }
 0x77e   : > { %9389 = vst [vmem:[#allocation7_spill] sm:$0xff] %v8706_v30 }
 0x781   : > { %5270 = vmatpush.bf16.xpose.msk.msrb.mxu3 %vm8645_vm10, %v8649_v58  ;;  %4027 = vmatpush.bf16.xpose.msrb.mxu0 %v8602_v38 }
 0x789   : > { %5273 = vmatpush.bf16.xpose.msk.msrb.mxu3 %vm8657_vm11, %v8661_v7  ;;  %4028 = vmatpush.bf16.xpose.msrb.mxu0 %v8576_v56  ;;  %vm8690_vm11 = vmpackc.low %vm9162_vm1, %vm3839_vm0 }
 0x78a   : > { %v9385_v6 = vsel %vm8690_vm11, 4294967295, %v9384_v6 }
 0x791   : > { %5276 = vmatpush.bf16.xpose.msk.msrb.mxu3 %vm8673_vm9, %v8679_v43  ;;  %4029 = vmatpush.bf16.xpose.msrb.mxu0 %v8550_v37  ;;  %vm3837_vm9 = vcmp.ne.s32.totalorder %v3773_v24, 0  ;;  %v9390_v24 = vpack.c.bf16 %v8419_v19, %v8395_v26  ;;  %v9394_v19 = vpack.c.bf16 %v8376_v17, %v8361_v53 }
 0x792   : > { %vm8702_vm10 = vmpackc.low %vm9162_vm1, %vm3837_vm9  ;;  %vm3835_vm9 = vcmp.ne.s32.totalorder %v3771_v21, 0  ;;  %v9395_v21 = vld [vmem:[#allocation32_spill] sm:$0xff] }
 0x793   : > { %v9388_v42 = vsel %vm8702_vm10, 4294967295, %v9387_v42  ;;  %vm8721_vm0 = vmpackc.low %vm9162_vm1, %vm3835_vm9 }
 0x794   : > { %v9393_v18 = vsel %vm8721_vm0, 4294967295, %v9392_v18 }
 0x799   : > { %5279 = vmatpush.bf16.xpose.msk.msrb.mxu3 %vm8690_vm11, %v8694_v31  ;;  %4030 = vmatpush.bf16.xpose.msrb.mxu0 %v8524_v0  ;;  %v9391_v0 = vld [vmem:[#allocation33_spill] sm:$0xff]  ;;  %v3737_v31 = vadd.s32 128, %v8355_v44 }
 0x79b   : > { %v3769_v36 = vand.u32 15, %v3737_v31  ;;  %v4094_v31 = vld [vmem:[#allocation2 + $0xf2] sm:$0xff] }
 0x79d   : > { %vm3833_vm9 = vcmp.ne.s32.totalorder %v3769_v36, 0  ;;  %v3748_v36 = vadd.s32 216, %v8355_v44 }
 0x79e   : > { %vm8750_vm11 = vmpackc.low %vm9162_vm1, %vm3833_vm9 }
 0x7a1   : > { %5282 = vmatpush.bf16.xpose.msk.msrb.mxu3 %vm8702_vm10, %v8706_v30  ;;  %4031 = vmatpush.bf16.xpose.msrb.mxu0 %v9390_v24  ;;  %vm4127_vm10 = vcmp.ne.s32.totalorder %v3784_v55, 15  ;;  %v3750_v30 = vadd.s32 232, %v8355_v44 }
 0x7a3   : > { %v3782_v55 = vand.u32 15, %v3750_v30  ;;  %v4092_v30 = vld [vmem:[#allocation2 + $0xe2] sm:$0xff] }
 0x7a4   : > { %v3614_v4 = vpop.f32.mrf.mxu2 }
 0x7a5   : > { %v8716_v37 = vadd.f32 %v3614_v4, %v9391_v0  ;;  %v3945_v0 = vld [vmem:[%s9095_s14] sm:$0x1] }
 0x7a6   : > { %4046 = vmatmul.bf16.vlgmr.msrb.gmra.mxu1 %v3945_v0 }
 0x7a7   : > { %3718 = vst [vmem:[#allocation2 + $0x101] sm:$0xff] %v8716_v37 }
 0x7a9   : > { %5285 = vmatpush.bf16.xpose.msk.msrb.mxu3 %vm8721_vm0, %v8449_v60  ;;  %4032 = vmatpush.bf16.xpose.msrb.mxu0 %v9394_v19  ;;  %vm8742_vm0 = vmpackc.low %vm4127_vm10, %vm9162_vm1  ;;  %v4093_v19 = vld [vmem:[#allocation2 + $0xea] sm:$0xff] }
 0x7ac   : > { %v3616_v26 = vpop.f32.mrf.mxu2 }
 0x7ad   : > { %v8736_v48 = vadd.f32 %v3616_v26, %v9395_v21  ;;  %v9445_v26 = vld [vmem:[#allocation4_spill] sm:$0xff] }
 0x7ae   : > { %v4095_v4 = vld [vmem:[#allocation2 + $0xfa] sm:$0xff] }
 0x7af   : > { %3719 = vst [vmem:[#allocation2 + $0x109] sm:$0xff] %v8736_v48  ;;  %v8747_v53 = vpack.c.bf16 %v4095_v4, %v4094_v31  ;;  %v3780_v31 = vand.u32 15, %v3748_v36  ;;  %v4090_v4 = vld [vmem:[#allocation2 + $0xd2] sm:$0xff] }
 0x7b0   : > { %4033 = vmatmul.bf16.vlgmr.msrb.gmra.mxu0 %v5240_v1  ;;  %v8772_v1 = vpack.c.bf16 %v4093_v19, %v4092_v30  ;;  %v3778_v19 = vand.u32 15, %v3746_v35 }
 0x7b1   : > { %5292 = vmatpush.bf16.xpose.msk.msra.mxu0 %vm8518_vm3, %v8548_v46  ;;  %5316 = vmatpush.bf16.xpose.msk.msra.mxu1 %vm8742_vm0, %v8747_v53  ;;  %vm4125_vm3 = vcmp.ne.s32.totalorder %v3782_v55, 15  ;;  %vm4123_vm9 = vcmp.ne.s32.totalorder %v3780_v31, 15  ;;  %v5487_v55 = vld [vmem:[%s9095_s14 + $0x8] sm:$0x1] }
 0x7b2   : > { %5288 = vmatpush.bf16.xpose.msk.msrb.mxu3 %vm8750_vm11, %v8468_v20  ;;  %vm8768_vm10 = vmpackc.low %vm4125_vm3, %vm9162_vm1  ;;  %vm4121_vm3 = vcmp.ne.s32.totalorder %v3778_v19, 15  ;;  %4846 = vmatmul.bf16.vlgmr.msra.gmra.mxu2 %v5487_v55 }
 0x7b9   : > { %5295 = vmatpush.bf16.xpose.msk.msra.mxu0 %vm8532_vm8, %v8562_v50  ;;  %5319 = vmatpush.bf16.xpose.msk.msra.mxu1 %vm8768_vm10, %v8772_v1 }
 0x7ba   : > { %5341 = vmatpush.bf16.xpose.msk.msra.mxu3 %vm8364_vm2, %v8468_v20  ;;  %v4091_v20 = vld [vmem:[#allocation2 + $0xda] sm:$0xff]  ;;  %vm8785_vm2 = vmpackc.low %vm4123_vm9, %vm9162_vm1 }
 0x7bb   : > { %4059 = vmatmul.bf16.vlgmr.msrb.gmra.mxu3 %v3945_v0  ;;  %v8789_v36 = vpack.c.bf16 %v4091_v20, %v4090_v4  ;;  %v4088_v0 = vld [vmem:[#allocation2 + $0xc2] sm:$0xff]  ;;  %v4086_v20 = vld [vmem:[#allocation2 + $0xb2] sm:$0xff]  ;;  %v9406_v4 = vmov 0 }
 0x7bc   : > { %v8806_v31 = vpack.c.bf16 %v4089_v12, %v4088_v0  ;;  %v8823_v19 = vpack.c.bf16 %v4087_v32, %v4086_v20  ;;  %v4084_v12 = vld [vmem:[#allocation2 + $0xa2] sm:$0xff]  ;;  %v9409_v0 = vmov 0  ;;  %v4067_v32 = vld [vmem:[#allocation2 + $0x1a] sm:$0xff]  ;;  %v3738_v20 = vadd.s32 136, %v8355_v44 }
 0x7c1   : > { %5298 = vmatpush.bf16.xpose.msk.msra.mxu0 %vm8544_vm12, %v8574_v16  ;;  %5322 = vmatpush.bf16.xpose.msk.msra.mxu1 %vm8785_vm2, %v8789_v36 }
 0x7c2   : > { %5344 = vmatpush.bf16.xpose.msk.msra.mxu3 %vm8379_vm4, %v8369_v62  ;;  %v3744_v62 = vadd.s32 184, %v8355_v44  ;;  %vm8802_vm4 = vmpackc.low %vm4121_vm3, %vm9162_vm1 }
 0x7c4   : > { %v3776_v35 = vand.u32 15, %v3744_v62 }
 0x7c6   : > { %vm4119_vm9 = vcmp.ne.s32.totalorder %v3776_v35, 15  ;;  %v8840_v35 = vpack.c.bf16 %v4085_v39, %v4084_v12  ;;  %v4064_v39 = vld [vmem:[#allocation2 + $0x2] sm:$0xff]  ;;  %v4065_v12 = vld [vmem:[#allocation2 + $0xa] sm:$0xff] }
 0x7c9   : > { %5301 = vmatpush.bf16.xpose.msk.msra.mxu0 %vm8558_vm5, %v8588_v54  ;;  %5325 = vmatpush.bf16.xpose.msk.msra.mxu1 %vm8802_vm4, %v8806_v31 }
 0x7ca   : > { %5347 = vmatpush.bf16.xpose.msk.msra.mxu3 %vm8398_vm6, %v8384_v34  ;;  %v3742_v34 = vadd.s32 168, %v8355_v44  ;;  %vm8819_vm6 = vmpackc.low %vm4119_vm9, %vm9162_vm1 }
 0x7cb   : > { %v9407_v4 = vsel %vm8819_vm6, 4294967295, %v9406_v4 }
 0x7cc   : > { %v3774_v62 = vand.u32 15, %v3742_v34 }
 0x7ce   : > { %vm4117_vm3 = vcmp.ne.s32.totalorder %v3774_v62, 15  ;;  %v9414_v62 = vmov 0 }
 0x7cf   : > { %vm8836_vm9 = vmpackc.low %vm4117_vm3, %vm9162_vm1  ;;  %vm9411_vm3 = vnez %v9339_v5  ;;  %vm9412_vm1 = vnez %v9367_v52  ;;  %v5312_v5 = vpack.c.bf16 %v4065_v12, %v4064_v39  ;;  %v4389_v39 = vld [vmem:[#allocation2 + $0x59] sm:$0xff]  ;;  %v4388_v12 = vld [vmem:[#allocation2 + $0x51] sm:$0xff] }
 0x7d0   : > { %v9410_v0 = vsel %vm8836_vm9, 4294967295, %v9409_v0 }
 0x7d1   : > { %5304 = vmatpush.bf16.xpose.msk.msra.mxu0 %vm8570_vm15, %v8600_v3  ;;  %5328 = vmatpush.bf16.xpose.msk.msra.mxu1 %vm8819_vm6, %v8823_v19 }
 0x7d2   : > { %5350 = vmatpush.bf16.xpose.msk.msra.mxu3 %vm8422_vm14, %v8403_v22  ;;  %v3740_v22 = vadd.s32 152, %v8355_v44  ;;  %vm9408_vm14 = vnez %v9364_v51  ;;  %v4301_v44 = vld [vmem:[#allocation2 + $0x108] sm:$0xff] }
 0x7d4   : > { %v3772_v34 = vand.u32 15, %v3740_v22  ;;  %v3770_v22 = vand.u32 15, %v3738_v20  ;;  %v4393_v20 = vld [vmem:[#allocation2 + $0x79] sm:$0xff] }
 0x7d9   : > { %5307 = vmatpush.bf16.xpose.msk.msra.mxu0 %vm9408_vm14, %v8613_v8  ;;  %5331 = vmatpush.bf16.xpose.msk.msra.mxu1 %vm8836_vm9, %v8840_v35  ;;  %vm9413_vm14 = vmmov 1   ;;  %vm4113_vm9 = vcmp.ne.s32.totalorder %v3770_v22, 15 }
 0x7da   : > { %5353 = vmatpush.bf16.xpose.msk.msra.mxu3 %vm8443_vm7, %v8427_v33  ;;  %vm4115_vm7 = vcmp.ne.s32.totalorder %v3772_v34, 15  ;;  %v8845_v33 = vpack.c.bf16 %v4067_v32, %v4066_v25  ;;  %v8869_v32 = vld [vmem:[#allocation2 + $0x81] sm:$0xff]  ;;  %v9418_v25 = vmov 0 }
 0x7db   : > { %vm8855_vm6 = vmpackc.low %vm4115_vm7, %vm9413_vm14  ;;  %vm9417_vm7 = vnez %v9370_v61 }
 0x7dc   : > { %v9415_v62 = vsel %vm8855_vm6, 4294967295, %v9414_v62 }
 0x7e1   : > { %5310 = vmatpush.bf16.xpose.msk.msra.mxu0 %vm9412_vm1, %v8845_v33  ;;  %5334 = vmatpush.bf16.xpose.msk.msra.mxu1 %vm8855_vm6, %v8522_v49  ;;  %vm8872_vm1 = vmpackc.low %vm4113_vm9, %vm9413_vm14  ;;  %vm9420_vm6 = vnez %v9376_v11  ;;  %v4421_v49 = vpack.c.bf16 %v8376_v17, %v8869_v32  ;;  %vm9421_vm14 = vnez %v9378_v40  ;;  %v4392_v17 = vld [vmem:[#allocation2 + $0x71] sm:$0xff]  ;;  %vm9423_vm9 = vnez %v9383_v13 }
 0x7e2   : > { %5356 = vmatpush.bf16.xpose.msk.msra.mxu3 %vm9411_vm3, %v8447_v2  ;;  %v4300_v2 = vld [vmem:[#allocation2 + $0x100] sm:$0xff]  ;;  %vm9416_vm3 = vnez %v9341_v63  ;;  %v9419_v25 = vsel %vm8872_vm1, 4294967295, %v9418_v25  ;;  %v8889_v63 = vpack.c.bf16 %v8736_v48, %v8716_v37  ;;  %v8898_v22 = vpack.c.bf16 %v4393_v20, %v4392_v17  ;;  %v4384_v20 = vld [vmem:[#allocation2 + $0x31] sm:$0xff] }
 0x7e3   : > { %v8862_v34 = vpack.c.bf16 %v4301_v44, %v4300_v2  ;;  %v5338_v37 = vld [vmem:[%s9095_s14 + $0x3] sm:$0x1]  ;;  %v8915_v44 = vpack.c.bf16 %v4389_v39, %v4388_v12 }
 0x7e4   : > { %v4386_v2 = vld [vmem:[#allocation2 + $0x41] sm:$0xff] }
 0x7e5   : > { %9424 = vst [vmem:[#allocation8_spill] sm:$0xff] %v8915_v44  ;;  %v4382_v39 = vld [vmem:[#allocation2 + $0x21] sm:$0xff] }
 0x7e9   : > { %5313 = vmatpush.bf16.xpose.msk.msra.mxu0 %vm9417_vm7, %v5312_v5  ;;  %5337 = vmatpush.bf16.xpose.msk.msra.mxu1 %vm8872_vm1, %v8536_v47  ;;  %v4387_v5 = vld [vmem:[#allocation2 + $0x49] sm:$0xff]  ;;  %vm9428_vm1 = vnez %v9388_v42  ;;  %vm9432_vm7 = vnez %v9393_v18  ;;  %v4702_v18 = vld [vmem:[#allocation2 + $0xe1] sm:$0xff] }
 0x7ea   : > { %5359 = vmatpush.bf16.xpose.msk.msra.mxu3 %vm9416_vm3, %v8466_v45  ;;  %v5289_v45 = vld [vmem:[%s9095_s14 + $0x2] sm:$0x1]  ;;  %vm9425_vm3 = vnez %v9385_v6 }
 0x7f0   : > { %4250 = vmatmul.bf16.vlgmr.msra.gmra.mxu0 %v5289_v45  ;;  %4263 = vmatmul.bf16.vlgmr.msra.gmra.mxu1 %v5289_v45  ;;  %v9427_v45 = vld [vmem:[#allocation6_spill] sm:$0xff] }
 0x7f1   : > { %5365 = vmatpush.bf16.xpose.msk.msrb.mxu0 %vm9420_vm6, %v8862_v34  ;;  %4430 = vmatpush.bf16.xpose.msrb.mxu1 %v4421_v49  ;;  %v8922_v49 = vpack.c.bf16 %v4387_v5, %v4386_v2  ;;  %v9434_v5 = vld [vmem:[#allocation34_spill] sm:$0xff] }
 0x7f2   : > { %5362 = vmatpush.bf16.xpose.msk.msra.mxu3 %vm8506_vm13, %v8484_v9  ;;  %vm9422_vm13 = vnez %v9380_v27  ;;  %v4390_v9 = vld [vmem:[#allocation2 + $0x61] sm:$0xff] }
 0x7f3   : > { %v8908_v48 = vpack.c.bf16 %v4391_v23, %v4390_v9  ;;  %9426 = vst [vmem:[#allocation9_spill] sm:$0xff] %v8922_v49  ;;  %v9430_v23 = vld [vmem:[#allocation3_spill] sm:$0xff] }
 0x7f4   : > { %v9431_v9 = vld [vmem:[#allocation7_spill] sm:$0xff] }
 0x7f5   : > { %v4488_v2 = vld [vmem:[#allocation2 + $0x102] sm:$0xff] }
 0x7f9   : > { %5368 = vmatpush.bf16.xpose.msk.msrb.mxu0 %vm9421_vm14, %v8637_v14  ;;  %4431 = vmatpush.bf16.xpose.msrb.mxu1 %v8898_v22 }
 0x7fa   : > { %4443 = vmatpush.bf16.xpose.msrb.mxu3 %v8889_v63 }
 0x7fb   : > { %4360 = vmatmul.bf16.vlgmr.msra.gmra.mxu3 %v5338_v37 }
 0x801   : > { %5371 = vmatpush.bf16.xpose.msk.msrb.mxu0 %vm9422_vm13, %v8649_v58  ;;  %4432 = vmatpush.bf16.xpose.msrb.mxu1 %v8908_v48 }
 0x802   : > { %4444 = vmatpush.bf16.xpose.msrb.mxu3 %v8628_v10 }
 0x809   : > { %5374 = vmatpush.bf16.xpose.msk.msrb.mxu0 %vm9423_vm9, %v8661_v7  ;;  %4433 = vmatpush.bf16.xpose.msrb.mxu1 %v8915_v44 }
 0x80a   : > { %4445 = vmatpush.bf16.xpose.msrb.mxu3 %v8623_v29  ;;  %v4385_v29 = vld [vmem:[#allocation2 + $0x39] sm:$0xff] }
 0x80b   : > { %v8929_v17 = vpack.c.bf16 %v4385_v29, %v4384_v20  ;;  %v4489_v29 = vld [vmem:[#allocation2 + $0x10a] sm:$0xff] }
 0x80c   : > { %v4380_v20 = vld [vmem:[#allocation2 + $0x11] sm:$0xff] }
 0x80d   : > { %9429 = vst [vmem:[#allocation10_spill] sm:$0xff] %v8929_v17 }
 0x811   : > { %5377 = vmatpush.bf16.xpose.msk.msrb.mxu0 %vm9425_vm3, %v8679_v43  ;;  %4434 = vmatpush.bf16.xpose.msrb.mxu1 %v8922_v49  ;;  %v4396_v49 = vld [vmem:[#allocation2 + $0x91] sm:$0xff] }
 0x812   : > { %4446 = vmatpush.bf16.xpose.msrb.mxu3 %v8602_v38  ;;  %v4383_v38 = vld [vmem:[#allocation2 + $0x29] sm:$0xff] }
 0x813   : > { %v8936_v12 = vpack.c.bf16 %v4383_v38, %v4382_v39  ;;  %v8946_v38 = vpack.c.bf16 %v4489_v29, %v4488_v2  ;;  %v4598_v39 = vld [vmem:[#allocation2 + $0x110] sm:$0xff]  ;;  %v5956_v29 = vmov 1  }
 0x814   : > { %5614 = vset.pattern.permute.xlu2 %v5956_v29 }
 0x815   : > { %9433 = vst [vmem:[#allocation11_spill] sm:$0xff] %v8936_v12 }
 0x819   : > { %5380 = vmatpush.bf16.xpose.msk.msrb.mxu0 %vm9428_vm1, %v9427_v45  ;;  %4435 = vmatpush.bf16.xpose.msrb.mxu1 %v8929_v17  ;;  %vm9435_vm1 = vnez %v9347_v41  ;;  %v4397_v17 = vld [vmem:[#allocation2 + $0x99] sm:$0xff]  ;;  %v5387_v41 = vld [vmem:[%s9095_s14 + $0x4] sm:$0x1] }
 0x81a   : > { %4447 = vmatpush.bf16.xpose.msrb.mxu3 %v8576_v56  ;;  %v4381_v56 = vld [vmem:[#allocation2 + $0x19] sm:$0xff] }
 0x821   : > { %5383 = vmatpush.bf16.xpose.msk.msrb.mxu0 %vm9432_vm7, %v9431_v9  ;;  %4436 = vmatpush.bf16.xpose.msrb.mxu1 %v8936_v12  ;;  %v4021_v12 = vpop.f32.mrf.mxu3 }
 0x822   : > { %4448 = vmatpush.bf16.xpose.msrb.mxu3 %v9430_v23  ;;  %v4414_v23 = vpack.c.bf16 %v4381_v56, %v4380_v20  ;;  %v4695_v20 = vld [vmem:[#allocation2 + $0xa9] sm:$0xff] }
 0x823   : > { %v4047_v56 = vpop.f32.mrf.mxu1 }
 0x829   : > { %5386 = vmatpush.bf16.xpose.msk.msrb.mxu0 %vm8750_vm11, %v8449_v60  ;;  %4437 = vmatpush.bf16.xpose.msrb.mxu1 %v4414_v23  ;;  %v4422_v60 = vpack.c.bf16 %v4397_v17, %v4396_v49  ;;  %v9447_v49 = vld [vmem:[#allocation9_spill] sm:$0xff]  ;;  %v4866_v17 = vld [vmem:[%s9096_s15] sm:$0x3] }
 0x82a   : > { %4449 = vmatpush.bf16.xpose.msrb.mxu3 %v9434_v5  ;;  %v9436_v5 = vld [vmem:[#allocation5_spill] sm:$0xff] }
 0x82b   : > { %v5463_v44 = vpack.c.bf16 %v9436_v5, %v4598_v39  ;;  %v4049_v11 = vpop.f32.mrf.mxu1 }
 0x82c   : > { %v4659_v11 = vpop.f32.mrf.mxu2 }
 0x82d   : > { %v4034_v59 = vpop.f32.mrf.mxu0 }
 0x830   : > { %4373 = vmatmul.bf16.vlgmr.msrb.gmra.mxu0 %v5338_v37  ;;  %4438 = vmatmul.bf16.vlgmr.msrb.gmra.mxu1 %v5387_v41  ;;  %v4048_v37 = vadd.f32 %v4047_v56, %v4021_v12  ;;  %v5955_v12 = vmov 0  }
 0x831   : > { %5391 = vmatpush.bf16.xpose.msk.msra.mxu0 %vm9435_vm1, %v8536_v47  ;;  %5415 = vmatpush.bf16.xpose.msk.msra.mxu1 %vm8742_vm0, %v8946_v38  ;;  %v4023_v47 = vpop.f32.mrf.mxu3  ;;  %vm9437_vm1 = vnez %v9407_v4  ;;  %v9448_v4 = vld [vmem:[#allocation10_spill] sm:$0xff] }
 0x832   : > { %4450 = vmatpush.bf16.xpose.msrb.mxu3 %v4422_v60  ;;  %5613 = vset.pattern.permute.xlu1 %v5955_v12 }
 0x833   : > { %5615 = vset.pattern.permute.xlu0 %v5955_v12  ;;  %4869 = vperm.xlu1 %5613, %v4866_v17  }
 0x839   : > { %5394 = vmatpush.bf16.xpose.msk.msra.mxu0 %vm8532_vm8, %v8548_v46  ;;  %5418 = vmatpush.bf16.xpose.msk.msra.mxu1 %vm8768_vm10, %v8747_v53  ;;  %vm9438_vm8 = vnez %v9364_v51  ;;  %v4036_v46 = vpop.f32.mrf.mxu0 }
 0x83a   : > { %5464 = vmatpush.bf16.xpose.msk.msra.mxu3 %vm9420_vm6, %v5463_v44  ;;  %vm9442_vm6 = vnez %v9415_v62 }
 0x83b   : > { %4451 = vmatmul.bf16.vlgmr.msrb.gmra.mxu3 %v5387_v41 }
 0x841   : > { %5397 = vmatpush.bf16.xpose.msk.msra.mxu0 %vm8544_vm12, %v8562_v50  ;;  %5421 = vmatpush.bf16.xpose.msk.msra.mxu1 %vm8785_vm2, %v8772_v1  ;;  %vm9439_vm12 = vnez %v9410_v0  ;;  %v4709_v50 = vld [vmem:[#allocation2 + $0x119] sm:$0xff]  ;;  %v9449_v0 = vld [vmem:[#allocation11_spill] sm:$0xff] }
 0x842   : > { %5467 = vmatpush.bf16.xpose.msk.msra.mxu3 %vm9421_vm14, %v8862_v34  ;;  %vm9443_vm14 = vnez %v9370_v61  ;;  %v4727_v51 = vpack.c.bf16 %v4709_v50, %v4708_v57  ;;  %v4701_v34 = vld [vmem:[#allocation2 + $0xd9] sm:$0xff] }
 0x849   : > { %5400 = vmatpush.bf16.xpose.msk.msra.mxu0 %vm8558_vm5, %v8574_v16  ;;  %5424 = vmatpush.bf16.xpose.msk.msra.mxu1 %vm8802_vm4, %v8789_v36  ;;  %vm9440_vm5 = vnez %v9388_v42  ;;  %v4474_v16 = vld [vmem:[#allocation2 + $0x92] sm:$0xff]  ;;  %v5388_v42 = vld [vmem:[%s9095_s14 + $0x5] sm:$0x1] }
 0x84a   : > { %5470 = vmatpush.bf16.xpose.msk.msra.mxu3 %vm9422_vm13, %v8637_v14  ;;  %vm9444_vm13 = vnez %v9419_v25  ;;  %v4691_v14 = vld [vmem:[#allocation2 + $0x89] sm:$0xff] }
 0x84b   : > { %v4718_v61 = vpack.c.bf16 %v4691_v14, %v8869_v32 }
 0x851   : > { %5403 = vmatpush.bf16.xpose.msk.msra.mxu0 %vm8570_vm15, %v8588_v54  ;;  %5427 = vmatpush.bf16.xpose.msk.msra.mxu1 %vm9437_vm1, %v8806_v31  ;;  %vm9441_vm15 = vnez %v9367_v52  ;;  %v5435_v54 = vpack.c.bf16 %v4475_v28, %v4474_v16  ;;  %v4786_v52 = vld [vmem:[#allocation2 + $0x112] sm:$0xff] }
 0x852   : > { %5473 = vmatpush.bf16.xpose.msk.msra.mxu3 %vm9423_vm9, %v8649_v58 }
 0x859   : > { %5406 = vmatpush.bf16.xpose.msk.msra.mxu0 %vm9438_vm8, %v8600_v3  ;;  %5430 = vmatpush.bf16.xpose.msk.msra.mxu1 %vm9439_vm12, %v8823_v19  ;;  %v4787_v3 = vld [vmem:[#allocation2 + $0x11a] sm:$0xff] }
 0x85a   : > { %5476 = vmatpush.bf16.xpose.msk.msra.mxu3 %vm9425_vm3, %v8661_v7  ;;  %v5513_v40 = vpack.c.bf16 %v4787_v3, %v4786_v52 }
 0x861   : > { %5409 = vmatpush.bf16.xpose.msk.msra.mxu0 %vm9441_vm15, %v8613_v8  ;;  %5433 = vmatpush.bf16.xpose.msk.msra.mxu1 %vm9442_vm6, %v8840_v35  ;;  %v4060_v8 = vpop.f32.mrf.mxu3 }
 0x862   : > { %5479 = vmatpush.bf16.xpose.msk.msra.mxu3 %vm9440_vm5, %v8679_v43  ;;  %v4061_v27 = vadd.f32 %v4060_v8, %v4034_v59 }
 0x869   : > { %5412 = vmatpush.bf16.xpose.msk.msra.mxu0 %vm9443_vm14, %v8845_v33  ;;  %5436 = vmatpush.bf16.xpose.msk.msra.mxu1 %vm9444_vm13, %v5435_v54  ;;  %v4062_v58 = vpop.f32.mrf.mxu3  ;;  %v4724_v33 = vpack.c.bf16 %v9445_v26, %v4702_v18 }
 0x86a   : > { %5482 = vmatpush.bf16.xpose.msk.msra.mxu3 %vm9432_vm7, %v9427_v45  ;;  %v4697_v45 = vld [vmem:[#allocation2 + $0xb9] sm:$0xff] }
 0x86d   : > { %v4251_v7 = vpop.f32.mrf.mxu0  ;;  %v4264_v43 = vpop.f32.mrf.mxu1 }
 0x86e   : > { %v4268_v13 = vadd.f32 %v4251_v7, %v4048_v37  ;;  %v4269_v6 = vadd.f32 %v4264_v43, %v4061_v27 }
 0x870   : > { %4548 = vmatmul.bf16.vlgmr.msra.gmra.mxu0 %v5388_v42  ;;  %4561 = vmatmul.bf16.vlgmr.msra.gmra.mxu1 %v5388_v42 }
 0x871   : > { %4728 = vmatpush.bf16.xpose.msrb.mxu0 %v4422_v60  ;;  %4741 = vmatpush.bf16.xpose.msrb.mxu1 %v4727_v51 }
 0x872   : > { %5485 = vmatpush.bf16.xpose.msk.msra.mxu3 %vm8750_vm11, %v9431_v9  ;;  %v5618_v9 = vld [vmem:[%s9084_s3] ss:$0 sm:$0xff]  ;;  %vm9450_vm11 = vcmask 1041408  }
 0x873   : > { %4879 = vperm.xlu0 %5615, %v5618_v9   ;;  %4884 = vperm.xlu2 %5614, %v5618_v9  }
 0x875   : > { %v4253_v24 = vpop.f32.mrf.mxu0  ;;  %v4266_v21 = vpop.f32.mrf.mxu1 }
 0x876   : > { %v4875_v24 = vld [vmem:[%s550_s25] sm:$0xf] }
 0x879   : > { %4729 = vmatpush.bf16.xpose.msrb.mxu0 %v4718_v61  ;;  %4742 = vmatpush.bf16.xpose.msrb.mxu1 %v8889_v63  ;;  %v4700_v63 = vld [vmem:[#allocation2 + $0xd1] sm:$0xff] }
 0x87a   : > { %5514 = vmatpush.bf16.xpose.msk.msrb.mxu3 %vm8742_vm0, %v5513_v40 }
 0x87b   : > { %4671 = vmatmul.bf16.vlgmr.msra.gmra.mxu3 %v5437_v15  ;;  %5616 = vset.pattern.permute.xlu0 %v5956_v29  ;;  %v4661_v15 = vpop.f32.mrf.mxu2 }
 0x87e   : > { %v4361_v32 = vpop.f32.mrf.mxu3 }
 0x881   : > { %4730 = vmatpush.bf16.xpose.msrb.mxu0 %v8898_v22  ;;  %4743 = vmatpush.bf16.xpose.msrb.mxu1 %v8628_v10  ;;  %v9446_v10 = vld [vmem:[#allocation8_spill] sm:$0xff]  ;;  %v4723_v22 = vpack.c.bf16 %v4701_v34, %v4700_v63 }
 0x882   : > { %5517 = vmatpush.bf16.xpose.msk.msrb.mxu3 %vm8768_vm10, %v8946_v38  ;;  %v5486_v38 = vld [vmem:[%s9095_s14 + $0x7] sm:$0x1] }
 0x883   : > { %v4847_v51 = vpop.f32.mrf.mxu2 }
 0x886   : > { %v4363_v44 = vpop.f32.mrf.mxu3 }
 0x889   : > { %4731 = vmatpush.bf16.xpose.msrb.mxu0 %v8908_v48  ;;  %4744 = vmatpush.bf16.xpose.msrb.mxu1 %v4724_v33  ;;  %v4699_v48 = vld [vmem:[#allocation2 + $0xc9] sm:$0xff] }
 0x88a   : > { %5520 = vmatpush.bf16.xpose.msk.msrb.mxu3 %vm8785_vm2, %v8747_v53  ;;  %v4378_v53 = vadd.f32 %v4361_v32, %v4268_v13 }
 0x88b   : > { %v4849_v54 = vpop.f32.mrf.mxu2 }
 0x891   : > { %4732 = vmatpush.bf16.xpose.msrb.mxu0 %v9446_v10  ;;  %4745 = vmatpush.bf16.xpose.msrb.mxu1 %v4723_v22 }
 0x892   : > { %5523 = vmatpush.bf16.xpose.msk.msrb.mxu3 %vm8802_vm4, %v8772_v1  ;;  %v4698_v1 = vld [vmem:[#allocation2 + $0xc1] sm:$0xff] }
 0x893   : > { %v4722_v30 = vpack.c.bf16 %v4699_v48, %v4698_v1 }
 0x899   : > { %4733 = vmatpush.bf16.xpose.msrb.mxu0 %v9447_v49  ;;  %4746 = vmatpush.bf16.xpose.msrb.mxu1 %v4722_v30 }
 0x89a   : > { %5526 = vmatpush.bf16.xpose.msk.msrb.mxu3 %vm9437_vm1, %v8789_v36  ;;  %v4696_v36 = vld [vmem:[#allocation2 + $0xb1] sm:$0xff] }
 0x89b   : > { %v4721_v2 = vpack.c.bf16 %v4697_v45, %v4696_v36 }
 0x8a1   : > { %4734 = vmatpush.bf16.xpose.msrb.mxu0 %v9448_v4  ;;  %4747 = vmatpush.bf16.xpose.msrb.mxu1 %v4721_v2 }
 0x8a2   : > { %5529 = vmatpush.bf16.xpose.msk.msrb.mxu3 %vm9439_vm12, %v8806_v31  ;;  %v4694_v31 = vld [vmem:[#allocation2 + $0xa1] sm:$0xff] }
 0x8a3   : > { %v4720_v23 = vpack.c.bf16 %v4695_v20, %v4694_v31 }
 0x8a5   : > { %v4870_v7 = vpop.permute.xlu1 %4869 }
 0x8a9   : > { %4735 = vmatpush.bf16.xpose.msrb.mxu0 %v9449_v0  ;;  %4748 = vmatpush.bf16.xpose.msrb.mxu1 %v4720_v23 }
 0x8aa   : > { %5532 = vmatpush.bf16.xpose.msk.msrb.mxu3 %vm9442_vm6, %v8823_v19 }
 0x8ad   : > { %v4374_v39 = vpop.f32.mrf.mxu0  ;;  %v4439_v19 = vpop.f32.mrf.mxu1 }
 0x8ae   : > { %v4379_v62 = vadd.f32 %v4374_v39, %v4269_v6  ;;  %v4456_v60 = vadd.f32 %v4439_v19, %v4378_v53 }
 0x8b0   : > { %4736 = vmatmul.bf16.vlgmr.msrb.gmra.mxu0 %v5486_v38  ;;  %4749 = vmatmul.bf16.vlgmr.msrb.gmra.mxu1 %v5486_v38 }
 0x8b2   : > { %5535 = vmatpush.bf16.xpose.msk.msrb.mxu3 %vm9444_vm13, %v8840_v35 }
 0x8b5   : > { %v4376_v5 = vpop.f32.mrf.mxu0  ;;  %v4441_v41 = vpop.f32.mrf.mxu1 }
 0x8b9   : > { %4859 = vmatmul.bf16.vlgmr.msrb.gmra.mxu3 %v5487_v55 }
 0x8be   : > { %v4452_v47 = vpop.f32.mrf.mxu3 }
 0x8bf   : > { %v4457_v56 = vadd.f32 %v4452_v47, %v4379_v62 }
 0x8c6   : > { %v4454_v37 = vpop.f32.mrf.mxu3 }
 0x8cd   : > { %v4885_v33 = vpop.permute.xlu2 %4884 }
 0x8e5   : > { %v4880_v26 = vpop.permute.xlu0 %4879 }
 0x8e6   : > { %v4882_v34 = vmul.f32 %v4880_v26, %v4875_v24 }
 0x8ed   : > { %v4549_v59 = vpop.f32.mrf.mxu0  ;;  %v4562_v50 = vpop.f32.mrf.mxu1 }
 0x8ee   : > { %v4566_v46 = vadd.f32 %v4549_v59, %v4456_v60  ;;  %v4567_v42 = vadd.f32 %v4562_v50, %v4457_v56 }
 0x8f0   : > { %v4676_v57 = vadd.f32 %v4659_v11, %v4566_v46 }
 0x8f5   : > { %v4551_v25 = vpop.f32.mrf.mxu0  ;;  %v4564_v35 = vpop.f32.mrf.mxu1 }
 0x8fe   : > { %v4672_v28 = vpop.f32.mrf.mxu3 }
 0x8ff   : > { %v4677_v40 = vadd.f32 %v4672_v28, %v4567_v42 }
 0x906   : > { %v4674_v16 = vpop.f32.mrf.mxu3 }
 0x92d   : > { %v4737_v52 = vpop.f32.mrf.mxu0  ;;  %v4750_v3 = vpop.f32.mrf.mxu1 }
 0x92e   : > { %v4754_v14 = vadd.f32 %v4737_v52, %v4676_v57  ;;  %v4755_v58 = vadd.f32 %v4750_v3, %v4677_v40 }
 0x930   : > { %v4864_v27 = vadd.f32 %v4847_v51, %v4754_v14 }
 0x932   : > { %v4872_v6 = vadd.f32 %v4870_v7, %v4864_v27 }
 0x934   : > { %v4887_v32 = vmul.f32 %v4885_v33, %v4872_v6 }
 0x935   : > { %v4739_v8 = vpop.f32.mrf.mxu0  ;;  %v4752_v61 = vpop.f32.mrf.mxu1 }
 0x93c   : > { %v4860_v13 = vpop.f32.mrf.mxu3 }
 0x93d   : > { %v4865_v43 = vadd.f32 %v4860_v13, %v4755_v58 }
 0x93f   : > { %v4873_v18 = vadd.f32 %v4870_v7, %v4865_v43 }
 0x941   : > { %v4888_v21 = vmul.f32 %v4885_v33, %v4873_v18 }
 0x943   : > { %v4891_v10 = vrot.slane %v4888_v21, 6 }
 0x944   : > { %v4862_v55 = vpop.f32.mrf.mxu3 }
 0x945   : > { %v4892_v53 = vsel %vm9450_vm11, %v4887_v32, %v4891_v10 }
 0x946   : > { %v4894_v63 = vadd.f32 %v4892_v53, %v4882_v34 }
 0x948   : > { %4895 = vst [vmem:[%s555_s27] sm:$0xf] %v4894_v63 }
 0x949 PF: > { %s26_s21 = sadd.s32 1, %s5951_s21  }
 0x94a   : > { %p23_p4 = scmp.ge.s32.totalorder %s26_s21, 4  }
 0x94c   :  { %25 = sbr.rel (!%p23_p4) target bundleno = 2 (0x2), region = 128 }

</bundles_post_ra>
